<compile_context>
chip_gen: v6e
topology: v6e:2x2x1
jax: 0.10.0
libtpu: 0.0.40
codegen_flags: <defaults>
</compile_context>

<pallas_src>
import functools

import jax
import jax.numpy as jnp
from jax.experimental import pallas as pl
from jax.experimental.pallas import tpu as pltpu  # noqa: F401  (TPU backend)

# ---------------- config (small, deterministic) ----------------
VOCAB = 256
HIDDEN = 64
N_HEADS = 4
N_KV_HEADS = 2
HEAD_DIM = HIDDEN // N_HEADS        # 16
INTER = 128
N_LAYERS = 2
SEQ = 8
EPS = 1e-5
ROPE_THETA = 10000.0
LOGIT_SCALE = 0.0625
DTYPE = jnp.float32                 # bf16 viable on v6e/v7x; f32 keeps toy numerics exact

GROUPS = N_HEADS // N_KV_HEADS      # GQA group size
DH = HEAD_DIM // 2                  # rotary pair count per head
Q_SIZE = N_HEADS * HEAD_DIM         # 64
KV_SIZE = N_KV_HEADS * HEAD_DIM     # 32


# ---------------- small in-kernel helpers ----------------
def _dot_nt(a, b):
    """a @ b.T via dot_general (contract last dims) — no transpose materialized."""
    return jax.lax.dot_general(a, b, (((1,), (1,)), ((), ())),
                               preferred_element_type=jnp.float32)


def _layernorm_f32(x, w):
    """Cohere LayerNorm: mean-subtract, rsqrt(var), * weight (no bias). f32 math."""
    mean = jnp.mean(x, axis=-1, keepdims=True)
    xc = x - mean
    var = jnp.mean(xc * xc, axis=-1, keepdims=True)
    return xc * jax.lax.rsqrt(var + EPS) * w


# ---------------- fused transformer layer kernel ----------------
def _layer_kernel(h_ref, res_ref, lnw_ref,
                  wqe_ref, wqo_ref, wke_ref, wko_ref, wv_ref, wo_ref,
                  wg_ref, wu_ref, wd_ref, cos_ref, sin_ref,
                  out_h_ref, out_res_ref, *, add_residual, softmax_scale):
    # ---- residual add (skipped statically on layer 0) + LayerNorm ----
    x = h_ref[...].astype(jnp.float32)
    if add_residual:
        x = x + res_ref[...].astype(jnp.float32)
    out_res_ref[...] = x.astype(out_res_ref.dtype)

    normed = _layernorm_f32(x, lnw_ref[...].astype(jnp.float32))
    normed = normed.astype(h_ref.dtype)

    cos = cos_ref[...].astype(jnp.float32)          # (T, HEAD_DIM//2)
    sin = sin_ref[...].astype(jnp.float32)

    T = x.shape[0]
    row = jax.lax.broadcasted_iota(jnp.int32, (T, T), 0)
    col = jax.lax.broadcasted_iota(jnp.int32, (T, T), 1)
    causal = row >= col

    # ---- K/V: project + rotate each kv head ONCE, reuse for its q-head group ----
    k_rot, v_heads = [], []
    for kv in range(N_KV_HEADS):
        ke = jnp.dot(normed, wke_ref[kv], preferred_element_type=jnp.float32)
        ko = jnp.dot(normed, wko_ref[kv], preferred_element_type=jnp.float32)
        # Cohere interleaved rotary on the (even, odd) pair
        k_rot.append((ke * cos - ko * sin, ke * sin + ko * cos))
        v_heads.append(jnp.dot(normed, wv_ref[kv], preferred_element_type=jnp.float32))

    # ---- causal attention, per query head (tiny T x D tiles: roofline here is
    #      memory movement / launch overhead, not MXU flops) ----
    attn_out = jnp.zeros((T, HIDDEN), dtype=jnp.float32)
    for h in range(N_HEADS):
        kv = h // GROUPS                            # GQA head mapping (no repeat)
        qe = jnp.dot(normed, wqe_ref[h], preferred_element_type=jnp.float32)
        qo = jnp.dot(normed, wqo_ref[h], preferred_element_type=jnp.float32)
        qe_r = qe * cos - qo * sin
        qo_r = qe * sin + qo * cos
        ke_r, ko_r = k_rot[kv]

        # q.k over head_dim == even-part dot + odd-part dot (layout invariant)
        s = (_dot_nt(qe_r, ke_r) + _dot_nt(qo_r, ko_r)) * softmax_scale
        s = jnp.where(causal, s, -1e30)             # finite mask: no inf-inf NaN risk
        s = s - jnp.max(s, axis=-1, keepdims=True)
        p = jnp.exp(s)
        p = p * pl.reciprocal(jnp.sum(p, axis=-1, keepdims=True), approx=True)

        o_h = jnp.dot(p, v_heads[kv], preferred_element_type=jnp.float32)
        # O-projection folded into the head loop: sum_h o_h @ Wo[h]
        attn_out = attn_out + jnp.dot(o_h.astype(wo_ref.dtype), wo_ref[h],
                                      preferred_element_type=jnp.float32)

    # ---- parallel MLP branch on the same LayerNorm output ----
    g = jnp.dot(normed, wg_ref[...], preferred_element_type=jnp.float32)
    u = jnp.dot(normed, wu_ref[...], preferred_element_type=jnp.float32)
    mid = (jax.nn.silu(g) * u).astype(wd_ref.dtype)
    mlp_out = jnp.dot(mid, wd_ref[...], preferred_element_type=jnp.float32)

    out_h_ref[...] = (attn_out + mlp_out).astype(out_h_ref.dtype)
    # TODO(synk): paged KV-cache write (reshape_and_cache / block_tables) and the
    #             decode path are not modelled -- prefill only, TP=1, no adapters.


def cohere_layer(hidden, residual, layer, cos, sin, *, add_residual):
    T, H = hidden.shape
    kernel = functools.partial(_layer_kernel, add_residual=add_residual,
                               softmax_scale=HEAD_DIM ** -0.5)
    return pl.pallas_call(
        kernel,
        out_shape=(jax.ShapeDtypeStruct((T, H), hidden.dtype),   # new hidden
                   jax.ShapeDtypeStruct((T, H), hidden.dtype)),  # new residual
    )(hidden, residual, layer["ln_w"].reshape(1, H),
      layer["wq_e"], layer["wq_o"], layer["wk_e"], layer["wk_o"],
      layer["wv"], layer["wo"], layer["wg"], layer["wu"], layer["wd"],
      cos, sin)


# ---------------- fused final LayerNorm + tied lm_head kernel ----------------
def _final_kernel(h_ref, res_ref, lnw_ref, emb_ref, hid_out_ref, logit_ref,
                  *, logit_scale):
    x = h_ref[...].astype(jnp.float32) + res_ref[...].astype(jnp.float32)
    normed = _layernorm_f32(x, lnw_ref[...].astype(jnp.float32)).astype(hid_out_ref.dtype)
    hid_out_ref[...] = normed
    # hidden @ embed^T via transposed contraction on the MXU (no embed.T array)
    logits = _dot_nt(normed, emb_ref[...])
    logit_ref[...] = (logits * logit_scale).astype(logit_ref.dtype)


def final_norm_lm_head(hidden, residual, ln_w, embed):
    T, H = hidden.shape
    V = embed.shape[0]
    return pl.pallas_call(
        functools.partial(_final_kernel, logit_scale=LOGIT_SCALE),
        out_shape=(jax.ShapeDtypeStruct((T, H), hidden.dtype),
                   jax.ShapeDtypeStruct((T, V), hidden.dtype)),
    )(hidden, residual, ln_w.reshape(1, H), embed)


# ---------------- weight prep, rotary tables, params, model loop ----------------
def get_cos_sin(position_ids, dim, theta, dtype):
    inv_freq = 1.0 / (theta ** (jnp.arange(0, dim, 2, dtype=jnp.float32) / dim))
    freqs = position_ids.astype(jnp.float32)[:, None] * inv_freq[None, :]
    return jnp.cos(freqs).astype(dtype), jnp.sin(freqs).astype(dtype)


def _split_attention_weights(wqkv, wo):
    """One-time re-layout of the fused QKV weight (hidden, (H+2KV)*D) and the
    O-proj weight (H*D, hidden) into per-head blocks with the rotary even/odd
    columns split, so the kernel never needs strided slices."""
    q_w = wqkv[:, :Q_SIZE].reshape(HIDDEN, N_HEADS, HEAD_DIM)
    k_w = wqkv[:, Q_SIZE:Q_SIZE + KV_SIZE].reshape(HIDDEN, N_KV_HEADS, HEAD_DIM)
    v_w = wqkv[:, Q_SIZE + KV_SIZE:].reshape(HIDDEN, N_KV_HEADS, HEAD_DIM)
    wq_e = jnp.transpose(q_w[:, :, 0::2], (1, 0, 2))   # (H,  hidden, D/2)
    wq_o = jnp.transpose(q_w[:, :, 1::2], (1, 0, 2))
    wk_e = jnp.transpose(k_w[:, :, 0::2], (1, 0, 2))   # (KV, hidden, D/2)
    wk_o = jnp.transpose(k_w[:, :, 1::2], (1, 0, 2))
    wv = jnp.transpose(v_w, (1, 0, 2))                 # (KV, hidden, D)
    wo_h = wo.reshape(N_HEADS, HEAD_DIM, HIDDEN)       # per-head rows of o_proj
    return wq_e, wq_o, wk_e, wk_o, wv, wo_h


def init_params(key):
    def nrm(k, shape, scale=0.02):
        return (scale * jax.random.normal(k, shape, dtype=jnp.float32)).astype(DTYPE)

    keys = jax.random.split(key, 2 + N_LAYERS)
    embed = nrm(keys[0], (VOCAB, HIDDEN))
    qkv_out = (N_HEADS + 2 * N_KV_HEADS) * HEAD_DIM
    layers = []
    for li in range(N_LAYERS):
        ks = jax.random.split(keys[2 + li], 8)
        wqkv = nrm(ks[1], (HIDDEN, qkv_out))            # canonical fused [q|k|v] (x @ W)
        wo = nrm(ks[2], (N_HEADS * HEAD_DIM, HIDDEN))
        wq_e, wq_o, wk_e, wk_o, wv, wo_h = _split_attention_weights(wqkv, wo)
        layers.append(dict(
            ln_w=1.0 + nrm(ks[0], (HIDDEN,)),
            wq_e=wq_e, wq_o=wq_o, wk_e=wk_e, wk_o=wk_o, wv=wv, wo=wo_h,
            wg=nrm(ks[3], (HIDDEN, INTER)),
            wu=nrm(ks[4], (HIDDEN, INTER)),
            wd=nrm(ks[5], (INTER, HIDDEN)),
        ))
    final_ln_w = 1.0 + nrm(keys[1], (HIDDEN,))
    return dict(embed=embed, layers=layers, final_ln_w=final_ln_w)  # lm_head tied


def flash_cohere_forward(params, input_ids, position_ids, lm_head_indices=None):
    hidden = params["embed"][input_ids]                    # (T, HIDDEN)
    cos, sin = get_cos_sin(position_ids, HEAD_DIM, ROPE_THETA, hidden.dtype)

    residual = hidden    # placeholder for layer 0; the kernel skips the add statically
    for li, layer in enumerate(params["layers"]):
        hidden, residual = cohere_layer(hidden, residual, layer, cos, sin,
                                        add_residual=(li > 0))
        # all_reduce omitted (TP world size 1)

    hidden, logits = final_norm_lm_head(hidden, residual, params["final_ln_w"],
                                        params["embed"])
    if lm_head_indices is not None:
        # TODO(synk): for real decode, gather rows before the lm_head contraction.
        hidden = hidden[lm_head_indices]
        logits = logits[lm_head_indices]
    return logits, hidden


if __name__ == "__main__":
    key = jax.random.PRNGKey(0)
    pkey, ikey = jax.random.split(key)
    params = init_params(pkey)

    input_ids = jax.random.randint(ikey, (SEQ,), 0, VOCAB, dtype=jnp.int32)
    position_ids = jnp.arange(SEQ, dtype=jnp.int32)

    fwd = jax.jit(flash_cohere_forward)
    logits, hidden = fwd(params, input_ids, position_ids)
    jax.block_until_ready((logits, hidden))

    assert logits.shape == (SEQ, VOCAB), logits.shape
    assert hidden.shape == (SEQ, HIDDEN), hidden.shape
    assert bool(jnp.all(jnp.isfinite(logits)))
    print("KERNEL_OK")
</pallas_src>

<mosaic_0001>
module attributes {stable_mosaic.version = 11 : i64} {
  func.func @_final_kernel(%arg0: memref<8x64xf32, #tpu.memory_space<vmem>>, %arg1: memref<8x64xf32, #tpu.memory_space<vmem>>, %arg2: memref<1x64xf32, #tpu.memory_space<vmem>>, %arg3: memref<256x64xf32, #tpu.memory_space<vmem>>, %arg4: memref<8x64xf32, #tpu.memory_space<vmem>>, %arg5: memref<8x256xf32, #tpu.memory_space<vmem>>) attributes {dimension_semantics = [], scalar_prefetch = 0 : i64, scratch_operands = 0 : i64, tpu.core_type = #tpu.core_type<tc>} {
    %c0 = arith.constant 0 : index
    %c0_0 = arith.constant 0 : index
    %0 = vector.load %arg0[%c0, %c0_0] : memref<8x64xf32, #tpu.memory_space<vmem>>, vector<8x64xf32>
    %c0_1 = arith.constant 0 : index
    %c0_2 = arith.constant 0 : index
    %1 = vector.load %arg1[%c0_1, %c0_2] : memref<8x64xf32, #tpu.memory_space<vmem>>, vector<8x64xf32>
    %2 = arith.addf %0, %1 : vector<8x64xf32>
    %c0_3 = arith.constant 0 : index
    %c0_4 = arith.constant 0 : index
    %3 = vector.load %arg2[%c0_3, %c0_4] : memref<1x64xf32, #tpu.memory_space<vmem>>, vector<1x64xf32>
    %cst = arith.constant dense<0.000000e+00> : vector<8xf32>
    %4 = vector.multi_reduction <add>, %2, %cst [1] : vector<8x64xf32> to vector<8xf32>
    %5 = vector.shape_cast %4 : vector<8xf32> to vector<8x1xf32>
    %cst_5 = arith.constant 6.400000e+01 : f32
    %6 = vector.broadcast %cst_5 : f32 to vector<8x1xf32>
    %7 = arith.divf %5, %6 : vector<8x1xf32>
    %8 = vector.broadcast %7 : vector<8x1xf32> to vector<8x64xf32>
    %9 = arith.subf %2, %8 : vector<8x64xf32>
    %10 = arith.mulf %9, %9 : vector<8x64xf32>
    %cst_6 = arith.constant dense<0.000000e+00> : vector<8xf32>
    %11 = vector.multi_reduction <add>, %10, %cst_6 [1] : vector<8x64xf32> to vector<8xf32>
    %12 = vector.shape_cast %11 : vector<8xf32> to vector<8x1xf32>
    %cst_7 = arith.constant 6.400000e+01 : f32
    %13 = vector.broadcast %cst_7 : f32 to vector<8x1xf32>
    %14 = arith.divf %12, %13 : vector<8x1xf32>
    %cst_8 = arith.constant 9.99999974E-6 : f32
    %15 = vector.broadcast %cst_8 : f32 to vector<8x1xf32>
    %16 = arith.addf %14, %15 : vector<8x1xf32>
    %17 = math.rsqrt %16 : vector<8x1xf32>
    %18 = vector.broadcast %17 : vector<8x1xf32> to vector<8x64xf32>
    %19 = arith.mulf %9, %18 : vector<8x64xf32>
    %20 = vector.broadcast %3 : vector<1x64xf32> to vector<8x64xf32>
    %21 = arith.mulf %19, %20 : vector<8x64xf32>
    %c0_9 = arith.constant 0 : index
    %c0_10 = arith.constant 0 : index
    %22 = vector.load %arg4[%c0_9, %c0_10] : memref<8x64xf32, #tpu.memory_space<vmem>>, vector<8x64xf32>
    tpu.vector_store %arg4[%c0_9, %c0_10], %21 {strides = array<i32>} : memref<8x64xf32, #tpu.memory_space<vmem>>, vector<8x64xf32>,
    %c0_11 = arith.constant 0 : index
    %c0_12 = arith.constant 0 : index
    %23 = vector.load %arg3[%c0_11, %c0_12] : memref<256x64xf32, #tpu.memory_space<vmem>>, vector<256x64xf32>
    %cst_13 = arith.constant dense<0.000000e+00> : vector<8x256xf32>
    %24 = tpu.matmul %21, %23, %cst_13 {dimension_numbers = #tpu.dot_dimension_numbers<[1], [1], [0], [0], [0, 0, 1, 0], [], []>} : vector<8x64xf32>, vector<256x64xf32>, vector<8x256xf32> -> vector<8x256xf32>
    %cst_14 = arith.constant 6.250000e-02 : f32
    %25 = vector.broadcast %cst_14 : f32 to vector<8x256xf32>
    %26 = arith.mulf %24, %25 : vector<8x256xf32>
    %c0_15 = arith.constant 0 : index
    %c0_16 = arith.constant 0 : index
    %27 = vector.load %arg5[%c0_15, %c0_16] : memref<8x256xf32, #tpu.memory_space<vmem>>, vector<8x256xf32>
    tpu.vector_store %arg5[%c0_15, %c0_16], %26 {strides = array<i32>} : memref<8x256xf32, #tpu.memory_space<vmem>>, vector<8x256xf32>,
    return
  }
}

module attributes {stable_mosaic.version = 11 : i64} {
  func.func @_layer_kernel(%arg0: memref<8x64xf32, #tpu.memory_space<vmem>>, %arg1: memref<8x64xf32, #tpu.memory_space<vmem>>, %arg2: memref<1x64xf32, #tpu.memory_space<vmem>>, %arg3: memref<4x64x8xf32, #tpu.memory_space<vmem>>, %arg4: memref<4x64x8xf32, #tpu.memory_space<vmem>>, %arg5: memref<2x64x8xf32, #tpu.memory_space<vmem>>, %arg6: memref<2x64x8xf32, #tpu.memory_space<vmem>>, %arg7: memref<2x64x16xf32, #tpu.memory_space<vmem>>, %arg8: memref<4x16x64xf32, #tpu.memory_space<vmem>>, %arg9: memref<64x128xf32, #tpu.memory_space<vmem>>, %arg10: memref<64x128xf32, #tpu.memory_space<vmem>>, %arg11: memref<128x64xf32, #tpu.memory_space<vmem>>, %arg12: memref<8x8xf32, #tpu.memory_space<vmem>>, %arg13: memref<8x8xf32, #tpu.memory_space<vmem>>, %arg14: memref<8x64xf32, #tpu.memory_space<vmem>>, %arg15: memref<8x64xf32, #tpu.memory_space<vmem>>) attributes {dimension_semantics = [], scalar_prefetch = 0 : i64, scratch_operands = 0 : i64, tpu.core_type = #tpu.core_type<tc>} {
    %c0 = arith.constant 0 : index
    %c0_0 = arith.constant 0 : index
    %0 = vector.load %arg0[%c0, %c0_0] : memref<8x64xf32, #tpu.memory_space<vmem>>, vector<8x64xf32>
    %c0_1 = arith.constant 0 : index
    %c0_2 = arith.constant 0 : index
    %1 = vector.load %arg15[%c0_1, %c0_2] : memref<8x64xf32, #tpu.memory_space<vmem>>, vector<8x64xf32>
    tpu.vector_store %arg15[%c0_1, %c0_2], %0 {strides = array<i32>} : memref<8x64xf32, #tpu.memory_space<vmem>>, vector<8x64xf32>,
    %c0_3 = arith.constant 0 : index
    %c0_4 = arith.constant 0 : index
    %2 = vector.load %arg2[%c0_3, %c0_4] : memref<1x64xf32, #tpu.memory_space<vmem>>, vector<1x64xf32>
    %cst = arith.constant dense<0.000000e+00> : vector<8xf32>
    %3 = vector.multi_reduction <add>, %0, %cst [1] : vector<8x64xf32> to vector<8xf32>
    %4 = vector.shape_cast %3 : vector<8xf32> to vector<8x1xf32>
    %cst_5 = arith.constant 6.400000e+01 : f32
    %5 = vector.broadcast %cst_5 : f32 to vector<8x1xf32>
    %6 = arith.divf %4, %5 : vector<8x1xf32>
    %7 = vector.broadcast %6 : vector<8x1xf32> to vector<8x64xf32>
    %8 = arith.subf %0, %7 : vector<8x64xf32>
    %9 = arith.mulf %8, %8 : vector<8x64xf32>
    %cst_6 = arith.constant dense<0.000000e+00> : vector<8xf32>
    %10 = vector.multi_reduction <add>, %9, %cst_6 [1] : vector<8x64xf32> to vector<8xf32>
    %11 = vector.shape_cast %10 : vector<8xf32> to vector<8x1xf32>
    %cst_7 = arith.constant 6.400000e+01 : f32
    %12 = vector.broadcast %cst_7 : f32 to vector<8x1xf32>
    %13 = arith.divf %11, %12 : vector<8x1xf32>
    %cst_8 = arith.constant 9.99999974E-6 : f32
    %14 = vector.broadcast %cst_8 : f32 to vector<8x1xf32>
    %15 = arith.addf %13, %14 : vector<8x1xf32>
    %16 = math.rsqrt %15 : vector<8x1xf32>
    %17 = vector.broadcast %16 : vector<8x1xf32> to vector<8x64xf32>
    %18 = arith.mulf %8, %17 : vector<8x64xf32>
    %19 = vector.broadcast %2 : vector<1x64xf32> to vector<8x64xf32>
    %20 = arith.mulf %18, %19 : vector<8x64xf32>
    %c0_9 = arith.constant 0 : index
    %c0_10 = arith.constant 0 : index
    %21 = vector.load %arg12[%c0_9, %c0_10] : memref<8x8xf32, #tpu.memory_space<vmem>>, vector<8x8xf32>
    %c0_11 = arith.constant 0 : index
    %c0_12 = arith.constant 0 : index
    %22 = vector.load %arg13[%c0_11, %c0_12] : memref<8x8xf32, #tpu.memory_space<vmem>>, vector<8x8xf32>
    %23 = tpu.iota {dimensions = array<i32: 0>} : vector<8x8xi32>
    %24 = tpu.iota {dimensions = array<i32: 1>} : vector<8x8xi32>
    %25 = arith.cmpi sge, %23, %24 : vector<8x8xi32>
    %c0_13 = arith.constant 0 : index
    %c0_14 = arith.constant 0 : index
    %c0_15 = arith.constant 0 : index
    %26 = vector.load %arg5[%c0_13, %c0_14, %c0_15] : memref<2x64x8xf32, #tpu.memory_space<vmem>>, vector<1x64x8xf32>
    %27 = vector.shape_cast %26 : vector<1x64x8xf32> to vector<64x8xf32>
    %cst_16 = arith.constant dense<0.000000e+00> : vector<8x8xf32>
    %28 = tpu.matmul %20, %27, %cst_16 {dimension_numbers = #tpu.dot_dimension_numbers<[1], [0], [0], [1], [0, 0, 1, 1], [], []>} : vector<8x64xf32>, vector<64x8xf32>, vector<8x8xf32> -> vector<8x8xf32>
    %c0_17 = arith.constant 0 : index
    %c0_18 = arith.constant 0 : index
    %c0_19 = arith.constant 0 : index
    %29 = vector.load %arg6[%c0_17, %c0_18, %c0_19] : memref<2x64x8xf32, #tpu.memory_space<vmem>>, vector<1x64x8xf32>
    %30 = vector.shape_cast %29 : vector<1x64x8xf32> to vector<64x8xf32>
    %cst_20 = arith.constant dense<0.000000e+00> : vector<8x8xf32>
    %31 = tpu.matmul %20, %30, %cst_20 {dimension_numbers = #tpu.dot_dimension_numbers<[1], [0], [0], [1], [0, 0, 1, 1], [], []>} : vector<8x64xf32>, vector<64x8xf32>, vector<8x8xf32> -> vector<8x8xf32>
    %32 = arith.mulf %28, %21 : vector<8x8xf32>
    %33 = arith.mulf %31, %22 : vector<8x8xf32>
    %34 = arith.subf %32, %33 : vector<8x8xf32>
    %35 = arith.mulf %28, %22 : vector<8x8xf32>
    %36 = arith.mulf %31, %21 : vector<8x8xf32>
    %37 = arith.addf %35, %36 : vector<8x8xf32>
    %c0_21 = arith.constant 0 : index
    %c0_22 = arith.constant 0 : index
    %c0_23 = arith.constant 0 : index
    %38 = vector.load %arg7[%c0_21, %c0_22, %c0_23] : memref<2x64x16xf32, #tpu.memory_space<vmem>>, vector<1x64x16xf32>
    %39 = vector.shape_cast %38 : vector<1x64x16xf32> to vector<64x16xf32>
    %cst_24 = arith.constant dense<0.000000e+00> : vector<8x16xf32>
    %40 = tpu.matmul %20, %39, %cst_24 {dimension_numbers = #tpu.dot_dimension_numbers<[1], [0], [0], [1], [0, 0, 1, 1], [], []>} : vector<8x64xf32>, vector<64x16xf32>, vector<8x16xf32> -> vector<8x16xf32>
    %c1 = arith.constant 1 : index
    %c0_25 = arith.constant 0 : index
    %c0_26 = arith.constant 0 : index
    %41 = vector.load %arg5[%c1, %c0_25, %c0_26] : memref<2x64x8xf32, #tpu.memory_space<vmem>>, vector<1x64x8xf32>
    %42 = vector.shape_cast %41 : vector<1x64x8xf32> to vector<64x8xf32>
    %cst_27 = arith.constant dense<0.000000e+00> : vector<8x8xf32>
    %43 = tpu.matmul %20, %42, %cst_27 {dimension_numbers = #tpu.dot_dimension_numbers<[1], [0], [0], [1], [0, 0, 1, 1], [], []>} : vector<8x64xf32>, vector<64x8xf32>, vector<8x8xf32> -> vector<8x8xf32>
    %c1_28 = arith.constant 1 : index
    %c0_29 = arith.constant 0 : index
    %c0_30 = arith.constant 0 : index
    %44 = vector.load %arg6[%c1_28, %c0_29, %c0_30] : memref<2x64x8xf32, #tpu.memory_space<vmem>>, vector<1x64x8xf32>
    %45 = vector.shape_cast %44 : vector<1x64x8xf32> to vector<64x8xf32>
    %cst_31 = arith.constant dense<0.000000e+00> : vector<8x8xf32>
    %46 = tpu.matmul %20, %45, %cst_31 {dimension_numbers = #tpu.dot_dimension_numbers<[1], [0], [0], [1], [0, 0, 1, 1], [], []>} : vector<8x64xf32>, vector<64x8xf32>, vector<8x8xf32> -> vector<8x8xf32>
    %47 = arith.mulf %43, %21 : vector<8x8xf32>
    %48 = arith.mulf %46, %22 : vector<8x8xf32>
    %49 = arith.subf %47, %48 : vector<8x8xf32>
    %50 = arith.mulf %43, %22 : vector<8x8xf32>
    %51 = arith.mulf %46, %21 : vector<8x8xf32>
    %52 = arith.addf %50, %51 : vector<8x8xf32>
    %c1_32 = arith.constant 1 : index
    %c0_33 = arith.constant 0 : index
    %c0_34 = arith.constant 0 : index
    %53 = vector.load %arg7[%c1_32, %c0_33, %c0_34] : memref<2x64x16xf32, #tpu.memory_space<vmem>>, vector<1x64x16xf32>
    %54 = vector.shape_cast %53 : vector<1x64x16xf32> to vector<64x16xf32>
    %cst_35 = arith.constant dense<0.000000e+00> : vector<8x16xf32>
    %55 = tpu.matmul %20, %54, %cst_35 {dimension_numbers = #tpu.dot_dimension_numbers<[1], [0], [0], [1], [0, 0, 1, 1], [], []>} : vector<8x64xf32>, vector<64x16xf32>, vector<8x16xf32> -> vector<8x16xf32>
    %cst_36 = arith.constant 0.000000e+00 : f32
    %56 = vector.broadcast %cst_36 : f32 to vector<8x64xf32>
    %c0_37 = arith.constant 0 : index
    %c0_38 = arith.constant 0 : index
    %c0_39 = arith.constant 0 : index
    %57 = vector.load %arg3[%c0_37, %c0_38, %c0_39] : memref<4x64x8xf32, #tpu.memory_space<vmem>>, vector<1x64x8xf32>
    %58 = vector.shape_cast %57 : vector<1x64x8xf32> to vector<64x8xf32>
    %cst_40 = arith.constant dense<0.000000e+00> : vector<8x8xf32>
    %59 = tpu.matmul %20, %58, %cst_40 {dimension_numbers = #tpu.dot_dimension_numbers<[1], [0], [0], [1], [0, 0, 1, 1], [], []>} : vector<8x64xf32>, vector<64x8xf32>, vector<8x8xf32> -> vector<8x8xf32>
    %c0_41 = arith.constant 0 : index
    %c0_42 = arith.constant 0 : index
    %c0_43 = arith.constant 0 : index
    %60 = vector.load %arg4[%c0_41, %c0_42, %c0_43] : memref<4x64x8xf32, #tpu.memory_space<vmem>>, vector<1x64x8xf32>
    %61 = vector.shape_cast %60 : vector<1x64x8xf32> to vector<64x8xf32>
    %cst_44 = arith.constant dense<0.000000e+00> : vector<8x8xf32>
    %62 = tpu.matmul %20, %61, %cst_44 {dimension_numbers = #tpu.dot_dimension_numbers<[1], [0], [0], [1], [0, 0, 1, 1], [], []>} : vector<8x64xf32>, vector<64x8xf32>, vector<8x8xf32> -> vector<8x8xf32>
    %63 = arith.mulf %59, %21 : vector<8x8xf32>
    %64 = arith.mulf %62, %22 : vector<8x8xf32>
    %65 = arith.subf %63, %64 : vector<8x8xf32>
    %66 = arith.mulf %59, %22 : vector<8x8xf32>
    %67 = arith.mulf %62, %21 : vector<8x8xf32>
    %68 = arith.addf %66, %67 : vector<8x8xf32>
    %cst_45 = arith.constant dense<0.000000e+00> : vector<8x8xf32>
    %69 = tpu.matmul %65, %34, %cst_45 {dimension_numbers = #tpu.dot_dimension_numbers<[1], [1], [0], [0], [0, 0, 1, 0], [], []>} : vector<8x8xf32>, vector<8x8xf32>, vector<8x8xf32> -> vector<8x8xf32>
    %cst_46 = arith.constant dense<0.000000e+00> : vector<8x8xf32>
    %70 = tpu.matmul %68, %37, %cst_46 {dimension_numbers = #tpu.dot_dimension_numbers<[1], [1], [0], [0], [0, 0, 1, 0], [], []>} : vector<8x8xf32>, vector<8x8xf32>, vector<8x8xf32> -> vector<8x8xf32>
    %71 = arith.addf %69, %70 : vector<8x8xf32>
    %cst_47 = arith.constant 2.500000e-01 : f32
    %72 = vector.broadcast %cst_47 : f32 to vector<8x8xf32>
    %73 = arith.mulf %71, %72 : vector<8x8xf32>
    %cst_48 = arith.constant -1.000000e+30 : f32
    %74 = vector.broadcast %cst_48 : f32 to vector<8x8xf32>
    %75 = arith.select %25, %73, %74 : vector<8x8xi1>, vector<8x8xf32>
    %cst_49 = arith.constant dense<0xFF800000> : vector<8xf32>
    %76 = vector.multi_reduction <maximumf>, %75, %cst_49 [1] : vector<8x8xf32> to vector<8xf32>
    %77 = vector.shape_cast %76 : vector<8xf32> to vector<8x1xf32>
    %78 = vector.broadcast %77 : vector<8x1xf32> to vector<8x8xf32>
    %79 = arith.subf %75, %78 : vector<8x8xf32>
    %80 = math.exp %79 : vector<8x8xf32>
    %cst_50 = arith.constant dense<0.000000e+00> : vector<8xf32>
    %81 = vector.multi_reduction <add>, %80, %cst_50 [1] : vector<8x8xf32> to vector<8xf32>
    %82 = vector.shape_cast %81 : vector<8xf32> to vector<8x1xf32>
    %83 = tpu.reciprocal %82 {approx = true} : vector<8x1xf32> -> vector<8x1xf32>
    %84 = vector.broadcast %83 : vector<8x1xf32> to vector<8x8xf32>
    %85 = arith.mulf %80, %84 : vector<8x8xf32>
    %cst_51 = arith.constant dense<0.000000e+00> : vector<8x16xf32>
    %86 = tpu.matmul %85, %40, %cst_51 {dimension_numbers = #tpu.dot_dimension_numbers<[1], [0], [0], [1], [0, 0, 1, 1], [], []>} : vector<8x8xf32>, vector<8x16xf32>, vector<8x16xf32> -> vector<8x16xf32>
    %c0_52 = arith.constant 0 : index
    %c0_53 = arith.constant 0 : index
    %c0_54 = arith.constant 0 : index
    %87 = vector.load %arg8[%c0_52, %c0_53, %c0_54] : memref<4x16x64xf32, #tpu.memory_space<vmem>>, vector<1x16x64xf32>
    %88 = vector.shape_cast %87 : vector<1x16x64xf32> to vector<16x64xf32>
    %cst_55 = arith.constant dense<0.000000e+00> : vector<8x64xf32>
    %89 = tpu.matmul %86, %88, %cst_55 {dimension_numbers = #tpu.dot_dimension_numbers<[1], [0], [0], [1], [0, 0, 1, 1], [], []>} : vector<8x16xf32>, vector<16x64xf32>, vector<8x64xf32> -> vector<8x64xf32>
    %90 = arith.addf %56, %89 : vector<8x64xf32>
    %c1_56 = arith.constant 1 : index
    %c0_57 = arith.constant 0 : index
    %c0_58 = arith.constant 0 : index
    %91 = vector.load %arg3[%c1_56, %c0_57, %c0_58] : memref<4x64x8xf32, #tpu.memory_space<vmem>>, vector<1x64x8xf32>
    %92 = vector.shape_cast %91 : vector<1x64x8xf32> to vector<64x8xf32>
    %cst_59 = arith.constant dense<0.000000e+00> : vector<8x8xf32>
    %93 = tpu.matmul %20, %92, %cst_59 {dimension_numbers = #tpu.dot_dimension_numbers<[1], [0], [0], [1], [0, 0, 1, 1], [], []>} : vector<8x64xf32>, vector<64x8xf32>, vector<8x8xf32> -> vector<8x8xf32>
    %c1_60 = arith.constant 1 : index
    %c0_61 = arith.constant 0 : index
    %c0_62 = arith.constant 0 : index
    %94 = vector.load %arg4[%c1_60, %c0_61, %c0_62] : memref<4x64x8xf32, #tpu.memory_space<vmem>>, vector<1x64x8xf32>
    %95 = vector.shape_cast %94 : vector<1x64x8xf32> to vector<64x8xf32>
    %cst_63 = arith.constant dense<0.000000e+00> : vector<8x8xf32>
    %96 = tpu.matmul %20, %95, %cst_63 {dimension_numbers = #tpu.dot_dimension_numbers<[1], [0], [0], [1], [0, 0, 1, 1], [], []>} : vector<8x64xf32>, vector<64x8xf32>, vector<8x8xf32> -> vector<8x8xf32>
    %97 = arith.mulf %93, %21 : vector<8x8xf32>
    %98 = arith.mulf %96, %22 : vector<8x8xf32>
    %99 = arith.subf %97, %98 : vector<8x8xf32>
    %100 = arith.mulf %93, %22 : vector<8x8xf32>
    %101 = arith.mulf %96, %21 : vector<8x8xf32>
    %102 = arith.addf %100, %101 : vector<8x8xf32>
    %cst_64 = arith.constant dense<0.000000e+00> : vector<8x8xf32>
    %103 = tpu.matmul %99, %34, %cst_64 {dimension_numbers = #tpu.dot_dimension_numbers<[1], [1], [0], [0], [0, 0, 1, 0], [], []>} : vector<8x8xf32>, vector<8x8xf32>, vector<8x8xf32> -> vector<8x8xf32>
    %cst_65 = arith.constant dense<0.000000e+00> : vector<8x8xf32>
    %104 = tpu.matmul %102, %37, %cst_65 {dimension_numbers = #tpu.dot_dimension_numbers<[1], [1], [0], [0], [0, 0, 1, 0], [], []>} : vector<8x8xf32>, vector<8x8xf32>, vector<8x8xf32> -> vector<8x8xf32>
    %105 = arith.addf %103, %104 : vector<8x8xf32>
    %cst_66 = arith.constant 2.500000e-01 : f32
    %106 = vector.broadcast %cst_66 : f32 to vector<8x8xf32>
    %107 = arith.mulf %105, %106 : vector<8x8xf32>
    %cst_67 = arith.constant -1.000000e+30 : f32
    %108 = vector.broadcast %cst_67 : f32 to vector<8x8xf32>
    %109 = arith.select %25, %107, %108 : vector<8x8xi1>, vector<8x8xf32>
    %cst_68 = arith.constant dense<0xFF800000> : vector<8xf32>
    %110 = vector.multi_reduction <maximumf>, %109, %cst_68 [1] : vector<8x8xf32> to vector<8xf32>
    %111 = vector.shape_cast %110 : vector<8xf32> to vector<8x1xf32>
    %112 = vector.broadcast %111 : vector<8x1xf32> to vector<8x8xf32>
    %113 = arith.subf %109, %112 : vector<8x8xf32>
    %114 = math.exp %113 : vector<8x8xf32>
    %cst_69 = arith.constant dense<0.000000e+00> : vector<8xf32>
    %115 = vector.multi_reduction <add>, %114, %cst_69 [1] : vector<8x8xf32> to vector<8xf32>
    %116 = vector.shape_cast %115 : vector<8xf32> to vector<8x1xf32>
    %117 = tpu.reciprocal %116 {approx = true} : vector<8x1xf32> -> vector<8x1xf32>
    %118 = vector.broadcast %117 : vector<8x1xf32> to vector<8x8xf32>
    %119 = arith.mulf %114, %118 : vector<8x8xf32>
    %cst_70 = arith.constant dense<0.000000e+00> : vector<8x16xf32>
    %120 = tpu.matmul %119, %40, %cst_70 {dimension_numbers = #tpu.dot_dimension_numbers<[1], [0], [0], [1], [0, 0, 1, 1], [], []>} : vector<8x8xf32>, vector<8x16xf32>, vector<8x16xf32> -> vector<8x16xf32>
    %c1_71 = arith.constant 1 : index
    %c0_72 = arith.constant 0 : index
    %c0_73 = arith.constant 0 : index
    %121 = vector.load %arg8[%c1_71, %c0_72, %c0_73] : memref<4x16x64xf32, #tpu.memory_space<vmem>>, vector<1x16x64xf32>
    %122 = vector.shape_cast %121 : vector<1x16x64xf32> to vector<16x64xf32>
    %cst_74 = arith.constant dense<0.000000e+00> : vector<8x64xf32>
    %123 = tpu.matmul %120, %122, %cst_74 {dimension_numbers = #tpu.dot_dimension_numbers<[1], [0], [0], [1], [0, 0, 1, 1], [], []>} : vector<8x16xf32>, vector<16x64xf32>, vector<8x64xf32> -> vector<8x64xf32>
    %124 = arith.addf %90, %123 : vector<8x64xf32>
    %c2 = arith.constant 2 : index
    %c0_75 = arith.constant 0 : index
    %c0_76 = arith.constant 0 : index
    %125 = vector.load %arg3[%c2, %c0_75, %c0_76] : memref<4x64x8xf32, #tpu.memory_space<vmem>>, vector<1x64x8xf32>
    %126 = vector.shape_cast %125 : vector<1x64x8xf32> to vector<64x8xf32>
    %cst_77 = arith.constant dense<0.000000e+00> : vector<8x8xf32>
    %127 = tpu.matmul %20, %126, %cst_77 {dimension_numbers = #tpu.dot_dimension_numbers<[1], [0], [0], [1], [0, 0, 1, 1], [], []>} : vector<8x64xf32>, vector<64x8xf32>, vector<8x8xf32> -> vector<8x8xf32>
    %c2_78 = arith.constant 2 : index
    %c0_79 = arith.constant 0 : index
    %c0_80 = arith.constant 0 : index
    %128 = vector.load %arg4[%c2_78, %c0_79, %c0_80] : memref<4x64x8xf32, #tpu.memory_space<vmem>>, vector<1x64x8xf32>
    %129 = vector.shape_cast %128 : vector<1x64x8xf32> to vector<64x8xf32>
    %cst_81 = arith.constant dense<0.000000e+00> : vector<8x8xf32>
    %130 = tpu.matmul %20, %129, %cst_81 {dimension_numbers = #tpu.dot_dimension_numbers<[1], [0], [0], [1], [0, 0, 1, 1], [], []>} : vector<8x64xf32>, vector<64x8xf32>, vector<8x8xf32> -> vector<8x8xf32>
    %131 = arith.mulf %127, %21 : vector<8x8xf32>
    %132 = arith.mulf %130, %22 : vector<8x8xf32>
    %133 = arith.subf %131, %132 : vector<8x8xf32>
    %134 = arith.mulf %127, %22 : vector<8x8xf32>
    %135 = arith.mulf %130, %21 : vector<8x8xf32>
    %136 = arith.addf %134, %135 : vector<8x8xf32>
    %cst_82 = arith.constant dense<0.000000e+00> : vector<8x8xf32>
    %137 = tpu.matmul %133, %49, %cst_82 {dimension_numbers = #tpu.dot_dimension_numbers<[1], [1], [0], [0], [0, 0, 1, 0], [], []>} : vector<8x8xf32>, vector<8x8xf32>, vector<8x8xf32> -> vector<8x8xf32>
    %cst_83 = arith.constant dense<0.000000e+00> : vector<8x8xf32>
    %138 = tpu.matmul %136, %52, %cst_83 {dimension_numbers = #tpu.dot_dimension_numbers<[1], [1], [0], [0], [0, 0, 1, 0], [], []>} : vector<8x8xf32>, vector<8x8xf32>, vector<8x8xf32> -> vector<8x8xf32>
    %139 = arith.addf %137, %138 : vector<8x8xf32>
    %cst_84 = arith.constant 2.500000e-01 : f32
    %140 = vector.broadcast %cst_84 : f32 to vector<8x8xf32>
    %141 = arith.mulf %139, %140 : vector<8x8xf32>
    %cst_85 = arith.constant -1.000000e+30 : f32
    %142 = vector.broadcast %cst_85 : f32 to vector<8x8xf32>
    %143 = arith.select %25, %141, %142 : vector<8x8xi1>, vector<8x8xf32>
    %cst_86 = arith.constant dense<0xFF800000> : vector<8xf32>
    %144 = vector.multi_reduction <maximumf>, %143, %cst_86 [1] : vector<8x8xf32> to vector<8xf32>
    %145 = vector.shape_cast %144 : vector<8xf32> to vector<8x1xf32>
    %146 = vector.broadcast %145 : vector<8x1xf32> to vector<8x8xf32>
    %147 = arith.subf %143, %146 : vector<8x8xf32>
    %148 = math.exp %147 : vector<8x8xf32>
    %cst_87 = arith.constant dense<0.000000e+00> : vector<8xf32>
    %149 = vector.multi_reduction <add>, %148, %cst_87 [1] : vector<8x8xf32> to vector<8xf32>
    %150 = vector.shape_cast %149 : vector<8xf32> to vector<8x1xf32>
    %151 = tpu.reciprocal %150 {approx = true} : vector<8x1xf32> -> vector<8x1xf32>
    %152 = vector.broadcast %151 : vector<8x1xf32> to vector<8x8xf32>
    %153 = arith.mulf %148, %152 : vector<8x8xf32>
    %cst_88 = arith.constant dense<0.000000e+00> : vector<8x16xf32>
    %154 = tpu.matmul %153, %55, %cst_88 {dimension_numbers = #tpu.dot_dimension_numbers<[1], [0], [0], [1], [0, 0, 1, 1], [], []>} : vector<8x8xf32>, vector<8x16xf32>, vector<8x16xf32> -> vector<8x16xf32>
    %c2_89 = arith.constant 2 : index
    %c0_90 = arith.constant 0 : index
    %c0_91 = arith.constant 0 : index
    %155 = vector.load %arg8[%c2_89, %c0_90, %c0_91] : memref<4x16x64xf32, #tpu.memory_space<vmem>>, vector<1x16x64xf32>
    %156 = vector.shape_cast %155 : vector<1x16x64xf32> to vector<16x64xf32>
    %cst_92 = arith.constant dense<0.000000e+00> : vector<8x64xf32>
    %157 = tpu.matmul %154, %156, %cst_92 {dimension_numbers = #tpu.dot_dimension_numbers<[1], [0], [0], [1], [0, 0, 1, 1], [], []>} : vector<8x16xf32>, vector<16x64xf32>, vector<8x64xf32> -> vector<8x64xf32>
    %158 = arith.addf %124, %157 : vector<8x64xf32>
    %c3 = arith.constant 3 : index
    %c0_93 = arith.constant 0 : index
    %c0_94 = arith.constant 0 : index
    %159 = vector.load %arg3[%c3, %c0_93, %c0_94] : memref<4x64x8xf32, #tpu.memory_space<vmem>>, vector<1x64x8xf32>
    %160 = vector.shape_cast %159 : vector<1x64x8xf32> to vector<64x8xf32>
    %cst_95 = arith.constant dense<0.000000e+00> : vector<8x8xf32>
    %161 = tpu.matmul %20, %160, %cst_95 {dimension_numbers = #tpu.dot_dimension_numbers<[1], [0], [0], [1], [0, 0, 1, 1], [], []>} : vector<8x64xf32>, vector<64x8xf32>, vector<8x8xf32> -> vector<8x8xf32>
    %c3_96 = arith.constant 3 : index
    %c0_97 = arith.constant 0 : index
    %c0_98 = arith.constant 0 : index
    %162 = vector.load %arg4[%c3_96, %c0_97, %c0_98] : memref<4x64x8xf32, #tpu.memory_space<vmem>>, vector<1x64x8xf32>
    %163 = vector.shape_cast %162 : vector<1x64x8xf32> to vector<64x8xf32>
    %cst_99 = arith.constant dense<0.000000e+00> : vector<8x8xf32>
    %164 = tpu.matmul %20, %163, %cst_99 {dimension_numbers = #tpu.dot_dimension_numbers<[1], [0], [0], [1], [0, 0, 1, 1], [], []>} : vector<8x64xf32>, vector<64x8xf32>, vector<8x8xf32> -> vector<8x8xf32>
    %165 = arith.mulf %161, %21 : vector<8x8xf32>
    %166 = arith.mulf %164, %22 : vector<8x8xf32>
    %167 = arith.subf %165, %166 : vector<8x8xf32>
    %168 = arith.mulf %161, %22 : vector<8x8xf32>
    %169 = arith.mulf %164, %21 : vector<8x8xf32>
    %170 = arith.addf %168, %169 : vector<8x8xf32>
    %cst_100 = arith.constant dense<0.000000e+00> : vector<8x8xf32>
    %171 = tpu.matmul %167, %49, %cst_100 {dimension_numbers = #tpu.dot_dimension_numbers<[1], [1], [0], [0], [0, 0, 1, 0], [], []>} : vector<8x8xf32>, vector<8x8xf32>, vector<8x8xf32> -> vector<8x8xf32>
    %cst_101 = arith.constant dense<0.000000e+00> : vector<8x8xf32>
    %172 = tpu.matmul %170, %52, %cst_101 {dimension_numbers = #tpu.dot_dimension_numbers<[1], [1], [0], [0], [0, 0, 1, 0], [], []>} : vector<8x8xf32>, vector<8x8xf32>, vector<8x8xf32> -> vector<8x8xf32>
    %173 = arith.addf %171, %172 : vector<8x8xf32>
    %cst_102 = arith.constant 2.500000e-01 : f32
    %174 = vector.broadcast %cst_102 : f32 to vector<8x8xf32>
    %175 = arith.mulf %173, %174 : vector<8x8xf32>
    %cst_103 = arith.constant -1.000000e+30 : f32
    %176 = vector.broadcast %cst_103 : f32 to vector<8x8xf32>
    %177 = arith.select %25, %175, %176 : vector<8x8xi1>, vector<8x8xf32>
    %cst_104 = arith.constant dense<0xFF800000> : vector<8xf32>
    %178 = vector.multi_reduction <maximumf>, %177, %cst_104 [1] : vector<8x8xf32> to vector<8xf32>
    %179 = vector.shape_cast %178 : vector<8xf32> to vector<8x1xf32>
    %180 = vector.broadcast %179 : vector<8x1xf32> to vector<8x8xf32>
    %181 = arith.subf %177, %180 : vector<8x8xf32>
    %182 = math.exp %181 : vector<8x8xf32>
    %cst_105 = arith.constant dense<0.000000e+00> : vector<8xf32>
    %183 = vector.multi_reduction <add>, %182, %cst_105 [1] : vector<8x8xf32> to vector<8xf32>
    %184 = vector.shape_cast %183 : vector<8xf32> to vector<8x1xf32>
    %185 = tpu.reciprocal %184 {approx = true} : vector<8x1xf32> -> vector<8x1xf32>
    %186 = vector.broadcast %185 : vector<8x1xf32> to vector<8x8xf32>
    %187 = arith.mulf %182, %186 : vector<8x8xf32>
    %cst_106 = arith.constant dense<0.000000e+00> : vector<8x16xf32>
    %188 = tpu.matmul %187, %55, %cst_106 {dimension_numbers = #tpu.dot_dimension_numbers<[1], [0], [0], [1], [0, 0, 1, 1], [], []>} : vector<8x8xf32>, vector<8x16xf32>, vector<8x16xf32> -> vector<8x16xf32>
    %c3_107 = arith.constant 3 : index
    %c0_108 = arith.constant 0 : index
    %c0_109 = arith.constant 0 : index
    %189 = vector.load %arg8[%c3_107, %c0_108, %c0_109] : memref<4x16x64xf32, #tpu.memory_space<vmem>>, vector<1x16x64xf32>
    %190 = vector.shape_cast %189 : vector<1x16x64xf32> to vector<16x64xf32>
    %cst_110 = arith.constant dense<0.000000e+00> : vector<8x64xf32>
    %191 = tpu.matmul %188, %190, %cst_110 {dimension_numbers = #tpu.dot_dimension_numbers<[1], [0], [0], [1], [0, 0, 1, 1], [], []>} : vector<8x16xf32>, vector<16x64xf32>, vector<8x64xf32> -> vector<8x64xf32>
    %192 = arith.addf %158, %191 : vector<8x64xf32>
    %c0_111 = arith.constant 0 : index
    %c0_112 = arith.constant 0 : index
    %193 = vector.load %arg9[%c0_111, %c0_112] : memref<64x128xf32, #tpu.memory_space<vmem>>, vector<64x128xf32>
    %cst_113 = arith.constant dense<0.000000e+00> : vector<8x128xf32>
    %194 = tpu.matmul %20, %193, %cst_113 {dimension_numbers = #tpu.dot_dimension_numbers<[1], [0], [0], [1], [0, 0, 1, 1], [], []>} : vector<8x64xf32>, vector<64x128xf32>, vector<8x128xf32> -> vector<8x128xf32>
    %c0_114 = arith.constant 0 : index
    %c0_115 = arith.constant 0 : index
    %195 = vector.load %arg10[%c0_114, %c0_115] : memref<64x128xf32, #tpu.memory_space<vmem>>, vector<64x128xf32>
    %cst_116 = arith.constant dense<0.000000e+00> : vector<8x128xf32>
    %196 = tpu.matmul %20, %195, %cst_116 {dimension_numbers = #tpu.dot_dimension_numbers<[1], [0], [0], [1], [0, 0, 1, 1], [], []>} : vector<8x64xf32>, vector<64x128xf32>, vector<8x128xf32> -> vector<8x128xf32>
    %197 = arith.negf %194 : vector<8x128xf32>
    %198 = math.exp %197 : vector<8x128xf32>
    %cst_117 = arith.constant 1.000000e+00 : f32
    %199 = vector.broadcast %cst_117 : f32 to vector<8x128xf32>
    %200 = arith.addf %199, %198 : vector<8x128xf32>
    %201 = arith.divf %199, %200 : vector<8x128xf32>
    %202 = arith.mulf %194, %201 : vector<8x128xf32>
    %203 = arith.mulf %202, %196 : vector<8x128xf32>
    %c0_118 = arith.constant 0 : index
    %c0_119 = arith.constant 0 : index
    %204 = vector.load %arg11[%c0_118, %c0_119] : memref<128x64xf32, #tpu.memory_space<vmem>>, vector<128x64xf32>
    %cst_120 = arith.constant dense<0.000000e+00> : vector<8x64xf32>
    %205 = tpu.matmul %203, %204, %cst_120 {dimension_numbers = #tpu.dot_dimension_numbers<[1], [0], [0], [1], [0, 0, 1, 1], [], []>} : vector<8x128xf32>, vector<128x64xf32>, vector<8x64xf32> -> vector<8x64xf32>
    %206 = arith.addf %192, %205 : vector<8x64xf32>
    %c0_121 = arith.constant 0 : index
    %c0_122 = arith.constant 0 : index
    %207 = vector.load %arg14[%c0_121, %c0_122] : memref<8x64xf32, #tpu.memory_space<vmem>>, vector<8x64xf32>
    tpu.vector_store %arg14[%c0_121, %c0_122], %206 {strides = array<i32>} : memref<8x64xf32, #tpu.memory_space<vmem>>, vector<8x64xf32>,
    return
  }
}

module attributes {stable_mosaic.version = 11 : i64} {
  func.func @_layer_kernel(%arg0: memref<8x64xf32, #tpu.memory_space<vmem>>, %arg1: memref<8x64xf32, #tpu.memory_space<vmem>>, %arg2: memref<1x64xf32, #tpu.memory_space<vmem>>, %arg3: memref<4x64x8xf32, #tpu.memory_space<vmem>>, %arg4: memref<4x64x8xf32, #tpu.memory_space<vmem>>, %arg5: memref<2x64x8xf32, #tpu.memory_space<vmem>>, %arg6: memref<2x64x8xf32, #tpu.memory_space<vmem>>, %arg7: memref<2x64x16xf32, #tpu.memory_space<vmem>>, %arg8: memref<4x16x64xf32, #tpu.memory_space<vmem>>, %arg9: memref<64x128xf32, #tpu.memory_space<vmem>>, %arg10: memref<64x128xf32, #tpu.memory_space<vmem>>, %arg11: memref<128x64xf32, #tpu.memory_space<vmem>>, %arg12: memref<8x8xf32, #tpu.memory_space<vmem>>, %arg13: memref<8x8xf32, #tpu.memory_space<vmem>>, %arg14: memref<8x64xf32, #tpu.memory_space<vmem>>, %arg15: memref<8x64xf32, #tpu.memory_space<vmem>>) attributes {dimension_semantics = [], scalar_prefetch = 0 : i64, scratch_operands = 0 : i64, tpu.core_type = #tpu.core_type<tc>} {
    %c0 = arith.constant 0 : index
    %c0_0 = arith.constant 0 : index
    %0 = vector.load %arg0[%c0, %c0_0] : memref<8x64xf32, #tpu.memory_space<vmem>>, vector<8x64xf32>
    %c0_1 = arith.constant 0 : index
    %c0_2 = arith.constant 0 : index
    %1 = vector.load %arg1[%c0_1, %c0_2] : memref<8x64xf32, #tpu.memory_space<vmem>>, vector<8x64xf32>
    %2 = arith.addf %0, %1 : vector<8x64xf32>
    %c0_3 = arith.constant 0 : index
    %c0_4 = arith.constant 0 : index
    %3 = vector.load %arg15[%c0_3, %c0_4] : memref<8x64xf32, #tpu.memory_space<vmem>>, vector<8x64xf32>
    tpu.vector_store %arg15[%c0_3, %c0_4], %2 {strides = array<i32>} : memref<8x64xf32, #tpu.memory_space<vmem>>, vector<8x64xf32>,
    %c0_5 = arith.constant 0 : index
    %c0_6 = arith.constant 0 : index
    %4 = vector.load %arg2[%c0_5, %c0_6] : memref<1x64xf32, #tpu.memory_space<vmem>>, vector<1x64xf32>
    %cst = arith.constant dense<0.000000e+00> : vector<8xf32>
    %5 = vector.multi_reduction <add>, %2, %cst [1] : vector<8x64xf32> to vector<8xf32>
    %6 = vector.shape_cast %5 : vector<8xf32> to vector<8x1xf32>
    %cst_7 = arith.constant 6.400000e+01 : f32
    %7 = vector.broadcast %cst_7 : f32 to vector<8x1xf32>
    %8 = arith.divf %6, %7 : vector<8x1xf32>
    %9 = vector.broadcast %8 : vector<8x1xf32> to vector<8x64xf32>
    %10 = arith.subf %2, %9 : vector<8x64xf32>
    %11 = arith.mulf %10, %10 : vector<8x64xf32>
    %cst_8 = arith.constant dense<0.000000e+00> : vector<8xf32>
    %12 = vector.multi_reduction <add>, %11, %cst_8 [1] : vector<8x64xf32> to vector<8xf32>
    %13 = vector.shape_cast %12 : vector<8xf32> to vector<8x1xf32>
    %cst_9 = arith.constant 6.400000e+01 : f32
    %14 = vector.broadcast %cst_9 : f32 to vector<8x1xf32>
    %15 = arith.divf %13, %14 : vector<8x1xf32>
    %cst_10 = arith.constant 9.99999974E-6 : f32
    %16 = vector.broadcast %cst_10 : f32 to vector<8x1xf32>
    %17 = arith.addf %15, %16 : vector<8x1xf32>
    %18 = math.rsqrt %17 : vector<8x1xf32>
    %19 = vector.broadcast %18 : vector<8x1xf32> to vector<8x64xf32>
    %20 = arith.mulf %10, %19 : vector<8x64xf32>
    %21 = vector.broadcast %4 : vector<1x64xf32> to vector<8x64xf32>
    %22 = arith.mulf %20, %21 : vector<8x64xf32>
    %c0_11 = arith.constant 0 : index
    %c0_12 = arith.constant 0 : index
    %23 = vector.load %arg12[%c0_11, %c0_12] : memref<8x8xf32, #tpu.memory_space<vmem>>, vector<8x8xf32>
    %c0_13 = arith.constant 0 : index
    %c0_14 = arith.constant 0 : index
    %24 = vector.load %arg13[%c0_13, %c0_14] : memref<8x8xf32, #tpu.memory_space<vmem>>, vector<8x8xf32>
    %25 = tpu.iota {dimensions = array<i32: 0>} : vector<8x8xi32>
    %26 = tpu.iota {dimensions = array<i32: 1>} : vector<8x8xi32>
    %27 = arith.cmpi sge, %25, %26 : vector<8x8xi32>
    %c0_15 = arith.constant 0 : index
    %c0_16 = arith.constant 0 : index
    %c0_17 = arith.constant 0 : index
    %28 = vector.load %arg5[%c0_15, %c0_16, %c0_17] : memref<2x64x8xf32, #tpu.memory_space<vmem>>, vector<1x64x8xf32>
    %29 = vector.shape_cast %28 : vector<1x64x8xf32> to vector<64x8xf32>
    %cst_18 = arith.constant dense<0.000000e+00> : vector<8x8xf32>
    %30 = tpu.matmul %22, %29, %cst_18 {dimension_numbers = #tpu.dot_dimension_numbers<[1], [0], [0], [1], [0, 0, 1, 1], [], []>} : vector<8x64xf32>, vector<64x8xf32>, vector<8x8xf32> -> vector<8x8xf32>
    %c0_19 = arith.constant 0 : index
    %c0_20 = arith.constant 0 : index
    %c0_21 = arith.constant 0 : index
    %31 = vector.load %arg6[%c0_19, %c0_20, %c0_21] : memref<2x64x8xf32, #tpu.memory_space<vmem>>, vector<1x64x8xf32>
    %32 = vector.shape_cast %31 : vector<1x64x8xf32> to vector<64x8xf32>
    %cst_22 = arith.constant dense<0.000000e+00> : vector<8x8xf32>
    %33 = tpu.matmul %22, %32, %cst_22 {dimension_numbers = #tpu.dot_dimension_numbers<[1], [0], [0], [1], [0, 0, 1, 1], [], []>} : vector<8x64xf32>, vector<64x8xf32>, vector<8x8xf32> -> vector<8x8xf32>
    %34 = arith.mulf %30, %23 : vector<8x8xf32>
    %35 = arith.mulf %33, %24 : vector<8x8xf32>
    %36 = arith.subf %34, %35 : vector<8x8xf32>
    %37 = arith.mulf %30, %24 : vector<8x8xf32>
    %38 = arith.mulf %33, %23 : vector<8x8xf32>
    %39 = arith.addf %37, %38 : vector<8x8xf32>
    %c0_23 = arith.constant 0 : index
    %c0_24 = arith.constant 0 : index
    %c0_25 = arith.constant 0 : index
    %40 = vector.load %arg7[%c0_23, %c0_24, %c0_25] : memref<2x64x16xf32, #tpu.memory_space<vmem>>, vector<1x64x16xf32>
    %41 = vector.shape_cast %40 : vector<1x64x16xf32> to vector<64x16xf32>
    %cst_26 = arith.constant dense<0.000000e+00> : vector<8x16xf32>
    %42 = tpu.matmul %22, %41, %cst_26 {dimension_numbers = #tpu.dot_dimension_numbers<[1], [0], [0], [1], [0, 0, 1, 1], [], []>} : vector<8x64xf32>, vector<64x16xf32>, vector<8x16xf32> -> vector<8x16xf32>
    %c1 = arith.constant 1 : index
    %c0_27 = arith.constant 0 : index
    %c0_28 = arith.constant 0 : index
    %43 = vector.load %arg5[%c1, %c0_27, %c0_28] : memref<2x64x8xf32, #tpu.memory_space<vmem>>, vector<1x64x8xf32>
    %44 = vector.shape_cast %43 : vector<1x64x8xf32> to vector<64x8xf32>
    %cst_29 = arith.constant dense<0.000000e+00> : vector<8x8xf32>
    %45 = tpu.matmul %22, %44, %cst_29 {dimension_numbers = #tpu.dot_dimension_numbers<[1], [0], [0], [1], [0, 0, 1, 1], [], []>} : vector<8x64xf32>, vector<64x8xf32>, vector<8x8xf32> -> vector<8x8xf32>
    %c1_30 = arith.constant 1 : index
    %c0_31 = arith.constant 0 : index
    %c0_32 = arith.constant 0 : index
    %46 = vector.load %arg6[%c1_30, %c0_31, %c0_32] : memref<2x64x8xf32, #tpu.memory_space<vmem>>, vector<1x64x8xf32>
    %47 = vector.shape_cast %46 : vector<1x64x8xf32> to vector<64x8xf32>
    %cst_33 = arith.constant dense<0.000000e+00> : vector<8x8xf32>
    %48 = tpu.matmul %22, %47, %cst_33 {dimension_numbers = #tpu.dot_dimension_numbers<[1], [0], [0], [1], [0, 0, 1, 1], [], []>} : vector<8x64xf32>, vector<64x8xf32>, vector<8x8xf32> -> vector<8x8xf32>
    %49 = arith.mulf %45, %23 : vector<8x8xf32>
    %50 = arith.mulf %48, %24 : vector<8x8xf32>
    %51 = arith.subf %49, %50 : vector<8x8xf32>
    %52 = arith.mulf %45, %24 : vector<8x8xf32>
    %53 = arith.mulf %48, %23 : vector<8x8xf32>
    %54 = arith.addf %52, %53 : vector<8x8xf32>
    %c1_34 = arith.constant 1 : index
    %c0_35 = arith.constant 0 : index
    %c0_36 = arith.constant 0 : index
    %55 = vector.load %arg7[%c1_34, %c0_35, %c0_36] : memref<2x64x16xf32, #tpu.memory_space<vmem>>, vector<1x64x16xf32>
    %56 = vector.shape_cast %55 : vector<1x64x16xf32> to vector<64x16xf32>
    %cst_37 = arith.constant dense<0.000000e+00> : vector<8x16xf32>
    %57 = tpu.matmul %22, %56, %cst_37 {dimension_numbers = #tpu.dot_dimension_numbers<[1], [0], [0], [1], [0, 0, 1, 1], [], []>} : vector<8x64xf32>, vector<64x16xf32>, vector<8x16xf32> -> vector<8x16xf32>
    %cst_38 = arith.constant 0.000000e+00 : f32
    %58 = vector.broadcast %cst_38 : f32 to vector<8x64xf32>
    %c0_39 = arith.constant 0 : index
    %c0_40 = arith.constant 0 : index
    %c0_41 = arith.constant 0 : index
    %59 = vector.load %arg3[%c0_39, %c0_40, %c0_41] : memref<4x64x8xf32, #tpu.memory_space<vmem>>, vector<1x64x8xf32>
    %60 = vector.shape_cast %59 : vector<1x64x8xf32> to vector<64x8xf32>
    %cst_42 = arith.constant dense<0.000000e+00> : vector<8x8xf32>
    %61 = tpu.matmul %22, %60, %cst_42 {dimension_numbers = #tpu.dot_dimension_numbers<[1], [0], [0], [1], [0, 0, 1, 1], [], []>} : vector<8x64xf32>, vector<64x8xf32>, vector<8x8xf32> -> vector<8x8xf32>
    %c0_43 = arith.constant 0 : index
    %c0_44 = arith.constant 0 : index
    %c0_45 = arith.constant 0 : index
    %62 = vector.load %arg4[%c0_43, %c0_44, %c0_45] : memref<4x64x8xf32, #tpu.memory_space<vmem>>, vector<1x64x8xf32>
    %63 = vector.shape_cast %62 : vector<1x64x8xf32> to vector<64x8xf32>
    %cst_46 = arith.constant dense<0.000000e+00> : vector<8x8xf32>
    %64 = tpu.matmul %22, %63, %cst_46 {dimension_numbers = #tpu.dot_dimension_numbers<[1], [0], [0], [1], [0, 0, 1, 1], [], []>} : vector<8x64xf32>, vector<64x8xf32>, vector<8x8xf32> -> vector<8x8xf32>
    %65 = arith.mulf %61, %23 : vector<8x8xf32>
    %66 = arith.mulf %64, %24 : vector<8x8xf32>
    %67 = arith.subf %65, %66 : vector<8x8xf32>
    %68 = arith.mulf %61, %24 : vector<8x8xf32>
    %69 = arith.mulf %64, %23 : vector<8x8xf32>
    %70 = arith.addf %68, %69 : vector<8x8xf32>
    %cst_47 = arith.constant dense<0.000000e+00> : vector<8x8xf32>
    %71 = tpu.matmul %67, %36, %cst_47 {dimension_numbers = #tpu.dot_dimension_numbers<[1], [1], [0], [0], [0, 0, 1, 0], [], []>} : vector<8x8xf32>, vector<8x8xf32>, vector<8x8xf32> -> vector<8x8xf32>
    %cst_48 = arith.constant dense<0.000000e+00> : vector<8x8xf32>
    %72 = tpu.matmul %70, %39, %cst_48 {dimension_numbers = #tpu.dot_dimension_numbers<[1], [1], [0], [0], [0, 0, 1, 0], [], []>} : vector<8x8xf32>, vector<8x8xf32>, vector<8x8xf32> -> vector<8x8xf32>
    %73 = arith.addf %71, %72 : vector<8x8xf32>
    %cst_49 = arith.constant 2.500000e-01 : f32
    %74 = vector.broadcast %cst_49 : f32 to vector<8x8xf32>
    %75 = arith.mulf %73, %74 : vector<8x8xf32>
    %cst_50 = arith.constant -1.000000e+30 : f32
    %76 = vector.broadcast %cst_50 : f32 to vector<8x8xf32>
    %77 = arith.select %27, %75, %76 : vector<8x8xi1>, vector<8x8xf32>
    %cst_51 = arith.constant dense<0xFF800000> : vector<8xf32>
    %78 = vector.multi_reduction <maximumf>, %77, %cst_51 [1] : vector<8x8xf32> to vector<8xf32>
    %79 = vector.shape_cast %78 : vector<8xf32> to vector<8x1xf32>
    %80 = vector.broadcast %79 : vector<8x1xf32> to vector<8x8xf32>
    %81 = arith.subf %77, %80 : vector<8x8xf32>
    %82 = math.exp %81 : vector<8x8xf32>
    %cst_52 = arith.constant dense<0.000000e+00> : vector<8xf32>
    %83 = vector.multi_reduction <add>, %82, %cst_52 [1] : vector<8x8xf32> to vector<8xf32>
    %84 = vector.shape_cast %83 : vector<8xf32> to vector<8x1xf32>
    %85 = tpu.reciprocal %84 {approx = true} : vector<8x1xf32> -> vector<8x1xf32>
    %86 = vector.broadcast %85 : vector<8x1xf32> to vector<8x8xf32>
    %87 = arith.mulf %82, %86 : vector<8x8xf32>
    %cst_53 = arith.constant dense<0.000000e+00> : vector<8x16xf32>
    %88 = tpu.matmul %87, %42, %cst_53 {dimension_numbers = #tpu.dot_dimension_numbers<[1], [0], [0], [1], [0, 0, 1, 1], [], []>} : vector<8x8xf32>, vector<8x16xf32>, vector<8x16xf32> -> vector<8x16xf32>
    %c0_54 = arith.constant 0 : index
    %c0_55 = arith.constant 0 : index
    %c0_56 = arith.constant 0 : index
    %89 = vector.load %arg8[%c0_54, %c0_55, %c0_56] : memref<4x16x64xf32, #tpu.memory_space<vmem>>, vector<1x16x64xf32>
    %90 = vector.shape_cast %89 : vector<1x16x64xf32> to vector<16x64xf32>
    %cst_57 = arith.constant dense<0.000000e+00> : vector<8x64xf32>
    %91 = tpu.matmul %88, %90, %cst_57 {dimension_numbers = #tpu.dot_dimension_numbers<[1], [0], [0], [1], [0, 0, 1, 1], [], []>} : vector<8x16xf32>, vector<16x64xf32>, vector<8x64xf32> -> vector<8x64xf32>
    %92 = arith.addf %58, %91 : vector<8x64xf32>
    %c1_58 = arith.constant 1 : index
    %c0_59 = arith.constant 0 : index
    %c0_60 = arith.constant 0 : index
    %93 = vector.load %arg3[%c1_58, %c0_59, %c0_60] : memref<4x64x8xf32, #tpu.memory_space<vmem>>, vector<1x64x8xf32>
    %94 = vector.shape_cast %93 : vector<1x64x8xf32> to vector<64x8xf32>
    %cst_61 = arith.constant dense<0.000000e+00> : vector<8x8xf32>
    %95 = tpu.matmul %22, %94, %cst_61 {dimension_numbers = #tpu.dot_dimension_numbers<[1], [0], [0], [1], [0, 0, 1, 1], [], []>} : vector<8x64xf32>, vector<64x8xf32>, vector<8x8xf32> -> vector<8x8xf32>
    %c1_62 = arith.constant 1 : index
    %c0_63 = arith.constant 0 : index
    %c0_64 = arith.constant 0 : index
    %96 = vector.load %arg4[%c1_62, %c0_63, %c0_64] : memref<4x64x8xf32, #tpu.memory_space<vmem>>, vector<1x64x8xf32>
    %97 = vector.shape_cast %96 : vector<1x64x8xf32> to vector<64x8xf32>
    %cst_65 = arith.constant dense<0.000000e+00> : vector<8x8xf32>
    %98 = tpu.matmul %22, %97, %cst_65 {dimension_numbers = #tpu.dot_dimension_numbers<[1], [0], [0], [1], [0, 0, 1, 1], [], []>} : vector<8x64xf32>, vector<64x8xf32>, vector<8x8xf32> -> vector<8x8xf32>
    %99 = arith.mulf %95, %23 : vector<8x8xf32>
    %100 = arith.mulf %98, %24 : vector<8x8xf32>
    %101 = arith.subf %99, %100 : vector<8x8xf32>
    %102 = arith.mulf %95, %24 : vector<8x8xf32>
    %103 = arith.mulf %98, %23 : vector<8x8xf32>
    %104 = arith.addf %102, %103 : vector<8x8xf32>
    %cst_66 = arith.constant dense<0.000000e+00> : vector<8x8xf32>
    %105 = tpu.matmul %101, %36, %cst_66 {dimension_numbers = #tpu.dot_dimension_numbers<[1], [1], [0], [0], [0, 0, 1, 0], [], []>} : vector<8x8xf32>, vector<8x8xf32>, vector<8x8xf32> -> vector<8x8xf32>
    %cst_67 = arith.constant dense<0.000000e+00> : vector<8x8xf32>
    %106 = tpu.matmul %104, %39, %cst_67 {dimension_numbers = #tpu.dot_dimension_numbers<[1], [1], [0], [0], [0, 0, 1, 0], [], []>} : vector<8x8xf32>, vector<8x8xf32>, vector<8x8xf32> -> vector<8x8xf32>
    %107 = arith.addf %105, %106 : vector<8x8xf32>
    %cst_68 = arith.constant 2.500000e-01 : f32
    %108 = vector.broadcast %cst_68 : f32 to vector<8x8xf32>
    %109 = arith.mulf %107, %108 : vector<8x8xf32>
    %cst_69 = arith.constant -1.000000e+30 : f32
    %110 = vector.broadcast %cst_69 : f32 to vector<8x8xf32>
    %111 = arith.select %27, %109, %110 : vector<8x8xi1>, vector<8x8xf32>
    %cst_70 = arith.constant dense<0xFF800000> : vector<8xf32>
    %112 = vector.multi_reduction <maximumf>, %111, %cst_70 [1] : vector<8x8xf32> to vector<8xf32>
    %113 = vector.shape_cast %112 : vector<8xf32> to vector<8x1xf32>
    %114 = vector.broadcast %113 : vector<8x1xf32> to vector<8x8xf32>
    %115 = arith.subf %111, %114 : vector<8x8xf32>
    %116 = math.exp %115 : vector<8x8xf32>
    %cst_71 = arith.constant dense<0.000000e+00> : vector<8xf32>
    %117 = vector.multi_reduction <add>, %116, %cst_71 [1] : vector<8x8xf32> to vector<8xf32>
    %118 = vector.shape_cast %117 : vector<8xf32> to vector<8x1xf32>
    %119 = tpu.reciprocal %118 {approx = true} : vector<8x1xf32> -> vector<8x1xf32>
    %120 = vector.broadcast %119 : vector<8x1xf32> to vector<8x8xf32>
    %121 = arith.mulf %116, %120 : vector<8x8xf32>
    %cst_72 = arith.constant dense<0.000000e+00> : vector<8x16xf32>
    %122 = tpu.matmul %121, %42, %cst_72 {dimension_numbers = #tpu.dot_dimension_numbers<[1], [0], [0], [1], [0, 0, 1, 1], [], []>} : vector<8x8xf32>, vector<8x16xf32>, vector<8x16xf32> -> vector<8x16xf32>
    %c1_73 = arith.constant 1 : index
    %c0_74 = arith.constant 0 : index
    %c0_75 = arith.constant 0 : index
    %123 = vector.load %arg8[%c1_73, %c0_74, %c0_75] : memref<4x16x64xf32, #tpu.memory_space<vmem>>, vector<1x16x64xf32>
    %124 = vector.shape_cast %123 : vector<1x16x64xf32> to vector<16x64xf32>
    %cst_76 = arith.constant dense<0.000000e+00> : vector<8x64xf32>
    %125 = tpu.matmul %122, %124, %cst_76 {dimension_numbers = #tpu.dot_dimension_numbers<[1], [0], [0], [1], [0, 0, 1, 1], [], []>} : vector<8x16xf32>, vector<16x64xf32>, vector<8x64xf32> -> vector<8x64xf32>
    %126 = arith.addf %92, %125 : vector<8x64xf32>
    %c2 = arith.constant 2 : index
    %c0_77 = arith.constant 0 : index
    %c0_78 = arith.constant 0 : index
    %127 = vector.load %arg3[%c2, %c0_77, %c0_78] : memref<4x64x8xf32, #tpu.memory_space<vmem>>, vector<1x64x8xf32>
    %128 = vector.shape_cast %127 : vector<1x64x8xf32> to vector<64x8xf32>
    %cst_79 = arith.constant dense<0.000000e+00> : vector<8x8xf32>
    %129 = tpu.matmul %22, %128, %cst_79 {dimension_numbers = #tpu.dot_dimension_numbers<[1], [0], [0], [1], [0, 0, 1, 1], [], []>} : vector<8x64xf32>, vector<64x8xf32>, vector<8x8xf32> -> vector<8x8xf32>
    %c2_80 = arith.constant 2 : index
    %c0_81 = arith.constant 0 : index
    %c0_82 = arith.constant 0 : index
    %130 = vector.load %arg4[%c2_80, %c0_81, %c0_82] : memref<4x64x8xf32, #tpu.memory_space<vmem>>, vector<1x64x8xf32>
    %131 = vector.shape_cast %130 : vector<1x64x8xf32> to vector<64x8xf32>
    %cst_83 = arith.constant dense<0.000000e+00> : vector<8x8xf32>
    %132 = tpu.matmul %22, %131, %cst_83 {dimension_numbers = #tpu.dot_dimension_numbers<[1], [0], [0], [1], [0, 0, 1, 1], [], []>} : vector<8x64xf32>, vector<64x8xf32>, vector<8x8xf32> -> vector<8x8xf32>
    %133 = arith.mulf %129, %23 : vector<8x8xf32>
    %134 = arith.mulf %132, %24 : vector<8x8xf32>
    %135 = arith.subf %133, %134 : vector<8x8xf32>
    %136 = arith.mulf %129, %24 : vector<8x8xf32>
    %137 = arith.mulf %132, %23 : vector<8x8xf32>
    %138 = arith.addf %136, %137 : vector<8x8xf32>
    %cst_84 = arith.constant dense<0.000000e+00> : vector<8x8xf32>
    %139 = tpu.matmul %135, %51, %cst_84 {dimension_numbers = #tpu.dot_dimension_numbers<[1], [1], [0], [0], [0, 0, 1, 0], [], []>} : vector<8x8xf32>, vector<8x8xf32>, vector<8x8xf32> -> vector<8x8xf32>
    %cst_85 = arith.constant dense<0.000000e+00> : vector<8x8xf32>
    %140 = tpu.matmul %138, %54, %cst_85 {dimension_numbers = #tpu.dot_dimension_numbers<[1], [1], [0], [0], [0, 0, 1, 0], [], []>} : vector<8x8xf32>, vector<8x8xf32>, vector<8x8xf32> -> vector<8x8xf32>
    %141 = arith.addf %139, %140 : vector<8x8xf32>
    %cst_86 = arith.constant 2.500000e-01 : f32
    %142 = vector.broadcast %cst_86 : f32 to vector<8x8xf32>
    %143 = arith.mulf %141, %142 : vector<8x8xf32>
    %cst_87 = arith.constant -1.000000e+30 : f32
    %144 = vector.broadcast %cst_87 : f32 to vector<8x8xf32>
    %145 = arith.select %27, %143, %144 : vector<8x8xi1>, vector<8x8xf32>
    %cst_88 = arith.constant dense<0xFF800000> : vector<8xf32>
    %146 = vector.multi_reduction <maximumf>, %145, %cst_88 [1] : vector<8x8xf32> to vector<8xf32>
    %147 = vector.shape_cast %146 : vector<8xf32> to vector<8x1xf32>
    %148 = vector.broadcast %147 : vector<8x1xf32> to vector<8x8xf32>
    %149 = arith.subf %145, %148 : vector<8x8xf32>
    %150 = math.exp %149 : vector<8x8xf32>
    %cst_89 = arith.constant dense<0.000000e+00> : vector<8xf32>
    %151 = vector.multi_reduction <add>, %150, %cst_89 [1] : vector<8x8xf32> to vector<8xf32>
    %152 = vector.shape_cast %151 : vector<8xf32> to vector<8x1xf32>
    %153 = tpu.reciprocal %152 {approx = true} : vector<8x1xf32> -> vector<8x1xf32>
    %154 = vector.broadcast %153 : vector<8x1xf32> to vector<8x8xf32>
    %155 = arith.mulf %150, %154 : vector<8x8xf32>
    %cst_90 = arith.constant dense<0.000000e+00> : vector<8x16xf32>
    %156 = tpu.matmul %155, %57, %cst_90 {dimension_numbers = #tpu.dot_dimension_numbers<[1], [0], [0], [1], [0, 0, 1, 1], [], []>} : vector<8x8xf32>, vector<8x16xf32>, vector<8x16xf32> -> vector<8x16xf32>
    %c2_91 = arith.constant 2 : index
    %c0_92 = arith.constant 0 : index
    %c0_93 = arith.constant 0 : index
    %157 = vector.load %arg8[%c2_91, %c0_92, %c0_93] : memref<4x16x64xf32, #tpu.memory_space<vmem>>, vector<1x16x64xf32>
    %158 = vector.shape_cast %157 : vector<1x16x64xf32> to vector<16x64xf32>
    %cst_94 = arith.constant dense<0.000000e+00> : vector<8x64xf32>
    %159 = tpu.matmul %156, %158, %cst_94 {dimension_numbers = #tpu.dot_dimension_numbers<[1], [0], [0], [1], [0, 0, 1, 1], [], []>} : vector<8x16xf32>, vector<16x64xf32>, vector<8x64xf32> -> vector<8x64xf32>
    %160 = arith.addf %126, %159 : vector<8x64xf32>
    %c3 = arith.constant 3 : index
    %c0_95 = arith.constant 0 : index
    %c0_96 = arith.constant 0 : index
    %161 = vector.load %arg3[%c3, %c0_95, %c0_96] : memref<4x64x8xf32, #tpu.memory_space<vmem>>, vector<1x64x8xf32>
    %162 = vector.shape_cast %161 : vector<1x64x8xf32> to vector<64x8xf32>
    %cst_97 = arith.constant dense<0.000000e+00> : vector<8x8xf32>
    %163 = tpu.matmul %22, %162, %cst_97 {dimension_numbers = #tpu.dot_dimension_numbers<[1], [0], [0], [1], [0, 0, 1, 1], [], []>} : vector<8x64xf32>, vector<64x8xf32>, vector<8x8xf32> -> vector<8x8xf32>
    %c3_98 = arith.constant 3 : index
    %c0_99 = arith.constant 0 : index
    %c0_100 = arith.constant 0 : index
    %164 = vector.load %arg4[%c3_98, %c0_99, %c0_100] : memref<4x64x8xf32, #tpu.memory_space<vmem>>, vector<1x64x8xf32>
    %165 = vector.shape_cast %164 : vector<1x64x8xf32> to vector<64x8xf32>
    %cst_101 = arith.constant dense<0.000000e+00> : vector<8x8xf32>
    %166 = tpu.matmul %22, %165, %cst_101 {dimension_numbers = #tpu.dot_dimension_numbers<[1], [0], [0], [1], [0, 0, 1, 1], [], []>} : vector<8x64xf32>, vector<64x8xf32>, vector<8x8xf32> -> vector<8x8xf32>
    %167 = arith.mulf %163, %23 : vector<8x8xf32>
    %168 = arith.mulf %166, %24 : vector<8x8xf32>
    %169 = arith.subf %167, %168 : vector<8x8xf32>
    %170 = arith.mulf %163, %24 : vector<8x8xf32>
    %171 = arith.mulf %166, %23 : vector<8x8xf32>
    %172 = arith.addf %170, %171 : vector<8x8xf32>
    %cst_102 = arith.constant dense<0.000000e+00> : vector<8x8xf32>
    %173 = tpu.matmul %169, %51, %cst_102 {dimension_numbers = #tpu.dot_dimension_numbers<[1], [1], [0], [0], [0, 0, 1, 0], [], []>} : vector<8x8xf32>, vector<8x8xf32>, vector<8x8xf32> -> vector<8x8xf32>
    %cst_103 = arith.constant dense<0.000000e+00> : vector<8x8xf32>
    %174 = tpu.matmul %172, %54, %cst_103 {dimension_numbers = #tpu.dot_dimension_numbers<[1], [1], [0], [0], [0, 0, 1, 0], [], []>} : vector<8x8xf32>, vector<8x8xf32>, vector<8x8xf32> -> vector<8x8xf32>
    %175 = arith.addf %173, %174 : vector<8x8xf32>
    %cst_104 = arith.constant 2.500000e-01 : f32
    %176 = vector.broadcast %cst_104 : f32 to vector<8x8xf32>
    %177 = arith.mulf %175, %176 : vector<8x8xf32>
    %cst_105 = arith.constant -1.000000e+30 : f32
    %178 = vector.broadcast %cst_105 : f32 to vector<8x8xf32>
    %179 = arith.select %27, %177, %178 : vector<8x8xi1>, vector<8x8xf32>
    %cst_106 = arith.constant dense<0xFF800000> : vector<8xf32>
    %180 = vector.multi_reduction <maximumf>, %179, %cst_106 [1] : vector<8x8xf32> to vector<8xf32>
    %181 = vector.shape_cast %180 : vector<8xf32> to vector<8x1xf32>
    %182 = vector.broadcast %181 : vector<8x1xf32> to vector<8x8xf32>
    %183 = arith.subf %179, %182 : vector<8x8xf32>
    %184 = math.exp %183 : vector<8x8xf32>
    %cst_107 = arith.constant dense<0.000000e+00> : vector<8xf32>
    %185 = vector.multi_reduction <add>, %184, %cst_107 [1] : vector<8x8xf32> to vector<8xf32>
    %186 = vector.shape_cast %185 : vector<8xf32> to vector<8x1xf32>
    %187 = tpu.reciprocal %186 {approx = true} : vector<8x1xf32> -> vector<8x1xf32>
    %188 = vector.broadcast %187 : vector<8x1xf32> to vector<8x8xf32>
    %189 = arith.mulf %184, %188 : vector<8x8xf32>
    %cst_108 = arith.constant dense<0.000000e+00> : vector<8x16xf32>
    %190 = tpu.matmul %189, %57, %cst_108 {dimension_numbers = #tpu.dot_dimension_numbers<[1], [0], [0], [1], [0, 0, 1, 1], [], []>} : vector<8x8xf32>, vector<8x16xf32>, vector<8x16xf32> -> vector<8x16xf32>
    %c3_109 = arith.constant 3 : index
    %c0_110 = arith.constant 0 : index
    %c0_111 = arith.constant 0 : index
    %191 = vector.load %arg8[%c3_109, %c0_110, %c0_111] : memref<4x16x64xf32, #tpu.memory_space<vmem>>, vector<1x16x64xf32>
    %192 = vector.shape_cast %191 : vector<1x16x64xf32> to vector<16x64xf32>
    %cst_112 = arith.constant dense<0.000000e+00> : vector<8x64xf32>
    %193 = tpu.matmul %190, %192, %cst_112 {dimension_numbers = #tpu.dot_dimension_numbers<[1], [0], [0], [1], [0, 0, 1, 1], [], []>} : vector<8x16xf32>, vector<16x64xf32>, vector<8x64xf32> -> vector<8x64xf32>
    %194 = arith.addf %160, %193 : vector<8x64xf32>
    %c0_113 = arith.constant 0 : index
    %c0_114 = arith.constant 0 : index
    %195 = vector.load %arg9[%c0_113, %c0_114] : memref<64x128xf32, #tpu.memory_space<vmem>>, vector<64x128xf32>
    %cst_115 = arith.constant dense<0.000000e+00> : vector<8x128xf32>
    %196 = tpu.matmul %22, %195, %cst_115 {dimension_numbers = #tpu.dot_dimension_numbers<[1], [0], [0], [1], [0, 0, 1, 1], [], []>} : vector<8x64xf32>, vector<64x128xf32>, vector<8x128xf32> -> vector<8x128xf32>
    %c0_116 = arith.constant 0 : index
    %c0_117 = arith.constant 0 : index
    %197 = vector.load %arg10[%c0_116, %c0_117] : memref<64x128xf32, #tpu.memory_space<vmem>>, vector<64x128xf32>
    %cst_118 = arith.constant dense<0.000000e+00> : vector<8x128xf32>
    %198 = tpu.matmul %22, %197, %cst_118 {dimension_numbers = #tpu.dot_dimension_numbers<[1], [0], [0], [1], [0, 0, 1, 1], [], []>} : vector<8x64xf32>, vector<64x128xf32>, vector<8x128xf32> -> vector<8x128xf32>
    %199 = arith.negf %196 : vector<8x128xf32>
    %200 = math.exp %199 : vector<8x128xf32>
    %cst_119 = arith.constant 1.000000e+00 : f32
    %201 = vector.broadcast %cst_119 : f32 to vector<8x128xf32>
    %202 = arith.addf %201, %200 : vector<8x128xf32>
    %203 = arith.divf %201, %202 : vector<8x128xf32>
    %204 = arith.mulf %196, %203 : vector<8x128xf32>
    %205 = arith.mulf %204, %198 : vector<8x128xf32>
    %c0_120 = arith.constant 0 : index
    %c0_121 = arith.constant 0 : index
    %206 = vector.load %arg11[%c0_120, %c0_121] : memref<128x64xf32, #tpu.memory_space<vmem>>, vector<128x64xf32>
    %cst_122 = arith.constant dense<0.000000e+00> : vector<8x64xf32>
    %207 = tpu.matmul %205, %206, %cst_122 {dimension_numbers = #tpu.dot_dimension_numbers<[1], [0], [0], [1], [0, 0, 1, 1], [], []>} : vector<8x128xf32>, vector<128x64xf32>, vector<8x64xf32> -> vector<8x64xf32>
    %208 = arith.addf %194, %207 : vector<8x64xf32>
    %c0_123 = arith.constant 0 : index
    %c0_124 = arith.constant 0 : index
    %209 = vector.load %arg14[%c0_123, %c0_124] : memref<8x64xf32, #tpu.memory_space<vmem>>, vector<8x64xf32>
    tpu.vector_store %arg14[%c0_123, %c0_124], %208 {strides = array<i32>} : memref<8x64xf32, #tpu.memory_space<vmem>>, vector<8x64xf32>,
    return
  }
}

</mosaic_0001>

<bundles_post_ra>
// kernel: flash_cohere_forward.5
= control target key start
LH: loop header
LB: loop body
LE: loop exit
PB: predicated region body
PF: predicated region fallthrough
CT: control target
= control target key end

     0   :  { %11 = vsyncpa [#allocation3], 0  ;;  %vm25_vm0 = vcmask 523264   ;;  %s578_s0 = inlined_call_operand.vmem [shape: f32[8,64], index: 0, kind: input, shape index: {}]   ;;  %s579_s1 = inlined_call_operand.vmem [shape: f32[8,64], index: 1, kind: input, shape index: {}]   ;;  %s580_s2 = inlined_call_operand.vmem [shape: f32[1,64], index: 2, kind: input, shape index: {}]   ;;  %s581_s3 = inlined_call_operand.vmem [shape: f32[256,64], index: 3, kind: input, shape index: {}]   ;;  %s582_s4 = inlined_call_operand.hbm [shape: f32[8,64], index: 4, kind: output, shape index: {0}]   ;;  %s583_s5 = inlined_call_operand.hbm [shape: f32[8,256], index: 5, kind: output, shape index: {1}]  }
   0x1   :  { %v21_v0 = vld [vmem:[%s578_s0] sm:$0xff] }
   0x2   :  { %v22_v1 = vld [vmem:[%s579_s1] sm:$0xff] }
   0x3   :  { %12 = vsyncpa [#allocation5], 0  ;;  %v23_v2 = vadd.f32 %v22_v1, %v21_v0  ;;  %v79_v4 = vld [vmem:[%s581_s3 + $0xf8] sm:$0xff]  ;;  %v78_v6 = vld [vmem:[%s581_s3 + $0xf0] sm:$0xff] }
   0x4   :  { %v63_v5 = vld [vmem:[%s581_s3 + $0x78] sm:$0xff]  ;;  %316 = vmatprep.subr.msk.mxu0 %vm25_vm0, %v79_v4  ;;  %v62_v7 = vld [vmem:[%s581_s3 + $0x70] sm:$0xff]  ;;  %v77_v8 = vld [vmem:[%s581_s3 + $0xe8] sm:$0xff] }
   0x5   :  { %v26_v3 = vsel %vm25_vm0, %v23_v2, 0.0  ;;  %317 = vmatpush3.xpose.msk.msra.mxu0 %vm25_vm0, %v63_v5  ;;  %v61_v9 = vld [vmem:[%s581_s3 + $0x68] sm:$0xff]  ;;  %v76_v10 = vld [vmem:[%s581_s3 + $0xe0] sm:$0xff]  ;;  %v75_v12 = vld [vmem:[%s581_s3 + $0xd8] sm:$0xff] }
   0x6   :  { %27 = vadd.xlane.f32.xlu0 %v26_v3  ;;  %318 = vmatprep.subr.msk.mxu0 %vm25_vm0, %v78_v6  ;;  %v60_v11 = vld [vmem:[%s581_s3 + $0x60] sm:$0xff]  ;;  %v59_v13 = vld [vmem:[%s581_s3 + $0x58] sm:$0xff]  ;;  %v74_v14 = vld [vmem:[%s581_s3 + $0xd0] sm:$0xff] }
   0x7   :  { %v58_v15 = vld [vmem:[%s581_s3 + $0x50] sm:$0xff]  ;;  %v73_v16 = vld [vmem:[%s581_s3 + $0xc8] sm:$0xff]  ;;  %v72_v18 = vld [vmem:[%s581_s3 + $0xc0] sm:$0xff] }
   0x8   :  { %v57_v17 = vld [vmem:[%s581_s3 + $0x48] sm:$0xff]  ;;  %v56_v19 = vld [vmem:[%s581_s3 + $0x40] sm:$0xff]  ;;  %v71_v20 = vld [vmem:[%s581_s3 + $0xb8] sm:$0xff] }
   0x9   :  { %319 = vmatpush3.xpose.msk.msra.mxu0 %vm25_vm0, %v62_v7  ;;  %v55_v21 = vld [vmem:[%s581_s3 + $0x38] sm:$0xff]  ;;  %v70_v22 = vld [vmem:[%s581_s3 + $0xb0] sm:$0xff]  ;;  %v69_v24 = vld [vmem:[%s581_s3 + $0xa8] sm:$0xff] }
   0xa   :  { %320 = vmatprep.subr.msk.mxu0 %vm25_vm0, %v77_v8  ;;  %v54_v23 = vld [vmem:[%s581_s3 + $0x30] sm:$0xff]  ;;  %v53_v30 = vld [vmem:[%s581_s3 + $0x28] sm:$0xff]  ;;  %v68_v31 = vld [vmem:[%s581_s3 + $0xa0] sm:$0xff] }
   0xb   :  { %v52_v32 = vld [vmem:[%s581_s3 + $0x20] sm:$0xff]  ;;  %v67_v33 = vld [vmem:[%s581_s3 + $0x98] sm:$0xff]  ;;  %v66_v35 = vld [vmem:[%s581_s3 + $0x90] sm:$0xff] }
   0xc   :  { %v51_v34 = vld [vmem:[%s581_s3 + $0x18] sm:$0xff]  ;;  %v50_v36 = vld [vmem:[%s581_s3 + $0x10] sm:$0xff]  ;;  %v65_v37 = vld [vmem:[%s581_s3 + $0x88] sm:$0xff] }
   0xd   :  { %321 = vmatpush3.xpose.msk.msra.mxu0 %vm25_vm0, %v61_v9  ;;  %v49_v38 = vld [vmem:[%s581_s3 + $0x8] sm:$0xff]  ;;  %v64_v39 = vld [vmem:[%s581_s3 + $0x80] sm:$0xff] }
   0xe   :  { %322 = vmatprep.subr.msk.mxu0 %vm25_vm0, %v76_v10  ;;  %v48_v40 = vld [vmem:[%s581_s3] sm:$0xff]  ;;  %s398_s3 = smov [#allocation2]  }
   0xf   :  { %v282_v45 = vld [vmem:[%s580_s2] ss:$0 sm:$0xff]  ;;  %s260_s7 = sshll.u32 %s398_s3, 4  ;;  %s261_s7 = int_to_ptr.vmem [resolvable:$true] %s260_s7 }
  0x10   :  { %s354_s8 = scalar_lea.vmem %s261_s7, 128  ;;  %p359_p1 = scmp.lt.s32.totalorder %s261_s7, %s261_s7 }
  0x11   :  { %323 = vmatpush3.xpose.msk.msra.mxu0 %vm25_vm0, %v60_v11  ;;  %p355_p0 = scmp.ne.s32.totalorder %s261_s7, %s354_s8  ;;  %p360_p2 = scmp.lt.s32.totalorder %s354_s8, %s354_s8 }
  0x12   :  { %324 = vmatprep.subr.msk.mxu0 %vm25_vm0, %v75_v12 }
  0x13   :  { %p361_p3 = por %p360_p2, %p359_p1 }
  0x15   :  { %325 = vmatpush3.xpose.msk.msra.mxu0 %vm25_vm0, %v59_v13  ;;  %p362_p4 = pnand %p361_p3, %p355_p0 }
  0x16   :  { %326 = vmatprep.subr.msk.mxu0 %vm25_vm0, %v74_v14 }
  0x19   :  { %327 = vmatpush3.xpose.msk.msra.mxu0 %vm25_vm0, %v58_v15 }
  0x1a   :  { %328 = vmatprep.subr.msk.mxu0 %vm25_vm0, %v73_v16 }
  0x1d   :  { %329 = vmatpush3.xpose.msk.msra.mxu0 %vm25_vm0, %v57_v17 }
  0x1e   :  { %330 = vmatprep.subr.msk.mxu0 %vm25_vm0, %v72_v18 }
  0x21   :  { %331 = vmatpush3.xpose.msk.msra.mxu0 %vm25_vm0, %v56_v19 }
  0x22   :  { %332 = vmatprep.subr.msk.mxu0 %vm25_vm0, %v71_v20 }
  0x25   :  { %333 = vmatpush3.xpose.msk.msra.mxu0 %vm25_vm0, %v55_v21 }
  0x26   :  { %334 = vmatprep.subr.msk.mxu0 %vm25_vm0, %v70_v22 }
  0x29   :  { %335 = vmatpush3.xpose.msk.msra.mxu0 %vm25_vm0, %v54_v23 }
  0x2a   :  { %336 = vmatprep.subr.msk.mxu0 %vm25_vm0, %v69_v24 }
  0x2d   :  { %337 = vmatpush3.xpose.msk.msra.mxu0 %vm25_vm0, %v53_v30 }
  0x2e   :  { %338 = vmatprep.subr.msk.mxu0 %vm25_vm0, %v68_v31 }
  0x31   :  { %339 = vmatpush3.xpose.msk.msra.mxu0 %vm25_vm0, %v52_v32 }
  0x32   :  { %340 = vmatprep.subr.msk.mxu0 %vm25_vm0, %v67_v33 }
  0x35   :  { %341 = vmatpush3.xpose.msk.msra.mxu0 %vm25_vm0, %v51_v34 }
  0x36   :  { %342 = vmatprep.subr.msk.mxu0 %vm25_vm0, %v66_v35 }
  0x39   :  { %343 = vmatpush3.xpose.msk.msra.mxu0 %vm25_vm0, %v50_v36 }
  0x3a   :  { %344 = vmatprep.subr.msk.mxu0 %vm25_vm0, %v65_v37 }
  0x3d   :  { %345 = vmatpush3.xpose.msk.msra.mxu0 %vm25_vm0, %v49_v38 }
  0x3e   :  { %346 = vmatprep.subr.msk.mxu0 %vm25_vm0, %v64_v39 }
  0x41   :  { %347 = vmatpush3.xpose.msk.msra.mxu0 %vm25_vm0, %v48_v40 }
  0x8f   :  { %v28_v25 = vpop.xlane.xlu0 %27 }
  0x90   :  { %v30_v26 = vmul.f32 0.015625, %v28_v25 }
  0x92   :  { %v31_v27 = vsub.f32 %v23_v2, %v30_v26 }
  0x94   :  { %v32_v28 = vmul.f32 %v31_v27, %v31_v27 }
  0x96   :  { %v33_v29 = vsel %vm25_vm0, %v32_v28, 0.0 }
  0x97   :  { %34 = vadd.xlane.f32.xlu0 %v33_v29 }
 0x120   :  { %v35_v41 = vpop.xlane.xlu0 %34 }
 0x121   :  { %v36_v42 = vmul.f32 0.015625, %v35_v41 }
 0x123   :  { %v37_v43 = vadd.f32 1e-05, %v36_v42 }
 0x125   :  { %352 = vrsqrt.f32 %v37_v43 }
 0x132   :  { %v353_v44 = vpop.eup %352 }
 0x133   :  { %v39_v46 = vmul.f32 %v353_v44, %v31_v27 }
 0x135   :  { %v46_v47 = vmul.f32 %v282_v45, %v39_v46 }
 0x137   :  { %348 = vmatprep.mubr.msk.f32.mxu0 %vm25_vm0, %v46_v47  ;;  %47 = vst.msk [vmem:[#allocation2] sm:$0xff] %vm25_vm0, %v46_v47 }
 0x138   :  { %349 = vmatmul.mubr.msk.f32.vlgmr.msra.gmra.mxu0 %vm25_vm0, %v46_v47 }
 0x139   :  { %365 = shalt.err (!%p362_p4)
}
 0x13a   :  { %263 = dma.vmem_to_hbm [thread:$0]  %s261_s7, 128, %s582_s4, [#allocation3]  }
 0x13b   :  { %s399_s10 = smov [#allocation4]  }
 0x13c   :  { %s270_s11 = sshll.u32 %s399_s10, 4  ;;  %s271_s11 = int_to_ptr.vmem [resolvable:$true] %s270_s11 }
 0x13d   :  { %s374_s12 = scalar_lea.vmem %s271_s11, 256  ;;  %p379_p6 = scmp.lt.s32.totalorder %s271_s11, %s271_s11 }
 0x13e   :  { %p375_p5 = scmp.ne.s32.totalorder %s271_s11, %s374_s12  ;;  %p380_p7 = scmp.lt.s32.totalorder %s374_s12, %s374_s12 }
 0x140   :  { %p381_p8 = por %p380_p7, %p379_p6 }
 0x142   :  { %p382_p9 = pnand %p381_p8, %p375_p5 }
 0x1f8   :  { %v245_v48 = vpop.f32.mrf.mxu0 }
 0x1f9   :  { %v250_v49 = vmul.f32 0.0625, %v245_v48 }
 0x1fa   :  { %v247_v50 = vpop.f32.mrf.mxu0 }
 0x1fb   :  { %252 = vst [vmem:[#allocation4] sm:$0xff] %v250_v49  ;;  %v251_v51 = vmul.f32 0.0625, %v247_v50 }
 0x1fd   :  { %253 = vst [vmem:[#allocation4 + $0x8] sm:$0xff] %v251_v51 }
 0x1fe   :  { %385 = shalt.err (!%p382_p9)
}
 0x1ff   :  { %273 = dma.vmem_to_hbm [thread:$0]  %s271_s11, 256, %s583_s5, [#allocation5]  }
 0x200   :  { %394 = dma.done.wait [#allocation3], 128  }
 0x201   :  { %395 = vsyncadd [#allocation3], 4294967168 }
 0x202   :  { %396 = dma.done.wait [#allocation5], 256  }
 0x203   :  { %397 = vsyncadd [#allocation5], 4294967040 }
 0x204   :  { %280 = vsyncpa [#allocation3], 1 }
 0x205   :  { %281 = vsyncpa [#allocation5], 1 }

// kernel: flash_cohere_forward.4
= control target key start
LH: loop header
LB: loop body
LE: loop exit
PB: predicated region body
PF: predicated region fallthrough
CT: control target
= control target key end

     0   :  { %vm52_vm0 = vcmask 523264   ;;  %v3498_v9 = vmov 0.0   ;;  %vm3499_vm1 = vmmov 0   ;;  %vm731_vm2 = vcmask 64512   ;;  %s4437_s0 = inlined_call_operand.vmem [shape: f32[8,64], index: 0, kind: input, shape index: {}]   ;;  %s4438_s1 = inlined_call_operand.vmem [shape: f32[8,64], index: 1, kind: input, shape index: {}]   ;;  %s4439_s15 = inlined_call_operand.vmem [shape: f32[8,64], index: 15, kind: output, shape index: {1}]   ;;  %s4440_s5 = inlined_call_operand.vmem [shape: f32[2,64,8], index: 5, kind: input, shape index: {}]   ;;  %s4441_s7 = inlined_call_operand.vmem [shape: f32[2,64,16], index: 7, kind: input, shape index: {}]   ;;  %s4442_s2 = inlined_call_operand.vmem [shape: f32[1,64], index: 2, kind: input, shape index: {}]   ;;  %s4443_s6 = inlined_call_operand.vmem [shape: f32[2,64,8], index: 6, kind: input, shape index: {}]   ;;  %s4444_s3 = inlined_call_operand.vmem [shape: f32[4,64,8], index: 3, kind: input, shape index: {}]   ;;  %s4445_s4 = inlined_call_operand.vmem [shape: f32[4,64,8], index: 4, kind: input, shape index: {}]   ;;  %s4446_s12 = inlined_call_operand.vmem [shape: f32[8,8], index: 12, kind: input, shape index: {}]   ;;  %s4447_s13 = inlined_call_operand.vmem [shape: f32[8,8], index: 13, kind: input, shape index: {}]   ;;  %s4448_s8 = inlined_call_operand.vmem [shape: f32[4,16,64], index: 8, kind: input, shape index: {}]   ;;  %s4449_s9 = inlined_call_operand.vmem [shape: f32[64,128], index: 9, kind: input, shape index: {}]   ;;  %s4450_s11 = inlined_call_operand.vmem [shape: f32[128,64], index: 11, kind: input, shape index: {}]   ;;  %s4451_s10 = inlined_call_operand.vmem [shape: f32[64,128], index: 10, kind: input, shape index: {}]   ;;  %s4452_s14 = inlined_call_operand.vmem [shape: f32[8,64], index: 14, kind: output, shape index: {0}]  }
   0x1   :  { %v49_v0 = vld [vmem:[%s4437_s0] sm:$0xff]  ;;  %3047 = vmatprep.subr.mxu1 %v3498_v9  ;;  %3085 = vmatprep.subr.mxu0 %v3498_v9  ;;  %v90_v10 = vld [vmem:[%s4440_s5 + $0x38] sm:$0xff]  ;;  %v89_v12 = vld [vmem:[%s4440_s5 + $0x30] sm:$0xff]  ;;  %vm1371_vm4 = vcmask 130048  }
   0x2   :  { %v50_v1 = vld [vmem:[%s4438_s1] sm:$0xff]  ;;  %v255_v11 = vld [vmem:[%s4441_s7 + $0x38] sm:$0xff]  ;;  %3048 = vmatpush3.msra.mxu1 %v90_v10  ;;  %v254_v13 = vld [vmem:[%s4441_s7 + $0x30] sm:$0xff]  ;;  %3063 = vmatprep.mubr.msk.f32.mxu1 %vm3499_vm1, %v3498_v9 }
   0x3   :  { %v51_v2 = vadd.f32 %v50_v1, %v49_v0  ;;  %3086 = vmatpush3.msra.mxu0 %v255_v11  ;;  %3049 = vmatprep.subr.mxu1 %v3498_v9  ;;  %v88_v14 = vld [vmem:[%s4440_s5 + $0x28] sm:$0xff]  ;;  %v87_v16 = vld [vmem:[%s4440_s5 + $0x20] sm:$0xff]  ;;  %v86_v18 = vld [vmem:[%s4440_s5 + $0x18] sm:$0xff] }
   0x4   :  { %3087 = vmatprep.subr.mxu0 %v3498_v9  ;;  %3050 = vmatpush3.msra.mxu1 %v89_v12  ;;  %v253_v15 = vld [vmem:[%s4441_s7 + $0x28] sm:$0xff]  ;;  %v252_v17 = vld [vmem:[%s4441_s7 + $0x20] sm:$0xff]  ;;  %v251_v19 = vld [vmem:[%s4441_s7 + $0x18] sm:$0xff] }
   0x5   :  { %v55_v3 = vsel %vm52_vm0, %v51_v2, 0.0  ;;  %53 = vst.msk [vmem:[%s4439_s15] sm:$0xff] %vm52_vm0, %v51_v2  ;;  %3088 = vmatpush3.msra.mxu0 %v254_v13  ;;  %3051 = vmatprep.subr.mxu1 %v3498_v9  ;;  %v85_v20 = vld [vmem:[%s4440_s5 + $0x10] sm:$0xff]  ;;  %v84_v22 = vld [vmem:[%s4440_s5 + $0x8] sm:$0xff]  ;;  %v83_v24 = vld [vmem:[%s4440_s5] sm:$0xff] }
   0x6   :  { %56 = vadd.xlane.f32.xlu0 %v55_v3  ;;  %3089 = vmatprep.subr.mxu0 %v3498_v9  ;;  %v250_v21 = vld [vmem:[%s4441_s7 + $0x10] sm:$0xff]  ;;  %v249_v23 = vld [vmem:[%s4441_s7 + $0x8] sm:$0xff]  ;;  %v248_v25 = vld [vmem:[%s4441_s7] sm:$0xff] }
   0x7   :  { %3052 = vmatpush3.msra.mxu1 %v88_v14  ;;  %3090 = vmatpush3.msra.mxu0 %v253_v15  ;;  %v2730_v30 = vld [vmem:[%s4442_s2] ss:$0 sm:$0xff]  ;;  %v171_v33 = vld [vmem:[%s4443_s6 + $0x38] sm:$0xff]  ;;  %v170_v35 = vld [vmem:[%s4443_s6 + $0x30] sm:$0xff] }
   0x8   :  { %3053 = vmatprep.subr.mxu1 %v3498_v9  ;;  %3091 = vmatprep.subr.mxu0 %v3498_v9  ;;  %v2750_v34 = vld [vmem:[%s4443_s6 + $0x78] sm:$0xff]  ;;  %v2749_v36 = vld [vmem:[%s4443_s6 + $0x70] sm:$0xff]  ;;  %v169_v37 = vld [vmem:[%s4443_s6 + $0x28] sm:$0xff] }
   0x9   :  { %3054 = vmatpush3.msra.mxu1 %v87_v16  ;;  %3092 = vmatpush3.msra.mxu0 %v252_v17  ;;  %v2748_v38 = vld [vmem:[%s4443_s6 + $0x68] sm:$0xff]  ;;  %v168_v39 = vld [vmem:[%s4443_s6 + $0x20] sm:$0xff]  ;;  %v167_v41 = vld [vmem:[%s4443_s6 + $0x18] sm:$0xff] }
   0xa   :  { %3055 = vmatprep.subr.mxu1 %v3498_v9  ;;  %3093 = vmatprep.subr.mxu0 %v3498_v9  ;;  %v2747_v40 = vld [vmem:[%s4443_s6 + $0x60] sm:$0xff]  ;;  %v2746_v42 = vld [vmem:[%s4443_s6 + $0x58] sm:$0xff]  ;;  %v166_v43 = vld [vmem:[%s4443_s6 + $0x10] sm:$0xff] }
   0xb   :  { %3056 = vmatpush3.msra.mxu1 %v86_v18  ;;  %3094 = vmatpush3.msra.mxu0 %v251_v19  ;;  %v2745_v44 = vld [vmem:[%s4443_s6 + $0x50] sm:$0xff]  ;;  %v165_v45 = vld [vmem:[%s4443_s6 + $0x8] sm:$0xff]  ;;  %v164_v47 = vld [vmem:[%s4443_s6] sm:$0xff] }
   0xc   :  { %3057 = vmatprep.subr.mxu1 %v3498_v9  ;;  %3095 = vmatprep.subr.mxu0 %v3498_v9  ;;  %v2744_v46 = vld [vmem:[%s4443_s6 + $0x48] sm:$0xff]  ;;  %v2743_v48 = vld [vmem:[%s4443_s6 + $0x40] sm:$0xff]  ;;  %v2741_v49 = vld [vmem:[%s4440_s5 + $0x78] sm:$0xff] }
   0xd   :  { %3058 = vmatpush3.msra.mxu1 %v85_v20  ;;  %3096 = vmatpush3.msra.mxu0 %v250_v21  ;;  %v576_v50 = vld [vmem:[%s4444_s3 + $0x38] sm:$0xff]  ;;  %v2740_v51 = vld [vmem:[%s4440_s5 + $0x70] sm:$0xff]  ;;  %v2739_v53 = vld [vmem:[%s4440_s5 + $0x68] sm:$0xff] }
   0xe   :  { %3059 = vmatprep.subr.mxu1 %v3498_v9  ;;  %3097 = vmatprep.subr.mxu0 %v3498_v9  ;;  %v575_v52 = vld [vmem:[%s4444_s3 + $0x30] sm:$0xff]  ;;  %v574_v54 = vld [vmem:[%s4444_s3 + $0x28] sm:$0xff]  ;;  %v2738_v55 = vld [vmem:[%s4440_s5 + $0x60] sm:$0xff] }
   0xf   :  { %3060 = vmatpush3.msra.mxu1 %v84_v22  ;;  %3098 = vmatpush3.msra.mxu0 %v249_v23  ;;  %v573_v56 = vld [vmem:[%s4444_s3 + $0x20] sm:$0xff]  ;;  %v2737_v57 = vld [vmem:[%s4440_s5 + $0x58] sm:$0xff]  ;;  %v2736_v59 = vld [vmem:[%s4440_s5 + $0x50] sm:$0xff] }
  0x10   :  { %3061 = vmatprep.subr.mxu1 %v3498_v9  ;;  %3099 = vmatprep.subr.mxu0 %v3498_v9  ;;  %v572_v58 = vld [vmem:[%s4444_s3 + $0x18] sm:$0xff]  ;;  %v571_v60 = vld [vmem:[%s4444_s3 + $0x10] sm:$0xff]  ;;  %v2735_v61 = vld [vmem:[%s4440_s5 + $0x48] sm:$0xff] }
  0x11   :  { %3062 = vmatpush3.msra.mxu1 %v83_v24  ;;  %3100 = vmatpush3.msra.mxu0 %v248_v25  ;;  %v570_v62 = vld [vmem:[%s4444_s3 + $0x8] sm:$0xff]  ;;  %v2734_v63 = vld [vmem:[%s4440_s5 + $0x40] sm:$0xff]  ;;  %v2759_v1 = vld [vmem:[%s4441_s7 + $0x78] sm:$0xff] }
  0x12   :  { %3066 = vmatprep.subr.mxu1 %v3498_v9  ;;  %3101 = vmatprep.mubr.msk.f32.mxu0 %vm3499_vm1, %v3498_v9  ;;  %v569_v0 = vld [vmem:[%s4444_s3] sm:$0xff]  ;;  %v2757_v3 = vld [vmem:[%s4441_s7 + $0x68] sm:$0xff]  ;;  %v654_v10 = vld [vmem:[%s4445_s4 + $0x38] sm:$0xff] }
  0x13   :  { %3123 = vmatprep.subr.mxu0 %v3498_v9  ;;  %v653_v11 = vld [vmem:[%s4445_s4 + $0x30] sm:$0xff]  ;;  %v652_v12 = vld [vmem:[%s4445_s4 + $0x28] sm:$0xff]  ;;  %v651_v13 = vld [vmem:[%s4445_s4 + $0x20] sm:$0xff] }
  0x14   :  { %v650_v14 = vld [vmem:[%s4445_s4 + $0x18] sm:$0xff]  ;;  %v649_v15 = vld [vmem:[%s4445_s4 + $0x10] sm:$0xff]  ;;  %v648_v16 = vld [vmem:[%s4445_s4 + $0x8] sm:$0xff] }
  0x15   :  { %v647_v17 = vld [vmem:[%s4445_s4] sm:$0xff] }
  0x16   :  { %v3901_v22 = vld [vmem:[%s4446_s12] sm:$0xff] }
  0x17   :  { %v3906_v23 = vld [vmem:[%s4447_s13] sm:$0xff] }
  0x8f   :  { %v57_v4 = vpop.xlane.xlu0 %56 }
  0x90   :  { %v59_v5 = vmul.f32 0.015625, %v57_v4  ;;  %v2756_v4 = vld [vmem:[%s4441_s7 + $0x60] sm:$0xff] }
  0x92   :  { %v3591_v6 = vsub.f32 %v51_v2, %v59_v5  ;;  %v2758_v2 = vld [vmem:[%s4441_s7 + $0x70] sm:$0xff]  ;;  %v2755_v5 = vld [vmem:[%s4441_s7 + $0x58] sm:$0xff] }
  0x94   :  { %v61_v7 = vmul.f32 %v3591_v6, %v3591_v6 }
  0x96   :  { %v62_v8 = vsel %vm52_vm0, %v61_v7, 0.0  ;;  %v2753_v7 = vld [vmem:[%s4441_s7 + $0x48] sm:$0xff] }
  0x97   :  { %63 = vadd.xlane.f32.xlu0 %v62_v8  ;;  %v2752_v8 = vld [vmem:[%s4441_s7 + $0x40] sm:$0xff] }
 0x120   :  { %v64_v26 = vpop.xlane.xlu0 %63 }
 0x121   :  { %v65_v27 = vmul.f32 0.015625, %v64_v26 }
 0x123   :  { %v66_v28 = vadd.f32 1e-05, %v65_v27 }
 0x125   :  { %3476 = vrsqrt.f32 %v66_v28 }
 0x132   :  { %v3477_v29 = vpop.eup %3476 }
 0x133   :  { %v68_v31 = vmul.f32 %v3477_v29, %v3591_v6  ;;  %v2754_v6 = vld [vmem:[%s4441_s7 + $0x50] sm:$0xff] }
 0x135   :  { %v3670_v32 = vmul.f32 %v2730_v30, %v68_v31 }
 0x137   :  { %3064 = vmatmul.mubr.msk.f32.vlgmr.msra.gmra.mxu1 %vm52_vm0, %v3670_v32  ;;  %3102 = vmatmul.mubr.msk.f32.vlgmr.msra.gmra.mxu0 %vm52_vm0, %v3670_v32 }
 0x138   :  { %3067 = vmatpush3.msra.mxu1 %v171_v33  ;;  %3124 = vmatpush3.msra.mxu0 %v2750_v34 }
 0x139   :  { %3068 = vmatprep.subr.mxu1 %v3498_v9  ;;  %3125 = vmatprep.subr.mxu0 %v3498_v9 }
 0x13a   :  { %3069 = vmatpush3.msra.mxu1 %v170_v35  ;;  %3126 = vmatpush3.msra.mxu0 %v2749_v36 }
 0x13b   :  { %3070 = vmatprep.subr.mxu1 %v3498_v9  ;;  %3127 = vmatprep.subr.mxu0 %v3498_v9 }
 0x13c   :  { %3071 = vmatpush3.msra.mxu1 %v169_v37  ;;  %3128 = vmatpush3.msra.mxu0 %v2748_v38 }
 0x13d   :  { %3072 = vmatprep.subr.mxu1 %v3498_v9  ;;  %3129 = vmatprep.subr.mxu0 %v3498_v9 }
 0x13e   :  { %3073 = vmatpush3.msra.mxu1 %v168_v39  ;;  %3130 = vmatpush3.msra.mxu0 %v2747_v40 }
 0x13f   :  { %3074 = vmatprep.subr.mxu1 %v3498_v9  ;;  %3131 = vmatprep.subr.mxu0 %v3498_v9 }
 0x140   :  { %3075 = vmatpush3.msra.mxu1 %v167_v41  ;;  %3132 = vmatpush3.msra.mxu0 %v2746_v42 }
 0x141   :  { %3076 = vmatprep.subr.mxu1 %v3498_v9  ;;  %3133 = vmatprep.subr.mxu0 %v3498_v9 }
 0x142   :  { %3077 = vmatpush3.msra.mxu1 %v166_v43  ;;  %3134 = vmatpush3.msra.mxu0 %v2745_v44 }
 0x143   :  { %3078 = vmatprep.subr.mxu1 %v3498_v9  ;;  %3135 = vmatprep.subr.mxu0 %v3498_v9 }
 0x144   :  { %3079 = vmatpush3.msra.mxu1 %v165_v45  ;;  %3136 = vmatpush3.msra.mxu0 %v2744_v46 }
 0x145   :  { %3080 = vmatprep.subr.mxu1 %v3498_v9  ;;  %3137 = vmatprep.subr.mxu0 %v3498_v9 }
 0x146   :  { %3081 = vmatpush3.msra.mxu1 %v164_v47  ;;  %3082 = vmatprep.mubr.msk.f32.mxu1 %vm3499_vm1, %v3498_v9 }
 0x147   :  { %3138 = vmatpush3.msra.mxu0 %v2743_v48  ;;  %3139 = vmatprep.mubr.msk.f32.mxu0 %vm3499_vm1, %v3498_v9 }
 0x148   :  { %3083 = vmatmul.mubr.msk.f32.vlgmr.msra.gmra.mxu1 %vm52_vm0, %v3670_v32  ;;  %3104 = vmatprep.subr.mxu1 %v3498_v9 }
 0x149   :  { %3140 = vmatmul.mubr.msk.f32.vlgmr.msra.gmra.mxu0 %vm52_vm0, %v3670_v32  ;;  %3161 = vmatprep.subr.mxu0 %v3498_v9 }
 0x14a   :  { %3105 = vmatpush3.msra.mxu1 %v2741_v49  ;;  %3162 = vmatpush3.msra.mxu0 %v576_v50 }
 0x14b   :  { %3106 = vmatprep.subr.mxu1 %v3498_v9  ;;  %3163 = vmatprep.subr.mxu0 %v3498_v9 }
 0x14c   :  { %3107 = vmatpush3.msra.mxu1 %v2740_v51  ;;  %3164 = vmatpush3.msra.mxu0 %v575_v52 }
 0x14d   :  { %3108 = vmatprep.subr.mxu1 %v3498_v9  ;;  %3165 = vmatprep.subr.mxu0 %v3498_v9 }
 0x14e   :  { %3109 = vmatpush3.msra.mxu1 %v2739_v53  ;;  %3166 = vmatpush3.msra.mxu0 %v574_v54 }
 0x14f   :  { %3110 = vmatprep.subr.mxu1 %v3498_v9  ;;  %3167 = vmatprep.subr.mxu0 %v3498_v9 }
 0x150   :  { %3111 = vmatpush3.msra.mxu1 %v2738_v55  ;;  %3168 = vmatpush3.msra.mxu0 %v573_v56  ;;  %v2775_v55 = vld [vmem:[%s4444_s3 + $0x78] sm:$0xff]  ;;  %v2774_v56 = vld [vmem:[%s4444_s3 + $0x70] sm:$0xff] }
 0x151   :  { %3112 = vmatprep.subr.mxu1 %v3498_v9  ;;  %3169 = vmatprep.subr.mxu0 %v3498_v9 }
 0x152   :  { %3113 = vmatpush3.msra.mxu1 %v2737_v57  ;;  %3170 = vmatpush3.msra.mxu0 %v572_v58  ;;  %v2773_v57 = vld [vmem:[%s4444_s3 + $0x68] sm:$0xff]  ;;  %v2772_v58 = vld [vmem:[%s4444_s3 + $0x60] sm:$0xff] }
 0x153   :  { %3114 = vmatprep.subr.mxu1 %v3498_v9  ;;  %3171 = vmatprep.subr.mxu0 %v3498_v9 }
 0x154   :  { %3115 = vmatpush3.msra.mxu1 %v2736_v59  ;;  %3172 = vmatpush3.msra.mxu0 %v571_v60  ;;  %v2771_v59 = vld [vmem:[%s4444_s3 + $0x58] sm:$0xff]  ;;  %v2770_v60 = vld [vmem:[%s4444_s3 + $0x50] sm:$0xff] }
 0x155   :  { %3116 = vmatprep.subr.mxu1 %v3498_v9  ;;  %3173 = vmatprep.subr.mxu0 %v3498_v9 }
 0x156   :  { %3117 = vmatpush3.msra.mxu1 %v2735_v61  ;;  %3174 = vmatpush3.msra.mxu0 %v570_v62  ;;  %v2769_v61 = vld [vmem:[%s4444_s3 + $0x48] sm:$0xff]  ;;  %v2768_v62 = vld [vmem:[%s4444_s3 + $0x40] sm:$0xff] }
 0x157   :  { %3118 = vmatprep.subr.mxu1 %v3498_v9  ;;  %3175 = vmatprep.subr.mxu0 %v3498_v9 }
 0x158   :  { %3119 = vmatpush3.msra.mxu1 %v2734_v63  ;;  %3120 = vmatprep.mubr.msk.f32.mxu1 %vm3499_vm1, %v3498_v9  ;;  %v78_v63 = vlaneseq }
 0x159   :  { %3176 = vmatpush3.msra.mxu0 %v569_v0  ;;  %3177 = vmatprep.mubr.msk.f32.mxu0 %vm3499_vm1, %v3498_v9 }
 0x15a   :  { %3121 = vmatmul.mubr.msk.f32.vlgmr.msra.gmra.mxu1 %vm52_vm0, %v3670_v32  ;;  %3142 = vmatprep.subr.mxu1 %v3498_v9  ;;  %v3979_v0 = vshrl.u32 %v78_v63, 7 }
 0x15b   :  { %3178 = vmatmul.mubr.msk.f32.vlgmr.msra.gmra.mxu0 %vm52_vm0, %v3670_v32  ;;  %3143 = vmatpush3.msra.mxu1 %v2759_v1  ;;  %v3981_v1 = vand.u32 127, %v78_v63  ;;  %v971_v63 = vld [vmem:[%s4448_s8 + $0x8] sm:$0xff] }
 0x15c   :  { %3144 = vmatprep.subr.mxu1 %v3498_v9  ;;  %3158 = vmatprep.mubr.msk.f32.mxu1 %vm3499_vm1, %v3498_v9 }
 0x15d   :  { %3145 = vmatpush3.msra.mxu1 %v2758_v2  ;;  %3199 = vmatprep.subr.mxu0 %v3498_v9  ;;  %vm82_vm3 = vcmp.ge.s32.totalorder %v3979_v0, %v3981_v1  ;;  %v2844_v0 = vld [vmem:[%s4448_s8 + $0x30] sm:$0xff] }
 0x15e   :  { %3146 = vmatprep.subr.mxu1 %v3498_v9  ;;  %3201 = vmatprep.mubr.msk.f32.mxu0 %vm3499_vm1, %v3498_v9 }
 0x15f   :  { %3147 = vmatpush3.msra.mxu1 %v2757_v3 }
 0x160   :  { %3148 = vmatprep.subr.mxu1 %v3498_v9 }
 0x161   :  { %3149 = vmatpush3.msra.mxu1 %v2756_v4 }
 0x162   :  { %3150 = vmatprep.subr.mxu1 %v3498_v9 }
 0x163   :  { %3151 = vmatpush3.msra.mxu1 %v2755_v5 }
 0x164   :  { %3152 = vmatprep.subr.mxu1 %v3498_v9 }
 0x165   :  { %3153 = vmatpush3.msra.mxu1 %v2754_v6 }
 0x166   :  { %3154 = vmatprep.subr.mxu1 %v3498_v9 }
 0x167   :  { %3155 = vmatpush3.msra.mxu1 %v2753_v7 }
 0x168   :  { %3156 = vmatprep.subr.mxu1 %v3498_v9 }
 0x169   :  { %3157 = vmatpush3.msra.mxu1 %v2752_v8 }
 0x16a   :  { %3159 = vmatmul.mubr.msk.f32.vlgmr.msra.gmra.mxu1 %vm52_vm0, %v3670_v32  ;;  %3180 = vmatprep.subr.mxu1 %v3498_v9 }
 0x16b   :  { %3181 = vmatpush3.msra.mxu1 %v654_v10  ;;  %3196 = vmatprep.mubr.msk.f32.mxu1 %vm3499_vm1, %v3498_v9 }
 0x16c   :  { %3182 = vmatprep.subr.mxu1 %v3498_v9 }
 0x16d   :  { %3183 = vmatpush3.msra.mxu1 %v653_v11 }
 0x16e   :  { %3184 = vmatprep.subr.mxu1 %v3498_v9 }
 0x16f   :  { %3185 = vmatpush3.msra.mxu1 %v652_v12 }
 0x170   :  { %3186 = vmatprep.subr.mxu1 %v3498_v9 }
 0x171   :  { %3187 = vmatpush3.msra.mxu1 %v651_v13 }
 0x172   :  { %3188 = vmatprep.subr.mxu1 %v3498_v9 }
 0x173   :  { %3189 = vmatpush3.msra.mxu1 %v650_v14 }
 0x174   :  { %3190 = vmatprep.subr.mxu1 %v3498_v9 }
 0x175   :  { %3191 = vmatpush3.msra.mxu1 %v649_v15 }
 0x176   :  { %3192 = vmatprep.subr.mxu1 %v3498_v9 }
 0x177   :  { %3193 = vmatpush3.msra.mxu1 %v648_v16 }
 0x178   :  { %3194 = vmatprep.subr.mxu1 %v3498_v9 }
 0x179   :  { %3195 = vmatpush3.msra.mxu1 %v647_v17 }
 0x17a   :  { %3197 = vmatmul.mubr.msk.f32.vlgmr.msra.gmra.mxu1 %vm52_vm0, %v3670_v32  ;;  %3204 = vmatprep.subr.mxu1 %v3498_v9 }
 0x17b   :  { %3206 = vmatprep.mubr.msk.f32.mxu1 %vm3499_vm1, %v3498_v9 }
 0x1f7   :  { %v160_v18 = vpop.f32.mrf.mxu1  ;;  %v3896_v19 = vpop.f32.mrf.mxu0 }
 0x1f8   :  { %v242_v25 = vmul.f32 %v160_v18, %v3901_v22  ;;  %v245_v26 = vmul.f32 %v160_v18, %v3906_v23 }
 0x1f9   :  { %v3065_v20 = vpop.f32.mrf.mxu1  ;;  %v3103_v21 = vpop.f32.mrf.mxu0 }
 0x208   :  { %v238_v24 = vpop.f32.mrf.mxu1 }
 0x209   :  { %v243_v27 = vmul.f32 %v238_v24, %v3906_v23  ;;  %v246_v28 = vmul.f32 %v238_v24, %v3901_v22  ;;  %v480_v29 = vpop.f32.mrf.mxu0  ;;  %v2784_v24 = vld [vmem:[%s4445_s4 + $0x78] sm:$0xff] }
 0x20a   :  { %v3084_v30 = vpop.f32.mrf.mxu1  ;;  %v485_v36 = vmul.f32 %v480_v29, %v3906_v23  ;;  %v488_v37 = vmul.f32 %v480_v29, %v3901_v22  ;;  %v2779_v29 = vld [vmem:[%s4445_s4 + $0x50] sm:$0xff] }
 0x20b   :  { %v3912_v31 = vsub.f32 %v242_v25, %v243_v27  ;;  %v247_v33 = vadd.f32 %v246_v28, %v245_v26  ;;  %v3141_v34 = vpop.f32.mrf.mxu0  ;;  %v2783_v25 = vld [vmem:[%s4445_s4 + $0x70] sm:$0xff]  ;;  %v2782_v26 = vld [vmem:[%s4445_s4 + $0x68] sm:$0xff]  ;;  %v2781_v27 = vld [vmem:[%s4445_s4 + $0x60] sm:$0xff] }
 0x20c   :  { %v2780_v28 = vld [vmem:[%s4445_s4 + $0x58] sm:$0xff]  ;;  %v2778_v30 = vld [vmem:[%s4445_s4 + $0x48] sm:$0xff] }
 0x20d   :  { %3200 = vmatpush3.xpose.msk.msra.mxu0 %vm731_vm2, %v247_v33  ;;  %3205 = vmatpush3.xpose.msk.msra.mxu1 %vm731_vm2, %v3912_v31 }
 0x20e   :  { %3209 = vmatprep.subr.mxu0 %v3498_v9  ;;  %3214 = vmatprep.subr.mxu1 %v3498_v9 }
 0x21a   :  { %v401_v35 = vpop.f32.mrf.mxu1 }
 0x21b   :  { %v484_v38 = vmul.f32 %v401_v35, %v3901_v22  ;;  %v487_v39 = vmul.f32 %v401_v35, %v3906_v23  ;;  %v643_v40 = vpop.f32.mrf.mxu0 }
 0x21c   :  { %v3122_v41 = vpop.f32.mrf.mxu1  ;;  %v725_v48 = vmul.f32 %v643_v40, %v3901_v22  ;;  %v728_v49 = vmul.f32 %v643_v40, %v3906_v23 }
 0x21d   :  { %v3923_v42 = vsub.f32 %v484_v38, %v485_v36  ;;  %v3925_v43 = vadd.f32 %v488_v37, %v487_v39  ;;  %v3179_v44 = vpop.f32.mrf.mxu0 }
 0x22a   :  { %v3927_v45 = vpop.f32.mrf.mxu1 }
 0x22c   :  { %v3160_v46 = vpop.f32.mrf.mxu1 }
 0x23a   :  { %v721_v47 = vpop.f32.mrf.mxu1 }
 0x23b   :  { %v726_v50 = vmul.f32 %v721_v47, %v3906_v23  ;;  %v729_v51 = vmul.f32 %v721_v47, %v3901_v22 }
 0x23c   :  { %v3198_v52 = vpop.f32.mrf.mxu1 }
 0x23d   :  { %v727_v53 = vsub.f32 %v725_v48, %v726_v50  ;;  %v730_v54 = vadd.f32 %v729_v51, %v728_v49 }
 0x23f   :  { %3202 = vmatmul.mubr.msk.f32.vlgmr.msra.gmra.mxu0 %vm731_vm2, %v730_v54  ;;  %3207 = vmatmul.mubr.msk.f32.vlgmr.msra.gmra.mxu1 %vm731_vm2, %v727_v53 }
 0x240   :  { %3210 = vmatpush3.msra.mxu0 %v3896_v19  ;;  %3215 = vmatpush3.msra.mxu1 %v2775_v55 }
 0x241   :  { %3216 = vmatprep.subr.mxu1 %v3498_v9  ;;  %3230 = vmatprep.mubr.msk.f32.mxu1 %vm3499_vm1, %v3498_v9 }
 0x242   :  { %3217 = vmatpush3.msra.mxu1 %v2774_v56  ;;  %3211 = vmatprep.mubr.msk.f32.mxu0 %vm3499_vm1, %v3498_v9 }
 0x243   :  { %3218 = vmatprep.subr.mxu1 %v3498_v9  ;;  %3233 = vmatprep.subr.mxu0 %v3498_v9 }
 0x244   :  { %3219 = vmatpush3.msra.mxu1 %v2773_v57 }
 0x245   :  { %3220 = vmatprep.subr.mxu1 %v3498_v9 }
 0x246   :  { %3221 = vmatpush3.msra.mxu1 %v2772_v58  ;;  %v2792_v58 = vld [vmem:[%s4448_s8 + $0x18] sm:$0xff] }
 0x247   :  { %3222 = vmatprep.subr.mxu1 %v3498_v9 }
 0x248   :  { %3223 = vmatpush3.msra.mxu1 %v2771_v59  ;;  %v2791_v59 = vld [vmem:[%s4448_s8 + $0x10] sm:$0xff] }
 0x249   :  { %3224 = vmatprep.subr.mxu1 %v3498_v9 }
 0x24a   :  { %3225 = vmatpush3.msra.mxu1 %v2770_v60 }
 0x24b   :  { %3226 = vmatprep.subr.mxu1 %v3498_v9 }
 0x24c   :  { %3227 = vmatpush3.msra.mxu1 %v2769_v61 }
 0x24d   :  { %3228 = vmatprep.subr.mxu1 %v3498_v9 }
 0x24e   :  { %3229 = vmatpush3.msra.mxu1 %v2768_v62 }
 0x24f   :  { %3231 = vmatmul.mubr.msk.f32.vlgmr.msra.gmra.mxu1 %vm52_vm0, %v3670_v32  ;;  %3252 = vmatprep.subr.mxu1 %v3498_v9 }
 0x250   :  { %3253 = vmatpush3.xpose.msk.msra.mxu1 %vm731_vm2, %v247_v33  ;;  %3254 = vmatprep.mubr.msk.f32.mxu1 %vm3499_vm1, %v3498_v9  ;;  %v2777_v33 = vld [vmem:[%s4445_s4 + $0x40] sm:$0xff] }
 0x251   :  { %3262 = vmatprep.subr.mxu1 %v3498_v9 }
 0x2ff   :  { %v804_v2 = vpop.f32.mrf.mxu0  ;;  %v880_v3 = vpop.f32.mrf.mxu1 }
 0x300   :  { %v881_v4 = vadd.f32 %v880_v3, %v804_v2  ;;  %v970_v2 = vld [vmem:[%s4448_s8] sm:$0xff]  ;;  %v2811_v3 = vld [vmem:[%s4445_s4 + $0xb8] sm:$0xff] }
 0x301   :  { %v3203_v5 = vpop.f32.mrf.mxu0  ;;  %v3208_v6 = vpop.f32.mrf.mxu1 }
 0x302   :  { %v884_v7 = vmul.f32 0.25, %v881_v4  ;;  %v2810_v4 = vld [vmem:[%s4445_s4 + $0xb0] sm:$0xff]  ;;  %v2809_v5 = vld [vmem:[%s4445_s4 + $0xa8] sm:$0xff]  ;;  %v2808_v6 = vld [vmem:[%s4445_s4 + $0xa0] sm:$0xff] }
 0x304   :  { %v885_v8 = vsel %vm82_vm3, %v884_v7, -1e+30  ;;  %v2807_v7 = vld [vmem:[%s4445_s4 + $0x98] sm:$0xff] }
 0x305   :  { %v886_v10 = vsel %vm731_vm2, %v885_v8, -inf }
 0x306   :  { %887 = vmax.xlane.f32.xlu1 %v886_v10  ;;  %v2805_v10 = vld [vmem:[%s4445_s4 + $0x88] sm:$0xff] }
 0x30f   :  { %v1047_v11 = vpop.f32.mrf.mxu1 }
 0x310   :  { %v1130_v37 = vmul.f32 %v1047_v11, %v3901_v22  ;;  %v1133_v38 = vmul.f32 %v1047_v11, %v3906_v23  ;;  %v2804_v11 = vld [vmem:[%s4445_s4 + $0x80] sm:$0xff] }
 0x311   :  { %v3232_v12 = vpop.f32.mrf.mxu1 }
 0x312   :  { %v2802_v12 = vld [vmem:[%s4444_s3 + $0xb8] sm:$0xff] }
 0x38f   :  { %v888_v13 = vpop.xlane.xlu1 %887 }
 0x390   :  { %v889_v14 = vsub.f32 %v885_v8, %v888_v13  ;;  %v2806_v8 = vld [vmem:[%s4445_s4 + $0x90] sm:$0xff] }
 0x392   :  { %v890_v15 = vmul.f32 1.442695, %v889_v14  ;;  %v2801_v14 = vld [vmem:[%s4444_s3 + $0xb0] sm:$0xff] }
 0x394   :  { %3478 = vpow2.f32 %v890_v15 }
 0x3a1   :  { %v3479_v16 = vpop.eup %3478 }
 0x3a2   :  { %v892_v17 = vsel %vm731_vm2, %v3479_v16, 0.0 }
 0x3a3   :  { %893 = vadd.xlane.f32.xlu1 %v892_v17 }
 0x42c   :  { %v894_v18 = vpop.xlane.xlu1 %893 }
 0x42d   :  { %3480 = vrcp.f32 %v894_v18  ;;  %v2799_v18 = vld [vmem:[%s4444_s3 + $0xa0] sm:$0xff] }
 0x43a   :  { %v3481_v20 = vpop.eup %3480 }
 0x43b   :  { %v896_v21 = vmul.f32 %v3481_v20, %v3479_v16  ;;  %v2800_v16 = vld [vmem:[%s4444_s3 + $0xa8] sm:$0xff] }
 0x43d   :  { %3212 = vmatmul.mubr.msk.f32.vlgmr.msra.gmra.mxu0 %vm731_vm2, %v896_v21  ;;  %v2798_v21 = vld [vmem:[%s4444_s3 + $0x98] sm:$0xff] }
 0x43e   :  { %3234 = vmatpush3.msra.mxu0 %v2784_v24  ;;  %3249 = vmatprep.mubr.msk.f32.mxu0 %vm3499_vm1, %v3498_v9  ;;  %v2797_v24 = vld [vmem:[%s4444_s3 + $0x90] sm:$0xff] }
 0x43f   :  { %3235 = vmatprep.subr.mxu0 %v3498_v9 }
 0x440   :  { %3236 = vmatpush3.msra.mxu0 %v2783_v25  ;;  %v2796_v25 = vld [vmem:[%s4444_s3 + $0x88] sm:$0xff] }
 0x441   :  { %3237 = vmatprep.subr.mxu0 %v3498_v9 }
 0x442   :  { %3238 = vmatpush3.msra.mxu0 %v2782_v26  ;;  %v2795_v26 = vld [vmem:[%s4444_s3 + $0x80] sm:$0xff] }
 0x443   :  { %3239 = vmatprep.subr.mxu0 %v3498_v9 }
 0x444   :  { %3240 = vmatpush3.msra.mxu0 %v2781_v27 }
 0x445   :  { %3241 = vmatprep.subr.mxu0 %v3498_v9 }
 0x446   :  { %3242 = vmatpush3.msra.mxu0 %v2780_v28 }
 0x447   :  { %3243 = vmatprep.subr.mxu0 %v3498_v9 }
 0x448   :  { %3244 = vmatpush3.msra.mxu0 %v2779_v29 }
 0x449   :  { %3245 = vmatprep.subr.mxu0 %v3498_v9 }
 0x44a   :  { %3246 = vmatpush3.msra.mxu0 %v2778_v30 }
 0x44b   :  { %3247 = vmatprep.subr.mxu0 %v3498_v9 }
 0x44c   :  { %3248 = vmatpush3.msra.mxu0 %v2777_v33 }
 0x44d   :  { %3250 = vmatmul.mubr.msk.f32.vlgmr.msra.gmra.mxu0 %vm52_vm0, %v3670_v32  ;;  %3257 = vmatprep.subr.mxu0 %v3498_v9 }
 0x44e   :  { %3258 = vmatpush3.xpose.msk.msra.mxu0 %vm731_vm2, %v3912_v31  ;;  %3259 = vmatprep.mubr.msk.f32.mxu0 %vm3499_vm1, %v3498_v9 }
 0x44f   :  { %3267 = vmatprep.subr.mxu0 %v3498_v9 }
 0x4fd   :  { %v966_v34 = vpop.f32.mrf.mxu0 }
 0x4ff   :  { %v3213_v35 = vpop.f32.mrf.mxu0 }
 0x50d   :  { %v1126_v36 = vpop.f32.mrf.mxu0 }
 0x50e   :  { %v1131_v39 = vmul.f32 %v1126_v36, %v3906_v23  ;;  %v1134_v40 = vmul.f32 %v1126_v36, %v3901_v22 }
 0x50f   :  { %v3251_v41 = vpop.f32.mrf.mxu0 }
 0x510   :  { %v1132_v44 = vsub.f32 %v1130_v37, %v1131_v39  ;;  %v1135_v46 = vadd.f32 %v1134_v40, %v1133_v38 }
 0x512   :  { %3255 = vmatmul.mubr.msk.f32.vlgmr.msra.gmra.mxu1 %vm731_vm2, %v1135_v46  ;;  %3260 = vmatmul.mubr.msk.f32.vlgmr.msra.gmra.mxu0 %vm731_vm2, %v1132_v44 }
 0x513   :  { %3263 = vmatpush3.msra.mxu1 %v3896_v19  ;;  %3264 = vmatprep.mubr.msk.f32.mxu1 %vm3499_vm1, %v3498_v9 }
 0x514   :  { %3274 = vmatprep.subr.mxu1 %v3498_v9  ;;  %3271 = vmatprep.mubr.msk.f32.mxu0 %vm3499_vm1, %v3498_v9 }
 0x515   :  { %3268 = vmatpush3.msra.mxu0 %v2792_v58 }
 0x516   :  { %3269 = vmatprep.subr.mxu0 %v3498_v9 }
 0x517   :  { %3270 = vmatpush3.msra.mxu0 %v2791_v59 }
 0x518   :  { %3281 = vmatprep.subr.mxu0 %v3498_v9 }
 0x5d2   :  { %v1205_v31 = vpop.f32.mrf.mxu1  ;;  %v1278_v47 = vpop.f32.mrf.mxu0 }
 0x5d3   :  { %v1279_v48 = vadd.f32 %v1278_v47, %v1205_v31 }
 0x5d4   :  { %v3256_v49 = vpop.f32.mrf.mxu1  ;;  %v3261_v50 = vpop.f32.mrf.mxu0 }
 0x5d5   :  { %v1282_v51 = vmul.f32 0.25, %v1279_v48 }
 0x5d7   :  { %v1283_v52 = vsel %vm82_vm3, %v1282_v51, -1e+30 }
 0x5d8   :  { %v1284_v19 = vsel %vm731_vm2, %v1283_v52, -inf }
 0x5d9   :  { %1285 = vmax.xlane.f32.xlu0 %v1284_v19 }
 0x662   :  { %v1286_v53 = vpop.xlane.xlu0 %1285 }
 0x663   :  { %v1287_v54 = vsub.f32 %v1283_v52, %v1286_v53 }
 0x665   :  { %v1288_v55 = vmul.f32 1.442695, %v1287_v54 }
 0x667   :  { %3482 = vpow2.f32 %v1288_v55  ;;  %v2819_v55 = vld [vmem:[%s4448_s8 + $0x28] sm:$0xff] }
 0x674   :  { %v3483_v56 = vpop.eup %3482 }
 0x675   :  { %v1290_v57 = vsel %vm731_vm2, %v3483_v56, 0.0 }
 0x676   :  { %1291 = vadd.xlane.f32.xlu1 %v1290_v57 }
 0x6ff   :  { %v1292_v60 = vpop.xlane.xlu1 %1291 }
 0x700   :  { %3484 = vrcp.f32 %v1292_v60  ;;  %v2828_v60 = vld [vmem:[%s4444_s3 + $0xf8] sm:$0xff] }
 0x70d   :  { %v3485_v61 = vpop.eup %3484 }
 0x70e   :  { %v1294_v62 = vmul.f32 %v3485_v61, %v3483_v56  ;;  %v2818_v56 = vld [vmem:[%s4448_s8 + $0x20] sm:$0xff]  ;;  %v2827_v61 = vld [vmem:[%s4444_s3 + $0xf0] sm:$0xff] }
 0x710   :  { %3265 = vmatmul.mubr.msk.f32.vlgmr.msra.gmra.mxu1 %vm731_vm2, %v1294_v62  ;;  %v2826_v62 = vld [vmem:[%s4444_s3 + $0xe8] sm:$0xff] }
 0x711   :  { %3275 = vmatpush3.msra.mxu1 %v971_v63  ;;  %3278 = vmatprep.mubr.msk.f32.mxu1 %vm3499_vm1, %v3498_v9  ;;  %v2825_v63 = vld [vmem:[%s4444_s3 + $0xe0] sm:$0xff] }
 0x712   :  { %3276 = vmatprep.subr.mxu1 %v3498_v9 }
 0x713   :  { %3277 = vmatpush3.msra.mxu1 %v970_v2  ;;  %v2824_v2 = vld [vmem:[%s4444_s3 + $0xd8] sm:$0xff] }
 0x714   :  { %3300 = vmatprep.subr.mxu1 %v3498_v9  ;;  %3279 = vmatmul.mubr.msk.f32.vlgmr.msra.gmra.mxu1 %vm1371_vm4, %v966_v34 }
 0x715   :  { %3301 = vmatpush3.msra.mxu1 %v2811_v3  ;;  %3316 = vmatprep.mubr.msk.f32.mxu1 %vm3499_vm1, %v3498_v9  ;;  %v2823_v3 = vld [vmem:[%s4444_s3 + $0xd0] sm:$0xff] }
 0x716   :  { %3302 = vmatprep.subr.mxu1 %v3498_v9 }
 0x717   :  { %3303 = vmatpush3.msra.mxu1 %v2810_v4  ;;  %v2822_v4 = vld [vmem:[%s4444_s3 + $0xc8] sm:$0xff] }
 0x718   :  { %3304 = vmatprep.subr.mxu1 %v3498_v9 }
 0x719   :  { %3305 = vmatpush3.msra.mxu1 %v2809_v5  ;;  %v2821_v5 = vld [vmem:[%s4444_s3 + $0xc0] sm:$0xff] }
 0x71a   :  { %3306 = vmatprep.subr.mxu1 %v3498_v9 }
 0x71b   :  { %3307 = vmatpush3.msra.mxu1 %v2808_v6  ;;  %v2837_v6 = vld [vmem:[%s4445_s4 + $0xf8] sm:$0xff] }
 0x71c   :  { %3308 = vmatprep.subr.mxu1 %v3498_v9 }
 0x71d   :  { %3309 = vmatpush3.msra.mxu1 %v2807_v7 }
 0x71e   :  { %3310 = vmatprep.subr.mxu1 %v3498_v9 }
 0x71f   :  { %3311 = vmatpush3.msra.mxu1 %v2806_v8  ;;  %v2836_v8 = vld [vmem:[%s4445_s4 + $0xf0] sm:$0xff] }
 0x720   :  { %3312 = vmatprep.subr.mxu1 %v3498_v9 }
 0x721   :  { %3313 = vmatpush3.msra.mxu1 %v2805_v10 }
 0x722   :  { %3314 = vmatprep.subr.mxu1 %v3498_v9 }
 0x723   :  { %3315 = vmatpush3.msra.mxu1 %v2804_v11  ;;  %v2834_v11 = vld [vmem:[%s4445_s4 + $0xe0] sm:$0xff] }
 0x724   :  { %3317 = vmatmul.mubr.msk.f32.vlgmr.msra.gmra.mxu1 %vm52_vm0, %v3670_v32  ;;  %3324 = vmatprep.subr.mxu1 %v3498_v9 }
 0x725   :  { %3325 = vmatpush3.xpose.msk.msra.mxu1 %vm731_vm2, %v3923_v42  ;;  %3326 = vmatprep.mubr.msk.f32.mxu1 %vm3499_vm1, %v3498_v9 }
 0x726   :  { %3334 = vmatprep.subr.mxu1 %v3498_v9 }
 0x7d0   :  { %v1364_v13 = vpop.f32.mrf.mxu1 }
 0x7d1   :  { %3272 = vmatmul.mubr.msk.f32.vlgmr.msra.gmra.mxu0 %vm1371_vm4, %v1364_v13  ;;  %v2832_v13 = vld [vmem:[%s4445_s4 + $0xd0] sm:$0xff] }
 0x7d2   :  { %3282 = vmatpush3.msra.mxu0 %v2802_v12  ;;  %v3266_v15 = vpop.f32.mrf.mxu1  ;;  %3297 = vmatprep.mubr.msk.f32.mxu0 %vm3499_vm1, %v3498_v9  ;;  %v2833_v12 = vld [vmem:[%s4445_s4 + $0xd8] sm:$0xff] }
 0x7d3   :  { %3283 = vmatprep.subr.mxu0 %v3498_v9  ;;  %v2830_v15 = vld [vmem:[%s4445_s4 + $0xc0] sm:$0xff] }
 0x7d4   :  { %3284 = vmatpush3.msra.mxu0 %v2801_v14  ;;  %v4123_v17 = vpop.f32.mrf.mxu1  ;;  %v2831_v14 = vld [vmem:[%s4445_s4 + $0xc8] sm:$0xff] }
 0x7d5   :  { %3285 = vmatprep.subr.mxu0 %v3498_v9 }
 0x7d6   :  { %3286 = vmatpush3.msra.mxu0 %v2800_v16  ;;  %v3280_v20 = vpop.f32.mrf.mxu1 }
 0x7d7   :  { %3287 = vmatprep.subr.mxu0 %v3498_v9 }
 0x7d8   :  { %3288 = vmatpush3.msra.mxu0 %v2799_v18 }
 0x7d9   :  { %3289 = vmatprep.subr.mxu0 %v3498_v9 }
 0x7da   :  { %3290 = vmatpush3.msra.mxu0 %v2798_v21 }
 0x7db   :  { %3291 = vmatprep.subr.mxu0 %v3498_v9 }
 0x7dc   :  { %3292 = vmatpush3.msra.mxu0 %v2797_v24 }
 0x7dd   :  { %3293 = vmatprep.subr.mxu0 %v3498_v9 }
 0x7de   :  { %3294 = vmatpush3.msra.mxu0 %v2796_v25 }
 0x7df   :  { %3295 = vmatprep.subr.mxu0 %v3498_v9 }
 0x7e0   :  { %3296 = vmatpush3.msra.mxu0 %v2795_v26 }
 0x7e1   :  { %3298 = vmatmul.mubr.msk.f32.vlgmr.msra.gmra.mxu0 %vm52_vm0, %v3670_v32  ;;  %3319 = vmatprep.subr.mxu0 %v3498_v9 }
 0x7e2   :  { %3320 = vmatpush3.xpose.msk.msra.mxu0 %vm731_vm2, %v3925_v43  ;;  %3321 = vmatprep.mubr.msk.f32.mxu0 %vm3499_vm1, %v3498_v9 }
 0x7e3   :  { %3329 = vmatprep.subr.mxu0 %v3498_v9 }
 0x7e4   :  { %v1672_v27 = vpop.f32.mrf.mxu1 }
 0x7e5   :  { %v1677_v34 = vmul.f32 %v1672_v27, %v3906_v23  ;;  %v1680_v35 = vmul.f32 %v1672_v27, %v3901_v22 }
 0x7e6   :  { %v3318_v28 = vpop.f32.mrf.mxu1 }
 0x891   :  { %v4154_v29 = vpop.f32.mrf.mxu0 }
 0x892   :  { %v1515_v20 = vadd.f32 %v4123_v17, %v4154_v29 }
 0x893   :  { %v3273_v30 = vpop.f32.mrf.mxu0 }
 0x8a1   :  { %v1593_v33 = vpop.f32.mrf.mxu0 }
 0x8a2   :  { %v1676_v36 = vmul.f32 %v1593_v33, %v3901_v22  ;;  %v1679_v37 = vmul.f32 %v1593_v33, %v3906_v23 }
 0x8a3   :  { %v3299_v38 = vpop.f32.mrf.mxu0 }
 0x8a4   :  { %v1678_v39 = vsub.f32 %v1676_v36, %v1677_v34  ;;  %v1681_v40 = vadd.f32 %v1680_v35, %v1679_v37 }
 0x8a6   :  { %3322 = vmatmul.mubr.msk.f32.vlgmr.msra.gmra.mxu0 %vm731_vm2, %v1681_v40  ;;  %3327 = vmatmul.mubr.msk.f32.vlgmr.msra.gmra.mxu1 %vm731_vm2, %v1678_v39 }
 0x8a7   :  { %3330 = vmatpush3.msra.mxu0 %v3927_v45  ;;  %3331 = vmatprep.mubr.msk.f32.mxu0 %vm3499_vm1, %v3498_v9 }
 0x8a8   :  { %3341 = vmatprep.subr.mxu0 %v3498_v9  ;;  %3338 = vmatprep.mubr.msk.f32.mxu1 %vm3499_vm1, %v3498_v9 }
 0x8a9   :  { %3335 = vmatpush3.msra.mxu1 %v2819_v55  ;;  %v2470_v55 = vld [vmem:[%s4449_s9] sm:$0xff] }
 0x8aa   :  { %3336 = vmatprep.subr.mxu1 %v3498_v9 }
 0x8ab   :  { %3337 = vmatpush3.msra.mxu1 %v2818_v56  ;;  %v2649_v56 = vld [vmem:[%s4450_s11 + $0x78] sm:$0xff] }
 0x8ac   :  { %3360 = vmatprep.subr.mxu1 %v3498_v9 }
 0x966   :  { %v1754_v41 = vpop.f32.mrf.mxu0  ;;  %v1830_v44 = vpop.f32.mrf.mxu1 }
 0x967   :  { %v1831_v46 = vadd.f32 %v1830_v44, %v1754_v41 }
 0x968   :  { %v3323_v31 = vpop.f32.mrf.mxu0  ;;  %v3328_v47 = vpop.f32.mrf.mxu1 }
 0x969   :  { %v1834_v48 = vmul.f32 0.25, %v1831_v46  ;;  %v2845_v31 = vld [vmem:[%s4448_s8 + $0x38] sm:$0xff] }
 0x96b   :  { %v1835_v49 = vsel %vm82_vm3, %v1834_v48, -1e+30 }
 0x96c   :  { %v1836_v50 = vsel %vm731_vm2, %v1835_v49, -inf }
 0x96d   :  { %1837 = vmax.xlane.f32.xlu0 %v1836_v50  ;;  %v2476_v50 = vld [vmem:[%s4449_s9 + $0x30] sm:$0xff] }
 0x9f6   :  { %v1838_v51 = vpop.xlane.xlu0 %1837 }
 0x9f7   :  { %v1839_v52 = vsub.f32 %v1835_v49, %v1838_v51  ;;  %v2477_v49 = vld [vmem:[%s4449_s9 + $0x38] sm:$0xff]  ;;  %v2475_v51 = vld [vmem:[%s4449_s9 + $0x28] sm:$0xff] }
 0x9f9   :  { %v1840_v19 = vmul.f32 1.442695, %v1839_v52  ;;  %v2474_v52 = vld [vmem:[%s4449_s9 + $0x20] sm:$0xff] }
 0x9fb   :  { %3486 = vpow2.f32 %v1840_v19  ;;  %v2473_v19 = vld [vmem:[%s4449_s9 + $0x18] sm:$0xff] }
 0xa08   :  { %v3487_v53 = vpop.eup %3486 }
 0xa09   :  { %v1842_v54 = vsel %vm731_vm2, %v3487_v53, 0.0 }
 0xa0a   :  { %1843 = vadd.xlane.f32.xlu1 %v1842_v54  ;;  %v2471_v54 = vld [vmem:[%s4449_s9 + $0x8] sm:$0xff] }
 0xa93   :  { %v1844_v57 = vpop.xlane.xlu1 %1843 }
 0xa94   :  { %3488 = vrcp.f32 %v1844_v57  ;;  %v2648_v57 = vld [vmem:[%s4450_s11 + $0x70] sm:$0xff] }
 0xaa1   :  { %v3489_v58 = vpop.eup %3488 }
 0xaa2   :  { %v1846_v59 = vmul.f32 %v3489_v58, %v3487_v53  ;;  %v2472_v53 = vld [vmem:[%s4449_s9 + $0x10] sm:$0xff]  ;;  %v2647_v58 = vld [vmem:[%s4450_s11 + $0x68] sm:$0xff] }
 0xaa4   :  { %3332 = vmatmul.mubr.msk.f32.vlgmr.msra.gmra.mxu0 %vm731_vm2, %v1846_v59  ;;  %v2646_v59 = vld [vmem:[%s4450_s11 + $0x60] sm:$0xff] }
 0xaa5   :  { %3342 = vmatpush3.msra.mxu0 %v2828_v60  ;;  %3357 = vmatprep.mubr.msk.f32.mxu0 %vm3499_vm1, %v3498_v9  ;;  %v2645_v60 = vld [vmem:[%s4450_s11 + $0x58] sm:$0xff] }
 0xaa6   :  { %3343 = vmatprep.subr.mxu0 %v3498_v9 }
 0xaa7   :  { %3344 = vmatpush3.msra.mxu0 %v2827_v61  ;;  %v2644_v61 = vld [vmem:[%s4450_s11 + $0x50] sm:$0xff] }
 0xaa8   :  { %3345 = vmatprep.subr.mxu0 %v3498_v9 }
 0xaa9   :  { %3346 = vmatpush3.msra.mxu0 %v2826_v62  ;;  %v2643_v62 = vld [vmem:[%s4450_s11 + $0x48] sm:$0xff] }
 0xaaa   :  { %3347 = vmatprep.subr.mxu0 %v3498_v9 }
 0xaab   :  { %3348 = vmatpush3.msra.mxu0 %v2825_v63  ;;  %v2555_v63 = vld [vmem:[%s4451_s10 + $0x38] sm:$0xff] }
 0xaac   :  { %3349 = vmatprep.subr.mxu0 %v3498_v9 }
 0xaad   :  { %3350 = vmatpush3.msra.mxu0 %v2824_v2 }
 0xaae   :  { %3351 = vmatprep.subr.mxu0 %v3498_v9 }
 0xaaf   :  { %3352 = vmatpush3.msra.mxu0 %v2823_v3  ;;  %v2554_v3 = vld [vmem:[%s4451_s10 + $0x30] sm:$0xff] }
 0xab0   :  { %3353 = vmatprep.subr.mxu0 %v3498_v9 }
 0xab1   :  { %3354 = vmatpush3.msra.mxu0 %v2822_v4 }
 0xab2   :  { %3355 = vmatprep.subr.mxu0 %v3498_v9 }
 0xab3   :  { %3356 = vmatpush3.msra.mxu0 %v2821_v5  ;;  %v2553_v5 = vld [vmem:[%s4451_s10 + $0x28] sm:$0xff] }
 0xab4   :  { %3358 = vmatmul.mubr.msk.f32.vlgmr.msra.gmra.mxu0 %vm52_vm0, %v3670_v32  ;;  %3379 = vmatprep.subr.mxu0 %v3498_v9 }
 0xab5   :  { %3380 = vmatpush3.xpose.msk.msra.mxu0 %vm731_vm2, %v3925_v43  ;;  %3381 = vmatprep.mubr.msk.f32.mxu0 %vm3499_vm1, %v3498_v9  ;;  %v2835_v43 = vld [vmem:[%s4445_s4 + $0xe8] sm:$0xff] }
 0xab6   :  { %3389 = vmatprep.subr.mxu0 %v3498_v9 }
 0xb64   :  { %v1916_v7 = vpop.f32.mrf.mxu0 }
 0xb65   :  { %3339 = vmatmul.mubr.msk.f32.vlgmr.msra.gmra.mxu1 %vm1371_vm4, %v1916_v7  ;;  %v2551_v7 = vld [vmem:[%s4451_s10 + $0x18] sm:$0xff] }
 0xb66   :  { %3361 = vmatpush3.msra.mxu1 %v2837_v6  ;;  %v3333_v10 = vpop.f32.mrf.mxu0  ;;  %3376 = vmatprep.mubr.msk.f32.mxu1 %vm3499_vm1, %v3498_v9  ;;  %v2552_v6 = vld [vmem:[%s4451_s10 + $0x20] sm:$0xff] }
 0xb67   :  { %3362 = vmatprep.subr.mxu1 %v3498_v9  ;;  %v2549_v10 = vld [vmem:[%s4451_s10 + $0x8] sm:$0xff] }
 0xb68   :  { %3363 = vmatpush3.msra.mxu1 %v2836_v8  ;;  %v2550_v8 = vld [vmem:[%s4451_s10 + $0x10] sm:$0xff] }
 0xb69   :  { %3364 = vmatprep.subr.mxu1 %v3498_v9 }
 0xb6a   :  { %3365 = vmatpush3.msra.mxu1 %v2835_v43  ;;  %v2548_v43 = vld [vmem:[%s4451_s10] sm:$0xff] }
 0xb6b   :  { %3366 = vmatprep.subr.mxu1 %v3498_v9 }
 0xb6c   :  { %3367 = vmatpush3.msra.mxu1 %v2834_v11 }
 0xb6d   :  { %3368 = vmatprep.subr.mxu1 %v3498_v9 }
 0xb6e   :  { %3369 = vmatpush3.msra.mxu1 %v2833_v12 }
 0xb6f   :  { %3370 = vmatprep.subr.mxu1 %v3498_v9 }
 0xb70   :  { %3371 = vmatpush3.msra.mxu1 %v2832_v13  ;;  %v2642_v13 = vld [vmem:[%s4450_s11 + $0x40] sm:$0xff] }
 0xb71   :  { %3372 = vmatprep.subr.mxu1 %v3498_v9 }
 0xb72   :  { %3373 = vmatpush3.msra.mxu1 %v2831_v14  ;;  %v2641_v14 = vld [vmem:[%s4450_s11 + $0x38] sm:$0xff] }
 0xb73   :  { %3374 = vmatprep.subr.mxu1 %v3498_v9 }
 0xb74   :  { %v2072_v16 = vpop.f32.mrf.mxu0  ;;  %3375 = vmatpush3.msra.mxu1 %v2830_v15  ;;  %v2640_v15 = vld [vmem:[%s4450_s11 + $0x30] sm:$0xff] }
 0xb75   :  { %3377 = vmatmul.mubr.msk.f32.vlgmr.msra.gmra.mxu1 %vm52_vm0, %v3670_v32  ;;  %3384 = vmatprep.subr.mxu1 %v3498_v9  ;;  %v2155_v27 = vmul.f32 %v2072_v16, %v3901_v22  ;;  %v2158_v28 = vmul.f32 %v2072_v16, %v3906_v23  ;;  %v2638_v16 = vld [vmem:[%s4450_s11 + $0x20] sm:$0xff] }
 0xb76   :  { %v3359_v18 = vpop.f32.mrf.mxu0  ;;  %3385 = vmatpush3.xpose.msk.msra.mxu1 %vm731_vm2, %v3923_v42  ;;  %3386 = vmatprep.mubr.msk.f32.mxu1 %vm3499_vm1, %v3498_v9 }
 0xb77   :  { %3394 = vmatprep.subr.mxu1 %v3498_v9  ;;  %v2637_v18 = vld [vmem:[%s4450_s11 + $0x18] sm:$0xff] }
 0xc25   :  { %v1992_v21 = vpop.f32.mrf.mxu1 }
 0xc26   :  { %v4267_v24 = vadd.f32 %v1992_v21, %v1515_v20  ;;  %v2636_v20 = vld [vmem:[%s4450_s11 + $0x10] sm:$0xff]  ;;  %v2635_v21 = vld [vmem:[%s4450_s11 + $0x8] sm:$0xff] }
 0xc27   :  { %v3340_v25 = vpop.f32.mrf.mxu1 }
 0xc28   :  { %v2634_v25 = vld [vmem:[%s4450_s11] sm:$0xff] }
 0xc35   :  { %v2151_v26 = vpop.f32.mrf.mxu1 }
 0xc36   :  { %v2156_v30 = vmul.f32 %v2151_v26, %v3906_v23  ;;  %v2159_v42 = vmul.f32 %v2151_v26, %v3901_v22 }
 0xc37   :  { %v3378_v33 = vpop.f32.mrf.mxu1 }
 0xc38   :  { %v2157_v34 = vsub.f32 %v2155_v27, %v2156_v30  ;;  %v2160_v35 = vadd.f32 %v2159_v42, %v2158_v28 }
 0xc3a   :  { %3382 = vmatmul.mubr.msk.f32.vlgmr.msra.gmra.mxu0 %vm731_vm2, %v2160_v35  ;;  %3387 = vmatmul.mubr.msk.f32.vlgmr.msra.gmra.mxu1 %vm731_vm2, %v2157_v34 }
 0xc3b   :  { %3390 = vmatpush3.msra.mxu0 %v3927_v45  ;;  %3391 = vmatprep.mubr.msk.f32.mxu0 %vm3499_vm1, %v3498_v9 }
 0xc3c   :  { %3401 = vmatprep.subr.mxu0 %v3498_v9  ;;  %3398 = vmatprep.mubr.msk.f32.mxu1 %vm3499_vm1, %v3498_v9 }
 0xc3d   :  { %3395 = vmatpush3.msra.mxu1 %v2845_v31 }
 0xc3e   :  { %3396 = vmatprep.subr.mxu1 %v3498_v9 }
 0xc3f   :  { %3397 = vmatpush3.msra.mxu1 %v2844_v0 }
 0xc40   :  { %3420 = vmatprep.subr.mxu1 %v3498_v9 }
 0xcfa   :  { %v2230_v23 = vpop.f32.mrf.mxu0  ;;  %v2303_v17 = vpop.f32.mrf.mxu1 }
 0xcfb   :  { %v2304_v22 = vadd.f32 %v2303_v17, %v2230_v23 }
 0xcfc   :  { %v3383_v29 = vpop.f32.mrf.mxu0  ;;  %v3388_v36 = vpop.f32.mrf.mxu1 }
 0xcfd   :  { %v2307_v37 = vmul.f32 0.25, %v2304_v22 }
 0xcff   :  { %v2308_v38 = vsel %vm82_vm3, %v2307_v37, -1e+30 }
 0xd00   :  { %v2309_v45 = vsel %vm731_vm2, %v2308_v38, -inf }
 0xd01   :  { %2310 = vmax.xlane.f32.xlu0 %v2309_v45 }
 0xd8a   :  { %v2311_v39 = vpop.xlane.xlu0 %2310 }
 0xd8b   :  { %v2312_v40 = vsub.f32 %v2308_v38, %v2311_v39 }
 0xd8d   :  { %v2313_v41 = vmul.f32 1.442695, %v2312_v40 }
 0xd8f   :  { %3490 = vpow2.f32 %v2313_v41 }
 0xd9c   :  { %v3491_v44 = vpop.eup %3490 }
 0xd9d   :  { %v2315_v46 = vsel %vm731_vm2, %v3491_v44, 0.0 }
 0xd9e   :  { %2316 = vadd.xlane.f32.xlu1 %v2315_v46 }
 0xe27   :  { %v2317_v1 = vpop.xlane.xlu1 %2316 }
 0xe28   :  { %3492 = vrcp.f32 %v2317_v1 }
 0xe35   :  { %v3493_v47 = vpop.eup %3492 }
 0xe36   :  { %v2319_v48 = vmul.f32 %v3493_v47, %v3491_v44 }
 0xe38   :  { %3392 = vmatmul.mubr.msk.f32.vlgmr.msra.gmra.mxu0 %vm731_vm2, %v2319_v48 }
 0xe39   :  { %3402 = vmatpush3.msra.mxu0 %v2477_v49  ;;  %3417 = vmatprep.mubr.msk.f32.mxu0 %vm3499_vm1, %v3498_v9 }
 0xe3a   :  { %3403 = vmatprep.subr.mxu0 %v3498_v9 }
 0xe3b   :  { %3404 = vmatpush3.msra.mxu0 %v2476_v50 }
 0xe3c   :  { %3405 = vmatprep.subr.mxu0 %v3498_v9 }
 0xe3d   :  { %3406 = vmatpush3.msra.mxu0 %v2475_v51 }
 0xe3e   :  { %3407 = vmatprep.subr.mxu0 %v3498_v9 }
 0xe3f   :  { %3408 = vmatpush3.msra.mxu0 %v2474_v52 }
 0xe40   :  { %3409 = vmatprep.subr.mxu0 %v3498_v9 }
 0xe41   :  { %3410 = vmatpush3.msra.mxu0 %v2473_v19 }
 0xe42   :  { %3411 = vmatprep.subr.mxu0 %v3498_v9 }
 0xe43   :  { %3412 = vmatpush3.msra.mxu0 %v2472_v53 }
 0xe44   :  { %3413 = vmatprep.subr.mxu0 %v3498_v9 }
 0xe45   :  { %3414 = vmatpush3.msra.mxu0 %v2471_v54 }
 0xe46   :  { %3415 = vmatprep.subr.mxu0 %v3498_v9 }
 0xe47   :  { %3416 = vmatpush3.msra.mxu0 %v2470_v55 }
 0xe48   :  { %3418 = vmatmul.mubr.msk.f32.vlgmr.msra.gmra.mxu0 %vm52_vm0, %v3670_v32  ;;  %3439 = vmatprep.subr.mxu0 %v3498_v9 }
 0xe49   :  { %3471 = vmatprep.mubr.msk.f32.mxu0 %vm3499_vm1, %v3498_v9  ;;  %3440 = vmatpush3.msra.mxu0 %v2649_v56 }
 0xe4a   :  { %3441 = vmatprep.subr.mxu0 %v3498_v9 }
 0xe4b   :  { %3442 = vmatpush3.msra.mxu0 %v2648_v57 }
 0xe4c   :  { %3443 = vmatprep.subr.mxu0 %v3498_v9 }
 0xe4d   :  { %3444 = vmatpush3.msra.mxu0 %v2647_v58 }
 0xe4e   :  { %3445 = vmatprep.subr.mxu0 %v3498_v9 }
 0xe4f   :  { %3446 = vmatpush3.msra.mxu0 %v2646_v59 }
 0xe50   :  { %3447 = vmatprep.subr.mxu0 %v3498_v9 }
 0xe51   :  { %3448 = vmatpush3.msra.mxu0 %v2645_v60 }
 0xe52   :  { %3449 = vmatprep.subr.mxu0 %v3498_v9 }
 0xe53   :  { %3450 = vmatpush3.msra.mxu0 %v2644_v61 }
 0xe54   :  { %3451 = vmatprep.subr.mxu0 %v3498_v9 }
 0xe55   :  { %3452 = vmatpush3.msra.mxu0 %v2643_v62 }
 0xe56   :  { %3453 = vmatprep.subr.mxu0 %v3498_v9 }
 0xe57   :  { %3454 = vmatpush3.msra.mxu0 %v2642_v13 }
 0xe58   :  { %3455 = vmatprep.subr.mxu0 %v3498_v9 }
 0xe59   :  { %3456 = vmatpush3.msra.mxu0 %v2641_v14 }
 0xe5a   :  { %3457 = vmatprep.subr.mxu0 %v3498_v9 }
 0xe5b   :  { %3458 = vmatpush3.msra.mxu0 %v2640_v15 }
 0xe5c   :  { %3459 = vmatprep.subr.mxu0 %v3498_v9 }
 0xef8   :  { %v2389_v2 = vpop.f32.mrf.mxu0 }
 0xef9   :  { %3399 = vmatmul.mubr.msk.f32.vlgmr.msra.gmra.mxu1 %vm1371_vm4, %v2389_v2 }
 0xefa   :  { %3421 = vmatpush3.msra.mxu1 %v2555_v63  ;;  %v3393_v4 = vpop.f32.mrf.mxu0  ;;  %3436 = vmatprep.mubr.msk.f32.mxu1 %vm3499_vm1, %v3498_v9 }
 0xefb   :  { %3422 = vmatprep.subr.mxu1 %v3498_v9 }
 0xefc   :  { %3423 = vmatpush3.msra.mxu1 %v2554_v3 }
 0xefd   :  { %3424 = vmatprep.subr.mxu1 %v3498_v9 }
 0xefe   :  { %3425 = vmatpush3.msra.mxu1 %v2553_v5 }
 0xeff   :  { %3426 = vmatprep.subr.mxu1 %v3498_v9 }
 0xf00   :  { %3427 = vmatpush3.msra.mxu1 %v2552_v6 }
 0xf01   :  { %3428 = vmatprep.subr.mxu1 %v3498_v9 }
 0xf02   :  { %3429 = vmatpush3.msra.mxu1 %v2551_v7 }
 0xf03   :  { %3430 = vmatprep.subr.mxu1 %v3498_v9 }
 0xf04   :  { %3431 = vmatpush3.msra.mxu1 %v2550_v8 }
 0xf05   :  { %3432 = vmatprep.subr.mxu1 %v3498_v9 }
 0xf06   :  { %3433 = vmatpush3.msra.mxu1 %v2549_v10 }
 0xf07   :  { %3434 = vmatprep.subr.mxu1 %v3498_v9 }
 0xf08   :  { %v2544_v11 = vpop.f32.mrf.mxu0  ;;  %3435 = vmatpush3.msra.mxu1 %v2548_v43 }
 0xf09   :  { %3437 = vmatmul.mubr.msk.f32.vlgmr.msra.gmra.mxu1 %vm52_vm0, %v3670_v32  ;;  %v2639_v32 = vld [vmem:[%s4450_s11 + $0x28] sm:$0xff]  ;;  %v2849_v26 = vmul.f32 -1.442695, %v2544_v11 }
 0xf0a   :  { %v3419_v12 = vpop.f32.mrf.mxu0  ;;  %3460 = vmatpush3.msra.mxu0 %v2639_v32 }
 0xf0b   :  { %3461 = vmatprep.subr.mxu0 %v3498_v9  ;;  %3494 = vpow2.f32 %v2849_v26 }
 0xf0c   :  { %3462 = vmatpush3.msra.mxu0 %v2638_v16 }
 0xf0d   :  { %3463 = vmatprep.subr.mxu0 %v3498_v9 }
 0xf0e   :  { %3464 = vmatpush3.msra.mxu0 %v2637_v18 }
 0xf0f   :  { %3465 = vmatprep.subr.mxu0 %v3498_v9 }
 0xf10   :  { %3466 = vmatpush3.msra.mxu0 %v2636_v20 }
 0xf11   :  { %3467 = vmatprep.subr.mxu0 %v3498_v9 }
 0xf12   :  { %3468 = vmatpush3.msra.mxu0 %v2635_v21 }
 0xf13   :  { %3469 = vmatprep.subr.mxu0 %v3498_v9 }
 0xf14   :  { %3470 = vmatpush3.msra.mxu0 %v2634_v25 }
 0xf18   :  { %v3495_v27 = vpop.eup %3494 }
 0xf19   :  { %v2629_v28 = vadd.f32 1.0, %v3495_v27 }
 0xf1b   :  { %3496 = vrcp.f32 %v2629_v28 }
 0xf28   :  { %v3497_v34 = vpop.eup %3496 }
 0xf29   :  { %v2632_v35 = vmul.f32 %v3497_v34, %v2544_v11 }
 0xfb9   :  { %v2465_v30 = vpop.f32.mrf.mxu1 }
 0xfba   :  { %v2469_v42 = vadd.f32 %v2465_v30, %v4267_v24 }
 0xfbb   :  { %v3400_v33 = vpop.f32.mrf.mxu1 }
 0xfc9   :  { %v2622_v23 = vpop.f32.mrf.mxu1 }
 0xfca   :  { %v2633_v17 = vmul.f32 %v2632_v35, %v2622_v23 }
 0xfcb   :  { %v3438_v22 = vpop.f32.mrf.mxu1 }
 0xfcc   :  { %3472 = vmatmul.mubr.f32.vlgmr.msra.gmra.mxu0 %v2633_v17 }
0x108c   :  { %v2716_v9 = vpop.f32.mrf.mxu0 }
0x108d   :  { %v2720_v29 = vadd.f32 %v2716_v9, %v2469_v42 }
0x108e   :  { %v3473_v36 = vpop.f32.mrf.mxu0 }
0x108f   :  { %2721 = vst.msk [vmem:[%s4452_s14] sm:$0xff] %vm52_vm0, %v2720_v29 }

// kernel: flash_cohere_forward.3
= control target key start
LH: loop header
LB: loop body
LE: loop exit
PB: predicated region body
PF: predicated region fallthrough
CT: control target
= control target key end

     0   :  { %vm50_vm0 = vcmask 523264   ;;  %v3496_v7 = vmov 0.0   ;;  %vm3497_vm1 = vmmov 0   ;;  %vm729_vm2 = vcmask 64512   ;;  %s4432_s0 = inlined_call_operand.vmem [shape: f32[8,64], index: 0, kind: input, shape index: {}, may-alias: {0,1}]   ;;  %s4433_s15 = inlined_call_operand.vmem [shape: f32[8,64], index: 15, kind: output, shape index: {1}]   ;;  %s4434_s1 = inlined_call_operand.vmem [shape: f32[8,64], index: 1, kind: input, shape index: {}, may-alias: {0,1}]   ;;  %s4435_s5 = inlined_call_operand.vmem [shape: f32[2,64,8], index: 5, kind: input, shape index: {}]   ;;  %s4436_s7 = inlined_call_operand.vmem [shape: f32[2,64,16], index: 7, kind: input, shape index: {}]   ;;  %s4437_s2 = inlined_call_operand.vmem [shape: f32[1,64], index: 2, kind: input, shape index: {}]   ;;  %s4438_s6 = inlined_call_operand.vmem [shape: f32[2,64,8], index: 6, kind: input, shape index: {}]   ;;  %s4439_s3 = inlined_call_operand.vmem [shape: f32[4,64,8], index: 3, kind: input, shape index: {}]   ;;  %s4440_s4 = inlined_call_operand.vmem [shape: f32[4,64,8], index: 4, kind: input, shape index: {}]   ;;  %s4441_s12 = inlined_call_operand.vmem [shape: f32[8,8], index: 12, kind: input, shape index: {}]   ;;  %s4442_s13 = inlined_call_operand.vmem [shape: f32[8,8], index: 13, kind: input, shape index: {}]   ;;  %s4443_s8 = inlined_call_operand.vmem [shape: f32[4,16,64], index: 8, kind: input, shape index: {}]   ;;  %s4444_s9 = inlined_call_operand.vmem [shape: f32[64,128], index: 9, kind: input, shape index: {}]   ;;  %s4445_s11 = inlined_call_operand.vmem [shape: f32[128,64], index: 11, kind: input, shape index: {}]   ;;  %s4446_s10 = inlined_call_operand.vmem [shape: f32[64,128], index: 10, kind: input, shape index: {}]   ;;  %s4447_s14 = inlined_call_operand.vmem [shape: f32[8,64], index: 14, kind: output, shape index: {0}]  }
   0x1   :  { %v49_v0 = vld [vmem:[%s4432_s0] sm:$0xff]  ;;  %3045 = vmatprep.subr.mxu1 %v3496_v7  ;;  %3083 = vmatprep.subr.mxu0 %v3496_v7  ;;  %v88_v8 = vld [vmem:[%s4435_s5 + $0x38] sm:$0xff]  ;;  %v87_v10 = vld [vmem:[%s4435_s5 + $0x30] sm:$0xff]  ;;  %vm1369_vm4 = vcmask 130048  }
   0x2   :  { %v53_v1 = vsel %vm50_vm0, %v49_v0, 0.0  ;;  %51 = vst.msk [vmem:[%s4433_s15] sm:$0xff] %vm50_vm0, %v49_v0  ;;  %v253_v9 = vld [vmem:[%s4436_s7 + $0x38] sm:$0xff]  ;;  %3046 = vmatpush3.msra.mxu1 %v88_v8  ;;  %v252_v11 = vld [vmem:[%s4436_s7 + $0x30] sm:$0xff]  ;;  %v86_v12 = vld [vmem:[%s4435_s5 + $0x28] sm:$0xff]  ;;  %3061 = vmatprep.mubr.msk.f32.mxu1 %vm3497_vm1, %v3496_v7 }
   0x3   :  { %54 = vadd.xlane.f32.xlu0 %v53_v1  ;;  %3084 = vmatpush3.msra.mxu0 %v253_v9  ;;  %v251_v13 = vld [vmem:[%s4436_s7 + $0x28] sm:$0xff]  ;;  %v85_v14 = vld [vmem:[%s4435_s5 + $0x20] sm:$0xff]  ;;  %v84_v16 = vld [vmem:[%s4435_s5 + $0x18] sm:$0xff] }
   0x4   :  { %3047 = vmatprep.subr.mxu1 %v3496_v7  ;;  %3085 = vmatprep.subr.mxu0 %v3496_v7  ;;  %v250_v15 = vld [vmem:[%s4436_s7 + $0x20] sm:$0xff]  ;;  %v249_v17 = vld [vmem:[%s4436_s7 + $0x18] sm:$0xff]  ;;  %v83_v18 = vld [vmem:[%s4435_s5 + $0x10] sm:$0xff] }
   0x5   :  { %3048 = vmatpush3.msra.mxu1 %v87_v10  ;;  %3086 = vmatpush3.msra.mxu0 %v252_v11  ;;  %v248_v19 = vld [vmem:[%s4436_s7 + $0x10] sm:$0xff]  ;;  %v82_v20 = vld [vmem:[%s4435_s5 + $0x8] sm:$0xff]  ;;  %v81_v22 = vld [vmem:[%s4435_s5] sm:$0xff] }
   0x6   :  { %3049 = vmatprep.subr.mxu1 %v3496_v7  ;;  %3087 = vmatprep.subr.mxu0 %v3496_v7  ;;  %v247_v21 = vld [vmem:[%s4436_s7 + $0x8] sm:$0xff]  ;;  %v246_v23 = vld [vmem:[%s4436_s7] sm:$0xff]  ;;  %v169_v31 = vld [vmem:[%s4438_s6 + $0x38] sm:$0xff] }
   0x7   :  { %3050 = vmatpush3.msra.mxu1 %v86_v12  ;;  %3088 = vmatpush3.msra.mxu0 %v251_v13  ;;  %v2728_v28 = vld [vmem:[%s4437_s2] ss:$0 sm:$0xff]  ;;  %v2748_v32 = vld [vmem:[%s4438_s6 + $0x78] sm:$0xff]  ;;  %v168_v33 = vld [vmem:[%s4438_s6 + $0x30] sm:$0xff] }
   0x8   :  { %3051 = vmatprep.subr.mxu1 %v3496_v7  ;;  %3089 = vmatprep.subr.mxu0 %v3496_v7  ;;  %v2747_v34 = vld [vmem:[%s4438_s6 + $0x70] sm:$0xff]  ;;  %v167_v35 = vld [vmem:[%s4438_s6 + $0x28] sm:$0xff]  ;;  %v166_v37 = vld [vmem:[%s4438_s6 + $0x20] sm:$0xff] }
   0x9   :  { %3052 = vmatpush3.msra.mxu1 %v85_v14  ;;  %3090 = vmatpush3.msra.mxu0 %v250_v15  ;;  %v2746_v36 = vld [vmem:[%s4438_s6 + $0x68] sm:$0xff]  ;;  %v2745_v38 = vld [vmem:[%s4438_s6 + $0x60] sm:$0xff]  ;;  %v165_v39 = vld [vmem:[%s4438_s6 + $0x18] sm:$0xff] }
   0xa   :  { %3053 = vmatprep.subr.mxu1 %v3496_v7  ;;  %3091 = vmatprep.subr.mxu0 %v3496_v7  ;;  %v2744_v40 = vld [vmem:[%s4438_s6 + $0x58] sm:$0xff]  ;;  %v164_v41 = vld [vmem:[%s4438_s6 + $0x10] sm:$0xff]  ;;  %v163_v43 = vld [vmem:[%s4438_s6 + $0x8] sm:$0xff] }
   0xb   :  { %3054 = vmatpush3.msra.mxu1 %v84_v16  ;;  %3092 = vmatpush3.msra.mxu0 %v249_v17  ;;  %v2743_v42 = vld [vmem:[%s4438_s6 + $0x50] sm:$0xff]  ;;  %v2742_v44 = vld [vmem:[%s4438_s6 + $0x48] sm:$0xff]  ;;  %v162_v45 = vld [vmem:[%s4438_s6] sm:$0xff] }
   0xc   :  { %3055 = vmatprep.subr.mxu1 %v3496_v7  ;;  %3093 = vmatprep.subr.mxu0 %v3496_v7  ;;  %v2741_v46 = vld [vmem:[%s4438_s6 + $0x40] sm:$0xff]  ;;  %v2739_v47 = vld [vmem:[%s4435_s5 + $0x78] sm:$0xff]  ;;  %v2738_v49 = vld [vmem:[%s4435_s5 + $0x70] sm:$0xff] }
   0xd   :  { %3056 = vmatpush3.msra.mxu1 %v83_v18  ;;  %3094 = vmatpush3.msra.mxu0 %v248_v19  ;;  %v574_v48 = vld [vmem:[%s4439_s3 + $0x38] sm:$0xff]  ;;  %v573_v50 = vld [vmem:[%s4439_s3 + $0x30] sm:$0xff]  ;;  %v2737_v51 = vld [vmem:[%s4435_s5 + $0x68] sm:$0xff] }
   0xe   :  { %3057 = vmatprep.subr.mxu1 %v3496_v7  ;;  %3095 = vmatprep.subr.mxu0 %v3496_v7  ;;  %v572_v52 = vld [vmem:[%s4439_s3 + $0x28] sm:$0xff]  ;;  %v2736_v53 = vld [vmem:[%s4435_s5 + $0x60] sm:$0xff]  ;;  %v2735_v55 = vld [vmem:[%s4435_s5 + $0x58] sm:$0xff] }
   0xf   :  { %3058 = vmatpush3.msra.mxu1 %v82_v20  ;;  %3096 = vmatpush3.msra.mxu0 %v247_v21  ;;  %v571_v54 = vld [vmem:[%s4439_s3 + $0x20] sm:$0xff]  ;;  %v570_v56 = vld [vmem:[%s4439_s3 + $0x18] sm:$0xff]  ;;  %v2734_v57 = vld [vmem:[%s4435_s5 + $0x50] sm:$0xff] }
  0x10   :  { %3059 = vmatprep.subr.mxu1 %v3496_v7  ;;  %3097 = vmatprep.subr.mxu0 %v3496_v7  ;;  %v569_v58 = vld [vmem:[%s4439_s3 + $0x10] sm:$0xff]  ;;  %v2733_v59 = vld [vmem:[%s4435_s5 + $0x48] sm:$0xff]  ;;  %v2732_v61 = vld [vmem:[%s4435_s5 + $0x40] sm:$0xff] }
  0x11   :  { %3060 = vmatpush3.msra.mxu1 %v81_v22  ;;  %3098 = vmatpush3.msra.mxu0 %v246_v23  ;;  %v568_v60 = vld [vmem:[%s4439_s3 + $0x8] sm:$0xff]  ;;  %v567_v62 = vld [vmem:[%s4439_s3] sm:$0xff]  ;;  %v2757_v63 = vld [vmem:[%s4436_s7 + $0x78] sm:$0xff] }
  0x12   :  { %3064 = vmatprep.subr.mxu1 %v3496_v7  ;;  %3099 = vmatprep.mubr.msk.f32.mxu0 %vm3497_vm1, %v3496_v7  ;;  %v2755_v1 = vld [vmem:[%s4436_s7 + $0x68] sm:$0xff]  ;;  %v652_v8 = vld [vmem:[%s4440_s4 + $0x38] sm:$0xff]  ;;  %v651_v9 = vld [vmem:[%s4440_s4 + $0x30] sm:$0xff] }
  0x13   :  { %3121 = vmatprep.subr.mxu0 %v3496_v7  ;;  %v650_v10 = vld [vmem:[%s4440_s4 + $0x28] sm:$0xff]  ;;  %v649_v11 = vld [vmem:[%s4440_s4 + $0x20] sm:$0xff]  ;;  %v648_v12 = vld [vmem:[%s4440_s4 + $0x18] sm:$0xff] }
  0x14   :  { %v647_v13 = vld [vmem:[%s4440_s4 + $0x10] sm:$0xff]  ;;  %v646_v14 = vld [vmem:[%s4440_s4 + $0x8] sm:$0xff]  ;;  %v645_v15 = vld [vmem:[%s4440_s4] sm:$0xff] }
  0x15   :  { %v3896_v20 = vld [vmem:[%s4441_s12] sm:$0xff] }
  0x16   :  { %v3901_v21 = vld [vmem:[%s4442_s13] sm:$0xff] }
  0x8c   :  { %v55_v2 = vpop.xlane.xlu0 %54 }
  0x8d   :  { %v57_v3 = vmul.f32 0.015625, %v55_v2  ;;  %v2754_v2 = vld [vmem:[%s4436_s7 + $0x60] sm:$0xff] }
  0x8f   :  { %v3586_v4 = vsub.f32 %v49_v0, %v57_v3  ;;  %v2756_v0 = vld [vmem:[%s4436_s7 + $0x70] sm:$0xff]  ;;  %v2753_v3 = vld [vmem:[%s4436_s7 + $0x58] sm:$0xff] }
  0x91   :  { %v59_v5 = vmul.f32 %v3586_v4, %v3586_v4 }
  0x93   :  { %v60_v6 = vsel %vm50_vm0, %v59_v5, 0.0  ;;  %v2751_v5 = vld [vmem:[%s4436_s7 + $0x48] sm:$0xff] }
  0x94   :  { %61 = vadd.xlane.f32.xlu0 %v60_v6  ;;  %v2750_v6 = vld [vmem:[%s4436_s7 + $0x40] sm:$0xff] }
 0x11d   :  { %v62_v24 = vpop.xlane.xlu0 %61 }
 0x11e   :  { %v63_v25 = vmul.f32 0.015625, %v62_v24 }
 0x120   :  { %v64_v26 = vadd.f32 1e-05, %v63_v25 }
 0x122   :  { %3474 = vrsqrt.f32 %v64_v26 }
 0x12f   :  { %v3475_v27 = vpop.eup %3474 }
 0x130   :  { %v66_v29 = vmul.f32 %v3475_v27, %v3586_v4  ;;  %v2752_v4 = vld [vmem:[%s4436_s7 + $0x50] sm:$0xff] }
 0x132   :  { %v3665_v30 = vmul.f32 %v2728_v28, %v66_v29 }
 0x134   :  { %3062 = vmatmul.mubr.msk.f32.vlgmr.msra.gmra.mxu1 %vm50_vm0, %v3665_v30  ;;  %3100 = vmatmul.mubr.msk.f32.vlgmr.msra.gmra.mxu0 %vm50_vm0, %v3665_v30 }
 0x135   :  { %3065 = vmatpush3.msra.mxu1 %v169_v31  ;;  %3122 = vmatpush3.msra.mxu0 %v2748_v32 }
 0x136   :  { %3066 = vmatprep.subr.mxu1 %v3496_v7  ;;  %3123 = vmatprep.subr.mxu0 %v3496_v7 }
 0x137   :  { %3067 = vmatpush3.msra.mxu1 %v168_v33  ;;  %3124 = vmatpush3.msra.mxu0 %v2747_v34 }
 0x138   :  { %3068 = vmatprep.subr.mxu1 %v3496_v7  ;;  %3125 = vmatprep.subr.mxu0 %v3496_v7 }
 0x139   :  { %3069 = vmatpush3.msra.mxu1 %v167_v35  ;;  %3126 = vmatpush3.msra.mxu0 %v2746_v36 }
 0x13a   :  { %3070 = vmatprep.subr.mxu1 %v3496_v7  ;;  %3127 = vmatprep.subr.mxu0 %v3496_v7 }
 0x13b   :  { %3071 = vmatpush3.msra.mxu1 %v166_v37  ;;  %3128 = vmatpush3.msra.mxu0 %v2745_v38 }
 0x13c   :  { %3072 = vmatprep.subr.mxu1 %v3496_v7  ;;  %3129 = vmatprep.subr.mxu0 %v3496_v7 }
 0x13d   :  { %3073 = vmatpush3.msra.mxu1 %v165_v39  ;;  %3130 = vmatpush3.msra.mxu0 %v2744_v40 }
 0x13e   :  { %3074 = vmatprep.subr.mxu1 %v3496_v7  ;;  %3131 = vmatprep.subr.mxu0 %v3496_v7 }
 0x13f   :  { %3075 = vmatpush3.msra.mxu1 %v164_v41  ;;  %3132 = vmatpush3.msra.mxu0 %v2743_v42 }
 0x140   :  { %3076 = vmatprep.subr.mxu1 %v3496_v7  ;;  %3133 = vmatprep.subr.mxu0 %v3496_v7 }
 0x141   :  { %3077 = vmatpush3.msra.mxu1 %v163_v43  ;;  %3134 = vmatpush3.msra.mxu0 %v2742_v44 }
 0x142   :  { %3078 = vmatprep.subr.mxu1 %v3496_v7  ;;  %3135 = vmatprep.subr.mxu0 %v3496_v7 }
 0x143   :  { %3079 = vmatpush3.msra.mxu1 %v162_v45  ;;  %3080 = vmatprep.mubr.msk.f32.mxu1 %vm3497_vm1, %v3496_v7 }
 0x144   :  { %3136 = vmatpush3.msra.mxu0 %v2741_v46  ;;  %3137 = vmatprep.mubr.msk.f32.mxu0 %vm3497_vm1, %v3496_v7 }
 0x145   :  { %3081 = vmatmul.mubr.msk.f32.vlgmr.msra.gmra.mxu1 %vm50_vm0, %v3665_v30  ;;  %3102 = vmatprep.subr.mxu1 %v3496_v7 }
 0x146   :  { %3138 = vmatmul.mubr.msk.f32.vlgmr.msra.gmra.mxu0 %vm50_vm0, %v3665_v30  ;;  %3159 = vmatprep.subr.mxu0 %v3496_v7 }
 0x147   :  { %3103 = vmatpush3.msra.mxu1 %v2739_v47  ;;  %3160 = vmatpush3.msra.mxu0 %v574_v48 }
 0x148   :  { %3104 = vmatprep.subr.mxu1 %v3496_v7  ;;  %3161 = vmatprep.subr.mxu0 %v3496_v7 }
 0x149   :  { %3105 = vmatpush3.msra.mxu1 %v2738_v49  ;;  %3162 = vmatpush3.msra.mxu0 %v573_v50 }
 0x14a   :  { %3106 = vmatprep.subr.mxu1 %v3496_v7  ;;  %3163 = vmatprep.subr.mxu0 %v3496_v7 }
 0x14b   :  { %3107 = vmatpush3.msra.mxu1 %v2737_v51  ;;  %3164 = vmatpush3.msra.mxu0 %v572_v52 }
 0x14c   :  { %3108 = vmatprep.subr.mxu1 %v3496_v7  ;;  %3165 = vmatprep.subr.mxu0 %v3496_v7 }
 0x14d   :  { %3109 = vmatpush3.msra.mxu1 %v2736_v53  ;;  %3166 = vmatpush3.msra.mxu0 %v571_v54  ;;  %v2773_v53 = vld [vmem:[%s4439_s3 + $0x78] sm:$0xff]  ;;  %v2772_v54 = vld [vmem:[%s4439_s3 + $0x70] sm:$0xff] }
 0x14e   :  { %3110 = vmatprep.subr.mxu1 %v3496_v7  ;;  %3167 = vmatprep.subr.mxu0 %v3496_v7 }
 0x14f   :  { %3111 = vmatpush3.msra.mxu1 %v2735_v55  ;;  %3168 = vmatpush3.msra.mxu0 %v570_v56  ;;  %v2771_v55 = vld [vmem:[%s4439_s3 + $0x68] sm:$0xff]  ;;  %v2770_v56 = vld [vmem:[%s4439_s3 + $0x60] sm:$0xff] }
 0x150   :  { %3112 = vmatprep.subr.mxu1 %v3496_v7  ;;  %3169 = vmatprep.subr.mxu0 %v3496_v7 }
 0x151   :  { %3113 = vmatpush3.msra.mxu1 %v2734_v57  ;;  %3170 = vmatpush3.msra.mxu0 %v569_v58  ;;  %v2769_v57 = vld [vmem:[%s4439_s3 + $0x58] sm:$0xff]  ;;  %v2768_v58 = vld [vmem:[%s4439_s3 + $0x50] sm:$0xff] }
 0x152   :  { %3114 = vmatprep.subr.mxu1 %v3496_v7  ;;  %3171 = vmatprep.subr.mxu0 %v3496_v7 }
 0x153   :  { %3115 = vmatpush3.msra.mxu1 %v2733_v59  ;;  %3172 = vmatpush3.msra.mxu0 %v568_v60  ;;  %v2767_v59 = vld [vmem:[%s4439_s3 + $0x48] sm:$0xff]  ;;  %v2766_v60 = vld [vmem:[%s4439_s3 + $0x40] sm:$0xff] }
 0x154   :  { %3116 = vmatprep.subr.mxu1 %v3496_v7  ;;  %3173 = vmatprep.subr.mxu0 %v3496_v7 }
 0x155   :  { %3117 = vmatpush3.msra.mxu1 %v2732_v61  ;;  %3118 = vmatprep.mubr.msk.f32.mxu1 %vm3497_vm1, %v3496_v7  ;;  %v76_v61 = vlaneseq }
 0x156   :  { %3174 = vmatpush3.msra.mxu0 %v567_v62  ;;  %3175 = vmatprep.mubr.msk.f32.mxu0 %vm3497_vm1, %v3496_v7 }
 0x157   :  { %3119 = vmatmul.mubr.msk.f32.vlgmr.msra.gmra.mxu1 %vm50_vm0, %v3665_v30  ;;  %3140 = vmatprep.subr.mxu1 %v3496_v7  ;;  %v3974_v62 = vshrl.u32 %v76_v61, 7 }
 0x158   :  { %3176 = vmatmul.mubr.msk.f32.vlgmr.msra.gmra.mxu0 %vm50_vm0, %v3665_v30  ;;  %3141 = vmatpush3.msra.mxu1 %v2757_v63  ;;  %v3976_v63 = vand.u32 127, %v76_v61  ;;  %v969_v61 = vld [vmem:[%s4443_s8 + $0x8] sm:$0xff] }
 0x159   :  { %3142 = vmatprep.subr.mxu1 %v3496_v7  ;;  %3156 = vmatprep.mubr.msk.f32.mxu1 %vm3497_vm1, %v3496_v7 }
 0x15a   :  { %3143 = vmatpush3.msra.mxu1 %v2756_v0  ;;  %3197 = vmatprep.subr.mxu0 %v3496_v7  ;;  %vm80_vm3 = vcmp.ge.s32.totalorder %v3974_v62, %v3976_v63  ;;  %v2842_v62 = vld [vmem:[%s4443_s8 + $0x30] sm:$0xff] }
 0x15b   :  { %3144 = vmatprep.subr.mxu1 %v3496_v7  ;;  %3199 = vmatprep.mubr.msk.f32.mxu0 %vm3497_vm1, %v3496_v7 }
 0x15c   :  { %3145 = vmatpush3.msra.mxu1 %v2755_v1 }
 0x15d   :  { %3146 = vmatprep.subr.mxu1 %v3496_v7 }
 0x15e   :  { %3147 = vmatpush3.msra.mxu1 %v2754_v2 }
 0x15f   :  { %3148 = vmatprep.subr.mxu1 %v3496_v7 }
 0x160   :  { %3149 = vmatpush3.msra.mxu1 %v2753_v3 }
 0x161   :  { %3150 = vmatprep.subr.mxu1 %v3496_v7 }
 0x162   :  { %3151 = vmatpush3.msra.mxu1 %v2752_v4 }
 0x163   :  { %3152 = vmatprep.subr.mxu1 %v3496_v7 }
 0x164   :  { %3153 = vmatpush3.msra.mxu1 %v2751_v5 }
 0x165   :  { %3154 = vmatprep.subr.mxu1 %v3496_v7 }
 0x166   :  { %3155 = vmatpush3.msra.mxu1 %v2750_v6 }
 0x167   :  { %3157 = vmatmul.mubr.msk.f32.vlgmr.msra.gmra.mxu1 %vm50_vm0, %v3665_v30  ;;  %3178 = vmatprep.subr.mxu1 %v3496_v7 }
 0x168   :  { %3179 = vmatpush3.msra.mxu1 %v652_v8  ;;  %3194 = vmatprep.mubr.msk.f32.mxu1 %vm3497_vm1, %v3496_v7 }
 0x169   :  { %3180 = vmatprep.subr.mxu1 %v3496_v7 }
 0x16a   :  { %3181 = vmatpush3.msra.mxu1 %v651_v9 }
 0x16b   :  { %3182 = vmatprep.subr.mxu1 %v3496_v7 }
 0x16c   :  { %3183 = vmatpush3.msra.mxu1 %v650_v10 }
 0x16d   :  { %3184 = vmatprep.subr.mxu1 %v3496_v7 }
 0x16e   :  { %3185 = vmatpush3.msra.mxu1 %v649_v11 }
 0x16f   :  { %3186 = vmatprep.subr.mxu1 %v3496_v7 }
 0x170   :  { %3187 = vmatpush3.msra.mxu1 %v648_v12 }
 0x171   :  { %3188 = vmatprep.subr.mxu1 %v3496_v7 }
 0x172   :  { %3189 = vmatpush3.msra.mxu1 %v647_v13 }
 0x173   :  { %3190 = vmatprep.subr.mxu1 %v3496_v7 }
 0x174   :  { %3191 = vmatpush3.msra.mxu1 %v646_v14 }
 0x175   :  { %3192 = vmatprep.subr.mxu1 %v3496_v7 }
 0x176   :  { %3193 = vmatpush3.msra.mxu1 %v645_v15 }
 0x177   :  { %3195 = vmatmul.mubr.msk.f32.vlgmr.msra.gmra.mxu1 %vm50_vm0, %v3665_v30  ;;  %3202 = vmatprep.subr.mxu1 %v3496_v7 }
 0x178   :  { %3204 = vmatprep.mubr.msk.f32.mxu1 %vm3497_vm1, %v3496_v7 }
 0x1f4   :  { %v158_v16 = vpop.f32.mrf.mxu1  ;;  %v3891_v17 = vpop.f32.mrf.mxu0 }
 0x1f5   :  { %v240_v23 = vmul.f32 %v158_v16, %v3896_v20  ;;  %v243_v24 = vmul.f32 %v158_v16, %v3901_v21 }
 0x1f6   :  { %v3063_v18 = vpop.f32.mrf.mxu1  ;;  %v3101_v19 = vpop.f32.mrf.mxu0 }
 0x205   :  { %v236_v22 = vpop.f32.mrf.mxu1 }
 0x206   :  { %v241_v25 = vmul.f32 %v236_v22, %v3901_v21  ;;  %v244_v26 = vmul.f32 %v236_v22, %v3896_v20  ;;  %v478_v27 = vpop.f32.mrf.mxu0  ;;  %v2782_v22 = vld [vmem:[%s4440_s4 + $0x78] sm:$0xff] }
 0x207   :  { %v3082_v28 = vpop.f32.mrf.mxu1  ;;  %v483_v34 = vmul.f32 %v478_v27, %v3901_v21  ;;  %v486_v35 = vmul.f32 %v478_v27, %v3896_v20  ;;  %v2777_v27 = vld [vmem:[%s4440_s4 + $0x50] sm:$0xff] }
 0x208   :  { %v3907_v29 = vsub.f32 %v240_v23, %v241_v25  ;;  %v245_v31 = vadd.f32 %v244_v26, %v243_v24  ;;  %v3139_v32 = vpop.f32.mrf.mxu0  ;;  %v2781_v23 = vld [vmem:[%s4440_s4 + $0x70] sm:$0xff]  ;;  %v2780_v24 = vld [vmem:[%s4440_s4 + $0x68] sm:$0xff]  ;;  %v2779_v25 = vld [vmem:[%s4440_s4 + $0x60] sm:$0xff] }
 0x209   :  { %v2778_v26 = vld [vmem:[%s4440_s4 + $0x58] sm:$0xff]  ;;  %v2776_v28 = vld [vmem:[%s4440_s4 + $0x48] sm:$0xff] }
 0x20a   :  { %3198 = vmatpush3.xpose.msk.msra.mxu0 %vm729_vm2, %v245_v31  ;;  %3203 = vmatpush3.xpose.msk.msra.mxu1 %vm729_vm2, %v3907_v29 }
 0x20b   :  { %3207 = vmatprep.subr.mxu0 %v3496_v7  ;;  %3212 = vmatprep.subr.mxu1 %v3496_v7 }
 0x217   :  { %v399_v33 = vpop.f32.mrf.mxu1 }
 0x218   :  { %v482_v36 = vmul.f32 %v399_v33, %v3896_v20  ;;  %v485_v37 = vmul.f32 %v399_v33, %v3901_v21  ;;  %v641_v38 = vpop.f32.mrf.mxu0 }
 0x219   :  { %v3120_v39 = vpop.f32.mrf.mxu1  ;;  %v723_v46 = vmul.f32 %v641_v38, %v3896_v20  ;;  %v726_v47 = vmul.f32 %v641_v38, %v3901_v21 }
 0x21a   :  { %v3918_v40 = vsub.f32 %v482_v36, %v483_v34  ;;  %v3920_v41 = vadd.f32 %v486_v35, %v485_v37  ;;  %v3177_v42 = vpop.f32.mrf.mxu0 }
 0x227   :  { %v3922_v43 = vpop.f32.mrf.mxu1 }
 0x229   :  { %v3158_v44 = vpop.f32.mrf.mxu1 }
 0x237   :  { %v719_v45 = vpop.f32.mrf.mxu1 }
 0x238   :  { %v724_v48 = vmul.f32 %v719_v45, %v3901_v21  ;;  %v727_v49 = vmul.f32 %v719_v45, %v3896_v20 }
 0x239   :  { %v3196_v50 = vpop.f32.mrf.mxu1 }
 0x23a   :  { %v725_v51 = vsub.f32 %v723_v46, %v724_v48  ;;  %v728_v52 = vadd.f32 %v727_v49, %v726_v47 }
 0x23c   :  { %3200 = vmatmul.mubr.msk.f32.vlgmr.msra.gmra.mxu0 %vm729_vm2, %v728_v52  ;;  %3205 = vmatmul.mubr.msk.f32.vlgmr.msra.gmra.mxu1 %vm729_vm2, %v725_v51 }
 0x23d   :  { %3208 = vmatpush3.msra.mxu0 %v3891_v17  ;;  %3213 = vmatpush3.msra.mxu1 %v2773_v53 }
 0x23e   :  { %3214 = vmatprep.subr.mxu1 %v3496_v7  ;;  %3228 = vmatprep.mubr.msk.f32.mxu1 %vm3497_vm1, %v3496_v7 }
 0x23f   :  { %3215 = vmatpush3.msra.mxu1 %v2772_v54  ;;  %3209 = vmatprep.mubr.msk.f32.mxu0 %vm3497_vm1, %v3496_v7 }
 0x240   :  { %3216 = vmatprep.subr.mxu1 %v3496_v7  ;;  %3231 = vmatprep.subr.mxu0 %v3496_v7 }
 0x241   :  { %3217 = vmatpush3.msra.mxu1 %v2771_v55 }
 0x242   :  { %3218 = vmatprep.subr.mxu1 %v3496_v7 }
 0x243   :  { %3219 = vmatpush3.msra.mxu1 %v2770_v56  ;;  %v2790_v56 = vld [vmem:[%s4443_s8 + $0x18] sm:$0xff] }
 0x244   :  { %3220 = vmatprep.subr.mxu1 %v3496_v7 }
 0x245   :  { %3221 = vmatpush3.msra.mxu1 %v2769_v57  ;;  %v2789_v57 = vld [vmem:[%s4443_s8 + $0x10] sm:$0xff] }
 0x246   :  { %3222 = vmatprep.subr.mxu1 %v3496_v7 }
 0x247   :  { %3223 = vmatpush3.msra.mxu1 %v2768_v58 }
 0x248   :  { %3224 = vmatprep.subr.mxu1 %v3496_v7 }
 0x249   :  { %3225 = vmatpush3.msra.mxu1 %v2767_v59 }
 0x24a   :  { %3226 = vmatprep.subr.mxu1 %v3496_v7 }
 0x24b   :  { %3227 = vmatpush3.msra.mxu1 %v2766_v60 }
 0x24c   :  { %3229 = vmatmul.mubr.msk.f32.vlgmr.msra.gmra.mxu1 %vm50_vm0, %v3665_v30  ;;  %3250 = vmatprep.subr.mxu1 %v3496_v7 }
 0x24d   :  { %3251 = vmatpush3.xpose.msk.msra.mxu1 %vm729_vm2, %v245_v31  ;;  %3252 = vmatprep.mubr.msk.f32.mxu1 %vm3497_vm1, %v3496_v7  ;;  %v2775_v31 = vld [vmem:[%s4440_s4 + $0x40] sm:$0xff] }
 0x24e   :  { %3260 = vmatprep.subr.mxu1 %v3496_v7 }
 0x2fc   :  { %v802_v0 = vpop.f32.mrf.mxu0  ;;  %v878_v1 = vpop.f32.mrf.mxu1 }
 0x2fd   :  { %v879_v2 = vadd.f32 %v878_v1, %v802_v0  ;;  %v968_v0 = vld [vmem:[%s4443_s8] sm:$0xff]  ;;  %v2809_v1 = vld [vmem:[%s4440_s4 + $0xb8] sm:$0xff] }
 0x2fe   :  { %v3201_v3 = vpop.f32.mrf.mxu0  ;;  %v3206_v4 = vpop.f32.mrf.mxu1 }
 0x2ff   :  { %v882_v5 = vmul.f32 0.25, %v879_v2  ;;  %v2808_v2 = vld [vmem:[%s4440_s4 + $0xb0] sm:$0xff]  ;;  %v2807_v3 = vld [vmem:[%s4440_s4 + $0xa8] sm:$0xff]  ;;  %v2806_v4 = vld [vmem:[%s4440_s4 + $0xa0] sm:$0xff] }
 0x301   :  { %v883_v6 = vsel %vm80_vm3, %v882_v5, -1e+30  ;;  %v2805_v5 = vld [vmem:[%s4440_s4 + $0x98] sm:$0xff] }
 0x302   :  { %v884_v8 = vsel %vm729_vm2, %v883_v6, -inf }
 0x303   :  { %885 = vmax.xlane.f32.xlu1 %v884_v8  ;;  %v2803_v8 = vld [vmem:[%s4440_s4 + $0x88] sm:$0xff] }
 0x30c   :  { %v1045_v9 = vpop.f32.mrf.mxu1 }
 0x30d   :  { %v1128_v35 = vmul.f32 %v1045_v9, %v3896_v20  ;;  %v1131_v36 = vmul.f32 %v1045_v9, %v3901_v21  ;;  %v2802_v9 = vld [vmem:[%s4440_s4 + $0x80] sm:$0xff] }
 0x30e   :  { %v3230_v10 = vpop.f32.mrf.mxu1 }
 0x30f   :  { %v2800_v10 = vld [vmem:[%s4439_s3 + $0xb8] sm:$0xff] }
 0x38c   :  { %v886_v11 = vpop.xlane.xlu1 %885 }
 0x38d   :  { %v887_v12 = vsub.f32 %v883_v6, %v886_v11  ;;  %v2804_v6 = vld [vmem:[%s4440_s4 + $0x90] sm:$0xff] }
 0x38f   :  { %v888_v13 = vmul.f32 1.442695, %v887_v12  ;;  %v2799_v12 = vld [vmem:[%s4439_s3 + $0xb0] sm:$0xff] }
 0x391   :  { %3476 = vpow2.f32 %v888_v13 }
 0x39e   :  { %v3477_v14 = vpop.eup %3476 }
 0x39f   :  { %v890_v15 = vsel %vm729_vm2, %v3477_v14, 0.0 }
 0x3a0   :  { %891 = vadd.xlane.f32.xlu1 %v890_v15 }
 0x429   :  { %v892_v16 = vpop.xlane.xlu1 %891 }
 0x42a   :  { %3478 = vrcp.f32 %v892_v16  ;;  %v2797_v16 = vld [vmem:[%s4439_s3 + $0xa0] sm:$0xff] }
 0x437   :  { %v3479_v18 = vpop.eup %3478 }
 0x438   :  { %v894_v19 = vmul.f32 %v3479_v18, %v3477_v14  ;;  %v2798_v14 = vld [vmem:[%s4439_s3 + $0xa8] sm:$0xff] }
 0x43a   :  { %3210 = vmatmul.mubr.msk.f32.vlgmr.msra.gmra.mxu0 %vm729_vm2, %v894_v19  ;;  %v2796_v19 = vld [vmem:[%s4439_s3 + $0x98] sm:$0xff] }
 0x43b   :  { %3232 = vmatpush3.msra.mxu0 %v2782_v22  ;;  %3247 = vmatprep.mubr.msk.f32.mxu0 %vm3497_vm1, %v3496_v7  ;;  %v2795_v22 = vld [vmem:[%s4439_s3 + $0x90] sm:$0xff] }
 0x43c   :  { %3233 = vmatprep.subr.mxu0 %v3496_v7 }
 0x43d   :  { %3234 = vmatpush3.msra.mxu0 %v2781_v23  ;;  %v2794_v23 = vld [vmem:[%s4439_s3 + $0x88] sm:$0xff] }
 0x43e   :  { %3235 = vmatprep.subr.mxu0 %v3496_v7 }
 0x43f   :  { %3236 = vmatpush3.msra.mxu0 %v2780_v24  ;;  %v2793_v24 = vld [vmem:[%s4439_s3 + $0x80] sm:$0xff] }
 0x440   :  { %3237 = vmatprep.subr.mxu0 %v3496_v7 }
 0x441   :  { %3238 = vmatpush3.msra.mxu0 %v2779_v25 }
 0x442   :  { %3239 = vmatprep.subr.mxu0 %v3496_v7 }
 0x443   :  { %3240 = vmatpush3.msra.mxu0 %v2778_v26 }
 0x444   :  { %3241 = vmatprep.subr.mxu0 %v3496_v7 }
 0x445   :  { %3242 = vmatpush3.msra.mxu0 %v2777_v27 }
 0x446   :  { %3243 = vmatprep.subr.mxu0 %v3496_v7 }
 0x447   :  { %3244 = vmatpush3.msra.mxu0 %v2776_v28 }
 0x448   :  { %3245 = vmatprep.subr.mxu0 %v3496_v7 }
 0x449   :  { %3246 = vmatpush3.msra.mxu0 %v2775_v31 }
 0x44a   :  { %3248 = vmatmul.mubr.msk.f32.vlgmr.msra.gmra.mxu0 %vm50_vm0, %v3665_v30  ;;  %3255 = vmatprep.subr.mxu0 %v3496_v7 }
 0x44b   :  { %3256 = vmatpush3.xpose.msk.msra.mxu0 %vm729_vm2, %v3907_v29  ;;  %3257 = vmatprep.mubr.msk.f32.mxu0 %vm3497_vm1, %v3496_v7 }
 0x44c   :  { %3265 = vmatprep.subr.mxu0 %v3496_v7 }
 0x4fa   :  { %v964_v32 = vpop.f32.mrf.mxu0 }
 0x4fc   :  { %v3211_v33 = vpop.f32.mrf.mxu0 }
 0x50a   :  { %v1124_v34 = vpop.f32.mrf.mxu0 }
 0x50b   :  { %v1129_v37 = vmul.f32 %v1124_v34, %v3901_v21  ;;  %v1132_v38 = vmul.f32 %v1124_v34, %v3896_v20 }
 0x50c   :  { %v3249_v39 = vpop.f32.mrf.mxu0 }
 0x50d   :  { %v1130_v42 = vsub.f32 %v1128_v35, %v1129_v37  ;;  %v1133_v44 = vadd.f32 %v1132_v38, %v1131_v36 }
 0x50f   :  { %3253 = vmatmul.mubr.msk.f32.vlgmr.msra.gmra.mxu1 %vm729_vm2, %v1133_v44  ;;  %3258 = vmatmul.mubr.msk.f32.vlgmr.msra.gmra.mxu0 %vm729_vm2, %v1130_v42 }
 0x510   :  { %3261 = vmatpush3.msra.mxu1 %v3891_v17  ;;  %3262 = vmatprep.mubr.msk.f32.mxu1 %vm3497_vm1, %v3496_v7 }
 0x511   :  { %3272 = vmatprep.subr.mxu1 %v3496_v7  ;;  %3269 = vmatprep.mubr.msk.f32.mxu0 %vm3497_vm1, %v3496_v7 }
 0x512   :  { %3266 = vmatpush3.msra.mxu0 %v2790_v56 }
 0x513   :  { %3267 = vmatprep.subr.mxu0 %v3496_v7 }
 0x514   :  { %3268 = vmatpush3.msra.mxu0 %v2789_v57 }
 0x515   :  { %3279 = vmatprep.subr.mxu0 %v3496_v7 }
 0x5cf   :  { %v1203_v29 = vpop.f32.mrf.mxu1  ;;  %v1276_v45 = vpop.f32.mrf.mxu0 }
 0x5d0   :  { %v1277_v46 = vadd.f32 %v1276_v45, %v1203_v29 }
 0x5d1   :  { %v3254_v47 = vpop.f32.mrf.mxu1  ;;  %v3259_v48 = vpop.f32.mrf.mxu0 }
 0x5d2   :  { %v1280_v49 = vmul.f32 0.25, %v1277_v46 }
 0x5d4   :  { %v1281_v50 = vsel %vm80_vm3, %v1280_v49, -1e+30 }
 0x5d5   :  { %v1282_v17 = vsel %vm729_vm2, %v1281_v50, -inf }
 0x5d6   :  { %1283 = vmax.xlane.f32.xlu0 %v1282_v17 }
 0x65f   :  { %v1284_v51 = vpop.xlane.xlu0 %1283 }
 0x660   :  { %v1285_v52 = vsub.f32 %v1281_v50, %v1284_v51 }
 0x662   :  { %v1286_v53 = vmul.f32 1.442695, %v1285_v52 }
 0x664   :  { %3480 = vpow2.f32 %v1286_v53  ;;  %v2817_v53 = vld [vmem:[%s4443_s8 + $0x28] sm:$0xff] }
 0x671   :  { %v3481_v54 = vpop.eup %3480 }
 0x672   :  { %v1288_v55 = vsel %vm729_vm2, %v3481_v54, 0.0 }
 0x673   :  { %1289 = vadd.xlane.f32.xlu1 %v1288_v55 }
 0x6fc   :  { %v1290_v58 = vpop.xlane.xlu1 %1289 }
 0x6fd   :  { %3482 = vrcp.f32 %v1290_v58  ;;  %v2826_v58 = vld [vmem:[%s4439_s3 + $0xf8] sm:$0xff] }
 0x70a   :  { %v3483_v59 = vpop.eup %3482 }
 0x70b   :  { %v1292_v60 = vmul.f32 %v3483_v59, %v3481_v54  ;;  %v2816_v54 = vld [vmem:[%s4443_s8 + $0x20] sm:$0xff]  ;;  %v2825_v59 = vld [vmem:[%s4439_s3 + $0xf0] sm:$0xff] }
 0x70d   :  { %3263 = vmatmul.mubr.msk.f32.vlgmr.msra.gmra.mxu1 %vm729_vm2, %v1292_v60  ;;  %v2824_v60 = vld [vmem:[%s4439_s3 + $0xe8] sm:$0xff] }
 0x70e   :  { %3273 = vmatpush3.msra.mxu1 %v969_v61  ;;  %3276 = vmatprep.mubr.msk.f32.mxu1 %vm3497_vm1, %v3496_v7  ;;  %v2823_v61 = vld [vmem:[%s4439_s3 + $0xe0] sm:$0xff] }
 0x70f   :  { %3274 = vmatprep.subr.mxu1 %v3496_v7 }
 0x710   :  { %3275 = vmatpush3.msra.mxu1 %v968_v0  ;;  %v2822_v0 = vld [vmem:[%s4439_s3 + $0xd8] sm:$0xff] }
 0x711   :  { %3298 = vmatprep.subr.mxu1 %v3496_v7  ;;  %3277 = vmatmul.mubr.msk.f32.vlgmr.msra.gmra.mxu1 %vm1369_vm4, %v964_v32 }
 0x712   :  { %3299 = vmatpush3.msra.mxu1 %v2809_v1  ;;  %3314 = vmatprep.mubr.msk.f32.mxu1 %vm3497_vm1, %v3496_v7  ;;  %v2821_v1 = vld [vmem:[%s4439_s3 + $0xd0] sm:$0xff] }
 0x713   :  { %3300 = vmatprep.subr.mxu1 %v3496_v7 }
 0x714   :  { %3301 = vmatpush3.msra.mxu1 %v2808_v2  ;;  %v2820_v2 = vld [vmem:[%s4439_s3 + $0xc8] sm:$0xff] }
 0x715   :  { %3302 = vmatprep.subr.mxu1 %v3496_v7 }
 0x716   :  { %3303 = vmatpush3.msra.mxu1 %v2807_v3  ;;  %v2819_v3 = vld [vmem:[%s4439_s3 + $0xc0] sm:$0xff] }
 0x717   :  { %3304 = vmatprep.subr.mxu1 %v3496_v7 }
 0x718   :  { %3305 = vmatpush3.msra.mxu1 %v2806_v4  ;;  %v2835_v4 = vld [vmem:[%s4440_s4 + $0xf8] sm:$0xff] }
 0x719   :  { %3306 = vmatprep.subr.mxu1 %v3496_v7 }
 0x71a   :  { %3307 = vmatpush3.msra.mxu1 %v2805_v5 }
 0x71b   :  { %3308 = vmatprep.subr.mxu1 %v3496_v7 }
 0x71c   :  { %3309 = vmatpush3.msra.mxu1 %v2804_v6  ;;  %v2834_v6 = vld [vmem:[%s4440_s4 + $0xf0] sm:$0xff] }
 0x71d   :  { %3310 = vmatprep.subr.mxu1 %v3496_v7 }
 0x71e   :  { %3311 = vmatpush3.msra.mxu1 %v2803_v8 }
 0x71f   :  { %3312 = vmatprep.subr.mxu1 %v3496_v7 }
 0x720   :  { %3313 = vmatpush3.msra.mxu1 %v2802_v9  ;;  %v2832_v9 = vld [vmem:[%s4440_s4 + $0xe0] sm:$0xff] }
 0x721   :  { %3315 = vmatmul.mubr.msk.f32.vlgmr.msra.gmra.mxu1 %vm50_vm0, %v3665_v30  ;;  %3322 = vmatprep.subr.mxu1 %v3496_v7 }
 0x722   :  { %3323 = vmatpush3.xpose.msk.msra.mxu1 %vm729_vm2, %v3918_v40  ;;  %3324 = vmatprep.mubr.msk.f32.mxu1 %vm3497_vm1, %v3496_v7 }
 0x723   :  { %3332 = vmatprep.subr.mxu1 %v3496_v7 }
 0x7cd   :  { %v1362_v11 = vpop.f32.mrf.mxu1 }
 0x7ce   :  { %3270 = vmatmul.mubr.msk.f32.vlgmr.msra.gmra.mxu0 %vm1369_vm4, %v1362_v11  ;;  %v2830_v11 = vld [vmem:[%s4440_s4 + $0xd0] sm:$0xff] }
 0x7cf   :  { %3280 = vmatpush3.msra.mxu0 %v2800_v10  ;;  %v3264_v13 = vpop.f32.mrf.mxu1  ;;  %3295 = vmatprep.mubr.msk.f32.mxu0 %vm3497_vm1, %v3496_v7  ;;  %v2831_v10 = vld [vmem:[%s4440_s4 + $0xd8] sm:$0xff] }
 0x7d0   :  { %3281 = vmatprep.subr.mxu0 %v3496_v7  ;;  %v2828_v13 = vld [vmem:[%s4440_s4 + $0xc0] sm:$0xff] }
 0x7d1   :  { %3282 = vmatpush3.msra.mxu0 %v2799_v12  ;;  %v4118_v15 = vpop.f32.mrf.mxu1  ;;  %v2829_v12 = vld [vmem:[%s4440_s4 + $0xc8] sm:$0xff] }
 0x7d2   :  { %3283 = vmatprep.subr.mxu0 %v3496_v7 }
 0x7d3   :  { %3284 = vmatpush3.msra.mxu0 %v2798_v14  ;;  %v3278_v18 = vpop.f32.mrf.mxu1 }
 0x7d4   :  { %3285 = vmatprep.subr.mxu0 %v3496_v7 }
 0x7d5   :  { %3286 = vmatpush3.msra.mxu0 %v2797_v16 }
 0x7d6   :  { %3287 = vmatprep.subr.mxu0 %v3496_v7 }
 0x7d7   :  { %3288 = vmatpush3.msra.mxu0 %v2796_v19 }
 0x7d8   :  { %3289 = vmatprep.subr.mxu0 %v3496_v7 }
 0x7d9   :  { %3290 = vmatpush3.msra.mxu0 %v2795_v22 }
 0x7da   :  { %3291 = vmatprep.subr.mxu0 %v3496_v7 }
 0x7db   :  { %3292 = vmatpush3.msra.mxu0 %v2794_v23 }
 0x7dc   :  { %3293 = vmatprep.subr.mxu0 %v3496_v7 }
 0x7dd   :  { %3294 = vmatpush3.msra.mxu0 %v2793_v24 }
 0x7de   :  { %3296 = vmatmul.mubr.msk.f32.vlgmr.msra.gmra.mxu0 %vm50_vm0, %v3665_v30  ;;  %3317 = vmatprep.subr.mxu0 %v3496_v7 }
 0x7df   :  { %3318 = vmatpush3.xpose.msk.msra.mxu0 %vm729_vm2, %v3920_v41  ;;  %3319 = vmatprep.mubr.msk.f32.mxu0 %vm3497_vm1, %v3496_v7 }
 0x7e0   :  { %3327 = vmatprep.subr.mxu0 %v3496_v7 }
 0x7e1   :  { %v1670_v25 = vpop.f32.mrf.mxu1 }
 0x7e2   :  { %v1675_v32 = vmul.f32 %v1670_v25, %v3901_v21  ;;  %v1678_v33 = vmul.f32 %v1670_v25, %v3896_v20 }
 0x7e3   :  { %v3316_v26 = vpop.f32.mrf.mxu1 }
 0x88e   :  { %v4149_v27 = vpop.f32.mrf.mxu0 }
 0x88f   :  { %v1513_v18 = vadd.f32 %v4118_v15, %v4149_v27 }
 0x890   :  { %v3271_v28 = vpop.f32.mrf.mxu0 }
 0x89e   :  { %v1591_v31 = vpop.f32.mrf.mxu0 }
 0x89f   :  { %v1674_v34 = vmul.f32 %v1591_v31, %v3896_v20  ;;  %v1677_v35 = vmul.f32 %v1591_v31, %v3901_v21 }
 0x8a0   :  { %v3297_v36 = vpop.f32.mrf.mxu0 }
 0x8a1   :  { %v1676_v37 = vsub.f32 %v1674_v34, %v1675_v32  ;;  %v1679_v38 = vadd.f32 %v1678_v33, %v1677_v35 }
 0x8a3   :  { %3320 = vmatmul.mubr.msk.f32.vlgmr.msra.gmra.mxu0 %vm729_vm2, %v1679_v38  ;;  %3325 = vmatmul.mubr.msk.f32.vlgmr.msra.gmra.mxu1 %vm729_vm2, %v1676_v37 }
 0x8a4   :  { %3328 = vmatpush3.msra.mxu0 %v3922_v43  ;;  %3329 = vmatprep.mubr.msk.f32.mxu0 %vm3497_vm1, %v3496_v7 }
 0x8a5   :  { %3339 = vmatprep.subr.mxu0 %v3496_v7  ;;  %3336 = vmatprep.mubr.msk.f32.mxu1 %vm3497_vm1, %v3496_v7 }
 0x8a6   :  { %3333 = vmatpush3.msra.mxu1 %v2817_v53  ;;  %v2468_v53 = vld [vmem:[%s4444_s9] sm:$0xff] }
 0x8a7   :  { %3334 = vmatprep.subr.mxu1 %v3496_v7 }
 0x8a8   :  { %3335 = vmatpush3.msra.mxu1 %v2816_v54  ;;  %v2647_v54 = vld [vmem:[%s4445_s11 + $0x78] sm:$0xff] }
 0x8a9   :  { %3358 = vmatprep.subr.mxu1 %v3496_v7 }
 0x963   :  { %v1752_v39 = vpop.f32.mrf.mxu0  ;;  %v1828_v42 = vpop.f32.mrf.mxu1 }
 0x964   :  { %v1829_v44 = vadd.f32 %v1828_v42, %v1752_v39 }
 0x965   :  { %v3321_v29 = vpop.f32.mrf.mxu0  ;;  %v3326_v45 = vpop.f32.mrf.mxu1 }
 0x966   :  { %v1832_v46 = vmul.f32 0.25, %v1829_v44  ;;  %v2843_v29 = vld [vmem:[%s4443_s8 + $0x38] sm:$0xff] }
 0x968   :  { %v1833_v47 = vsel %vm80_vm3, %v1832_v46, -1e+30 }
 0x969   :  { %v1834_v48 = vsel %vm729_vm2, %v1833_v47, -inf }
 0x96a   :  { %1835 = vmax.xlane.f32.xlu0 %v1834_v48  ;;  %v2474_v48 = vld [vmem:[%s4444_s9 + $0x30] sm:$0xff] }
 0x9f3   :  { %v1836_v49 = vpop.xlane.xlu0 %1835 }
 0x9f4   :  { %v1837_v50 = vsub.f32 %v1833_v47, %v1836_v49  ;;  %v2475_v47 = vld [vmem:[%s4444_s9 + $0x38] sm:$0xff]  ;;  %v2473_v49 = vld [vmem:[%s4444_s9 + $0x28] sm:$0xff] }
 0x9f6   :  { %v1838_v17 = vmul.f32 1.442695, %v1837_v50  ;;  %v2472_v50 = vld [vmem:[%s4444_s9 + $0x20] sm:$0xff] }
 0x9f8   :  { %3484 = vpow2.f32 %v1838_v17  ;;  %v2471_v17 = vld [vmem:[%s4444_s9 + $0x18] sm:$0xff] }
 0xa05   :  { %v3485_v51 = vpop.eup %3484 }
 0xa06   :  { %v1840_v52 = vsel %vm729_vm2, %v3485_v51, 0.0 }
 0xa07   :  { %1841 = vadd.xlane.f32.xlu1 %v1840_v52  ;;  %v2469_v52 = vld [vmem:[%s4444_s9 + $0x8] sm:$0xff] }
 0xa90   :  { %v1842_v55 = vpop.xlane.xlu1 %1841 }
 0xa91   :  { %3486 = vrcp.f32 %v1842_v55  ;;  %v2646_v55 = vld [vmem:[%s4445_s11 + $0x70] sm:$0xff] }
 0xa9e   :  { %v3487_v56 = vpop.eup %3486 }
 0xa9f   :  { %v1844_v57 = vmul.f32 %v3487_v56, %v3485_v51  ;;  %v2470_v51 = vld [vmem:[%s4444_s9 + $0x10] sm:$0xff]  ;;  %v2645_v56 = vld [vmem:[%s4445_s11 + $0x68] sm:$0xff] }
 0xaa1   :  { %3330 = vmatmul.mubr.msk.f32.vlgmr.msra.gmra.mxu0 %vm729_vm2, %v1844_v57  ;;  %v2644_v57 = vld [vmem:[%s4445_s11 + $0x60] sm:$0xff] }
 0xaa2   :  { %3340 = vmatpush3.msra.mxu0 %v2826_v58  ;;  %3355 = vmatprep.mubr.msk.f32.mxu0 %vm3497_vm1, %v3496_v7  ;;  %v2643_v58 = vld [vmem:[%s4445_s11 + $0x58] sm:$0xff] }
 0xaa3   :  { %3341 = vmatprep.subr.mxu0 %v3496_v7 }
 0xaa4   :  { %3342 = vmatpush3.msra.mxu0 %v2825_v59  ;;  %v2642_v59 = vld [vmem:[%s4445_s11 + $0x50] sm:$0xff] }
 0xaa5   :  { %3343 = vmatprep.subr.mxu0 %v3496_v7 }
 0xaa6   :  { %3344 = vmatpush3.msra.mxu0 %v2824_v60  ;;  %v2641_v60 = vld [vmem:[%s4445_s11 + $0x48] sm:$0xff] }
 0xaa7   :  { %3345 = vmatprep.subr.mxu0 %v3496_v7 }
 0xaa8   :  { %3346 = vmatpush3.msra.mxu0 %v2823_v61  ;;  %v2553_v61 = vld [vmem:[%s4446_s10 + $0x38] sm:$0xff] }
 0xaa9   :  { %3347 = vmatprep.subr.mxu0 %v3496_v7 }
 0xaaa   :  { %3348 = vmatpush3.msra.mxu0 %v2822_v0 }
 0xaab   :  { %3349 = vmatprep.subr.mxu0 %v3496_v7 }
 0xaac   :  { %3350 = vmatpush3.msra.mxu0 %v2821_v1  ;;  %v2552_v1 = vld [vmem:[%s4446_s10 + $0x30] sm:$0xff] }
 0xaad   :  { %3351 = vmatprep.subr.mxu0 %v3496_v7 }
 0xaae   :  { %3352 = vmatpush3.msra.mxu0 %v2820_v2 }
 0xaaf   :  { %3353 = vmatprep.subr.mxu0 %v3496_v7 }
 0xab0   :  { %3354 = vmatpush3.msra.mxu0 %v2819_v3  ;;  %v2551_v3 = vld [vmem:[%s4446_s10 + $0x28] sm:$0xff] }
 0xab1   :  { %3356 = vmatmul.mubr.msk.f32.vlgmr.msra.gmra.mxu0 %vm50_vm0, %v3665_v30  ;;  %3377 = vmatprep.subr.mxu0 %v3496_v7 }
 0xab2   :  { %3378 = vmatpush3.xpose.msk.msra.mxu0 %vm729_vm2, %v3920_v41  ;;  %3379 = vmatprep.mubr.msk.f32.mxu0 %vm3497_vm1, %v3496_v7  ;;  %v2833_v41 = vld [vmem:[%s4440_s4 + $0xe8] sm:$0xff] }
 0xab3   :  { %3387 = vmatprep.subr.mxu0 %v3496_v7 }
 0xb61   :  { %v1914_v5 = vpop.f32.mrf.mxu0 }
 0xb62   :  { %3337 = vmatmul.mubr.msk.f32.vlgmr.msra.gmra.mxu1 %vm1369_vm4, %v1914_v5  ;;  %v2549_v5 = vld [vmem:[%s4446_s10 + $0x18] sm:$0xff] }
 0xb63   :  { %3359 = vmatpush3.msra.mxu1 %v2835_v4  ;;  %v3331_v8 = vpop.f32.mrf.mxu0  ;;  %3374 = vmatprep.mubr.msk.f32.mxu1 %vm3497_vm1, %v3496_v7  ;;  %v2550_v4 = vld [vmem:[%s4446_s10 + $0x20] sm:$0xff] }
 0xb64   :  { %3360 = vmatprep.subr.mxu1 %v3496_v7  ;;  %v2547_v8 = vld [vmem:[%s4446_s10 + $0x8] sm:$0xff] }
 0xb65   :  { %3361 = vmatpush3.msra.mxu1 %v2834_v6  ;;  %v2548_v6 = vld [vmem:[%s4446_s10 + $0x10] sm:$0xff] }
 0xb66   :  { %3362 = vmatprep.subr.mxu1 %v3496_v7 }
 0xb67   :  { %3363 = vmatpush3.msra.mxu1 %v2833_v41  ;;  %v2546_v41 = vld [vmem:[%s4446_s10] sm:$0xff] }
 0xb68   :  { %3364 = vmatprep.subr.mxu1 %v3496_v7 }
 0xb69   :  { %3365 = vmatpush3.msra.mxu1 %v2832_v9 }
 0xb6a   :  { %3366 = vmatprep.subr.mxu1 %v3496_v7 }
 0xb6b   :  { %3367 = vmatpush3.msra.mxu1 %v2831_v10 }
 0xb6c   :  { %3368 = vmatprep.subr.mxu1 %v3496_v7 }
 0xb6d   :  { %3369 = vmatpush3.msra.mxu1 %v2830_v11  ;;  %v2640_v11 = vld [vmem:[%s4445_s11 + $0x40] sm:$0xff] }
 0xb6e   :  { %3370 = vmatprep.subr.mxu1 %v3496_v7 }
 0xb6f   :  { %3371 = vmatpush3.msra.mxu1 %v2829_v12  ;;  %v2639_v12 = vld [vmem:[%s4445_s11 + $0x38] sm:$0xff] }
 0xb70   :  { %3372 = vmatprep.subr.mxu1 %v3496_v7 }
 0xb71   :  { %v2070_v14 = vpop.f32.mrf.mxu0  ;;  %3373 = vmatpush3.msra.mxu1 %v2828_v13  ;;  %v2638_v13 = vld [vmem:[%s4445_s11 + $0x30] sm:$0xff] }
 0xb72   :  { %3375 = vmatmul.mubr.msk.f32.vlgmr.msra.gmra.mxu1 %vm50_vm0, %v3665_v30  ;;  %3382 = vmatprep.subr.mxu1 %v3496_v7  ;;  %v2153_v25 = vmul.f32 %v2070_v14, %v3896_v20  ;;  %v2156_v26 = vmul.f32 %v2070_v14, %v3901_v21  ;;  %v2636_v14 = vld [vmem:[%s4445_s11 + $0x20] sm:$0xff] }
 0xb73   :  { %v3357_v16 = vpop.f32.mrf.mxu0  ;;  %3383 = vmatpush3.xpose.msk.msra.mxu1 %vm729_vm2, %v3918_v40  ;;  %3384 = vmatprep.mubr.msk.f32.mxu1 %vm3497_vm1, %v3496_v7 }
 0xb74   :  { %3392 = vmatprep.subr.mxu1 %v3496_v7  ;;  %v2635_v16 = vld [vmem:[%s4445_s11 + $0x18] sm:$0xff] }
 0xc22   :  { %v1990_v19 = vpop.f32.mrf.mxu1 }
 0xc23   :  { %v4262_v22 = vadd.f32 %v1990_v19, %v1513_v18  ;;  %v2634_v18 = vld [vmem:[%s4445_s11 + $0x10] sm:$0xff]  ;;  %v2633_v19 = vld [vmem:[%s4445_s11 + $0x8] sm:$0xff] }
 0xc24   :  { %v3338_v23 = vpop.f32.mrf.mxu1 }
 0xc25   :  { %v2632_v23 = vld [vmem:[%s4445_s11] sm:$0xff] }
 0xc32   :  { %v2149_v24 = vpop.f32.mrf.mxu1 }
 0xc33   :  { %v2154_v28 = vmul.f32 %v2149_v24, %v3901_v21  ;;  %v2157_v40 = vmul.f32 %v2149_v24, %v3896_v20 }
 0xc34   :  { %v3376_v31 = vpop.f32.mrf.mxu1 }
 0xc35   :  { %v2155_v32 = vsub.f32 %v2153_v25, %v2154_v28  ;;  %v2158_v33 = vadd.f32 %v2157_v40, %v2156_v26 }
 0xc37   :  { %3380 = vmatmul.mubr.msk.f32.vlgmr.msra.gmra.mxu0 %vm729_vm2, %v2158_v33  ;;  %3385 = vmatmul.mubr.msk.f32.vlgmr.msra.gmra.mxu1 %vm729_vm2, %v2155_v32 }
 0xc38   :  { %3388 = vmatpush3.msra.mxu0 %v3922_v43  ;;  %3389 = vmatprep.mubr.msk.f32.mxu0 %vm3497_vm1, %v3496_v7 }
 0xc39   :  { %3399 = vmatprep.subr.mxu0 %v3496_v7  ;;  %3396 = vmatprep.mubr.msk.f32.mxu1 %vm3497_vm1, %v3496_v7 }
 0xc3a   :  { %3393 = vmatpush3.msra.mxu1 %v2843_v29 }
 0xc3b   :  { %3394 = vmatprep.subr.mxu1 %v3496_v7 }
 0xc3c   :  { %3395 = vmatpush3.msra.mxu1 %v2842_v62 }
 0xc3d   :  { %3418 = vmatprep.subr.mxu1 %v3496_v7 }
 0xcf7   :  { %v2228_v21 = vpop.f32.mrf.mxu0  ;;  %v2301_v15 = vpop.f32.mrf.mxu1 }
 0xcf8   :  { %v2302_v20 = vadd.f32 %v2301_v15, %v2228_v21 }
 0xcf9   :  { %v3381_v27 = vpop.f32.mrf.mxu0  ;;  %v3386_v34 = vpop.f32.mrf.mxu1 }
 0xcfa   :  { %v2305_v35 = vmul.f32 0.25, %v2302_v20 }
 0xcfc   :  { %v2306_v36 = vsel %vm80_vm3, %v2305_v35, -1e+30 }
 0xcfd   :  { %v2307_v43 = vsel %vm729_vm2, %v2306_v36, -inf }
 0xcfe   :  { %2308 = vmax.xlane.f32.xlu0 %v2307_v43 }
 0xd87   :  { %v2309_v37 = vpop.xlane.xlu0 %2308 }
 0xd88   :  { %v2310_v38 = vsub.f32 %v2306_v36, %v2309_v37 }
 0xd8a   :  { %v2311_v39 = vmul.f32 1.442695, %v2310_v38 }
 0xd8c   :  { %3488 = vpow2.f32 %v2311_v39 }
 0xd99   :  { %v3489_v42 = vpop.eup %3488 }
 0xd9a   :  { %v2313_v44 = vsel %vm729_vm2, %v3489_v42, 0.0 }
 0xd9b   :  { %2314 = vadd.xlane.f32.xlu1 %v2313_v44 }
 0xe24   :  { %v2315_v63 = vpop.xlane.xlu1 %2314 }
 0xe25   :  { %3490 = vrcp.f32 %v2315_v63 }
 0xe32   :  { %v3491_v45 = vpop.eup %3490 }
 0xe33   :  { %v2317_v46 = vmul.f32 %v3491_v45, %v3489_v42 }
 0xe35   :  { %3390 = vmatmul.mubr.msk.f32.vlgmr.msra.gmra.mxu0 %vm729_vm2, %v2317_v46 }
 0xe36   :  { %3400 = vmatpush3.msra.mxu0 %v2475_v47  ;;  %3415 = vmatprep.mubr.msk.f32.mxu0 %vm3497_vm1, %v3496_v7 }
 0xe37   :  { %3401 = vmatprep.subr.mxu0 %v3496_v7 }
 0xe38   :  { %3402 = vmatpush3.msra.mxu0 %v2474_v48 }
 0xe39   :  { %3403 = vmatprep.subr.mxu0 %v3496_v7 }
 0xe3a   :  { %3404 = vmatpush3.msra.mxu0 %v2473_v49 }
 0xe3b   :  { %3405 = vmatprep.subr.mxu0 %v3496_v7 }
 0xe3c   :  { %3406 = vmatpush3.msra.mxu0 %v2472_v50 }
 0xe3d   :  { %3407 = vmatprep.subr.mxu0 %v3496_v7 }
 0xe3e   :  { %3408 = vmatpush3.msra.mxu0 %v2471_v17 }
 0xe3f   :  { %3409 = vmatprep.subr.mxu0 %v3496_v7 }
 0xe40   :  { %3410 = vmatpush3.msra.mxu0 %v2470_v51 }
 0xe41   :  { %3411 = vmatprep.subr.mxu0 %v3496_v7 }
 0xe42   :  { %3412 = vmatpush3.msra.mxu0 %v2469_v52 }
 0xe43   :  { %3413 = vmatprep.subr.mxu0 %v3496_v7 }
 0xe44   :  { %3414 = vmatpush3.msra.mxu0 %v2468_v53 }
 0xe45   :  { %3416 = vmatmul.mubr.msk.f32.vlgmr.msra.gmra.mxu0 %vm50_vm0, %v3665_v30  ;;  %3437 = vmatprep.subr.mxu0 %v3496_v7 }
 0xe46   :  { %3469 = vmatprep.mubr.msk.f32.mxu0 %vm3497_vm1, %v3496_v7  ;;  %3438 = vmatpush3.msra.mxu0 %v2647_v54 }
 0xe47   :  { %3439 = vmatprep.subr.mxu0 %v3496_v7 }
 0xe48   :  { %3440 = vmatpush3.msra.mxu0 %v2646_v55 }
 0xe49   :  { %3441 = vmatprep.subr.mxu0 %v3496_v7 }
 0xe4a   :  { %3442 = vmatpush3.msra.mxu0 %v2645_v56 }
 0xe4b   :  { %3443 = vmatprep.subr.mxu0 %v3496_v7 }
 0xe4c   :  { %3444 = vmatpush3.msra.mxu0 %v2644_v57 }
 0xe4d   :  { %3445 = vmatprep.subr.mxu0 %v3496_v7 }
 0xe4e   :  { %3446 = vmatpush3.msra.mxu0 %v2643_v58 }
 0xe4f   :  { %3447 = vmatprep.subr.mxu0 %v3496_v7 }
 0xe50   :  { %3448 = vmatpush3.msra.mxu0 %v2642_v59 }
 0xe51   :  { %3449 = vmatprep.subr.mxu0 %v3496_v7 }
 0xe52   :  { %3450 = vmatpush3.msra.mxu0 %v2641_v60 }
 0xe53   :  { %3451 = vmatprep.subr.mxu0 %v3496_v7 }
 0xe54   :  { %3452 = vmatpush3.msra.mxu0 %v2640_v11 }
 0xe55   :  { %3453 = vmatprep.subr.mxu0 %v3496_v7 }
 0xe56   :  { %3454 = vmatpush3.msra.mxu0 %v2639_v12 }
 0xe57   :  { %3455 = vmatprep.subr.mxu0 %v3496_v7 }
 0xe58   :  { %3456 = vmatpush3.msra.mxu0 %v2638_v13 }
 0xe59   :  { %3457 = vmatprep.subr.mxu0 %v3496_v7 }
 0xef5   :  { %v2387_v0 = vpop.f32.mrf.mxu0 }
 0xef6   :  { %3397 = vmatmul.mubr.msk.f32.vlgmr.msra.gmra.mxu1 %vm1369_vm4, %v2387_v0 }
 0xef7   :  { %3419 = vmatpush3.msra.mxu1 %v2553_v61  ;;  %v3391_v2 = vpop.f32.mrf.mxu0  ;;  %3434 = vmatprep.mubr.msk.f32.mxu1 %vm3497_vm1, %v3496_v7 }
 0xef8   :  { %3420 = vmatprep.subr.mxu1 %v3496_v7 }
 0xef9   :  { %3421 = vmatpush3.msra.mxu1 %v2552_v1 }
 0xefa   :  { %3422 = vmatprep.subr.mxu1 %v3496_v7 }
 0xefb   :  { %3423 = vmatpush3.msra.mxu1 %v2551_v3 }
 0xefc   :  { %3424 = vmatprep.subr.mxu1 %v3496_v7 }
 0xefd   :  { %3425 = vmatpush3.msra.mxu1 %v2550_v4 }
 0xefe   :  { %3426 = vmatprep.subr.mxu1 %v3496_v7 }
 0xeff   :  { %3427 = vmatpush3.msra.mxu1 %v2549_v5 }
 0xf00   :  { %3428 = vmatprep.subr.mxu1 %v3496_v7 }
 0xf01   :  { %3429 = vmatpush3.msra.mxu1 %v2548_v6 }
 0xf02   :  { %3430 = vmatprep.subr.mxu1 %v3496_v7 }
 0xf03   :  { %3431 = vmatpush3.msra.mxu1 %v2547_v8 }
 0xf04   :  { %3432 = vmatprep.subr.mxu1 %v3496_v7 }
 0xf05   :  { %v2542_v9 = vpop.f32.mrf.mxu0  ;;  %3433 = vmatpush3.msra.mxu1 %v2546_v41 }
 0xf06   :  { %3435 = vmatmul.mubr.msk.f32.vlgmr.msra.gmra.mxu1 %vm50_vm0, %v3665_v30  ;;  %v2637_v30 = vld [vmem:[%s4445_s11 + $0x28] sm:$0xff]  ;;  %v2847_v24 = vmul.f32 -1.442695, %v2542_v9 }
 0xf07   :  { %v3417_v10 = vpop.f32.mrf.mxu0  ;;  %3458 = vmatpush3.msra.mxu0 %v2637_v30 }
 0xf08   :  { %3459 = vmatprep.subr.mxu0 %v3496_v7  ;;  %3492 = vpow2.f32 %v2847_v24 }
 0xf09   :  { %3460 = vmatpush3.msra.mxu0 %v2636_v14 }
 0xf0a   :  { %3461 = vmatprep.subr.mxu0 %v3496_v7 }
 0xf0b   :  { %3462 = vmatpush3.msra.mxu0 %v2635_v16 }
 0xf0c   :  { %3463 = vmatprep.subr.mxu0 %v3496_v7 }
 0xf0d   :  { %3464 = vmatpush3.msra.mxu0 %v2634_v18 }
 0xf0e   :  { %3465 = vmatprep.subr.mxu0 %v3496_v7 }
 0xf0f   :  { %3466 = vmatpush3.msra.mxu0 %v2633_v19 }
 0xf10   :  { %3467 = vmatprep.subr.mxu0 %v3496_v7 }
 0xf11   :  { %3468 = vmatpush3.msra.mxu0 %v2632_v23 }
 0xf15   :  { %v3493_v25 = vpop.eup %3492 }
 0xf16   :  { %v2627_v26 = vadd.f32 1.0, %v3493_v25 }
 0xf18   :  { %3494 = vrcp.f32 %v2627_v26 }
 0xf25   :  { %v3495_v32 = vpop.eup %3494 }
 0xf26   :  { %v2630_v33 = vmul.f32 %v3495_v32, %v2542_v9 }
 0xfb6   :  { %v2463_v28 = vpop.f32.mrf.mxu1 }
 0xfb7   :  { %v2467_v40 = vadd.f32 %v2463_v28, %v4262_v22 }
 0xfb8   :  { %v3398_v31 = vpop.f32.mrf.mxu1 }
 0xfc6   :  { %v2620_v21 = vpop.f32.mrf.mxu1 }
 0xfc7   :  { %v2631_v15 = vmul.f32 %v2630_v33, %v2620_v21 }
 0xfc8   :  { %v3436_v20 = vpop.f32.mrf.mxu1 }
 0xfc9   :  { %3470 = vmatmul.mubr.f32.vlgmr.msra.gmra.mxu0 %v2631_v15 }
0x1089   :  { %v2714_v7 = vpop.f32.mrf.mxu0 }
0x108a   :  { %v2718_v27 = vadd.f32 %v2714_v7, %v2467_v40 }
0x108b   :  { %v3471_v34 = vpop.f32.mrf.mxu0 }
0x108c   :  { %2719 = vst.msk [vmem:[%s4447_s14] sm:$0xff] %vm50_vm0, %v2718_v27 }

</bundles_post_ra>
